<compile_context>
chip_gen: v7x
topology: tpu7x:2x2x1
jax: 0.10.0
libtpu: 0.0.40
codegen_flags: <defaults>
</compile_context>

<pallas_src>
import functools

import jax
import jax.numpy as jnp
from jax import lax
from jax.experimental import pallas as pl
from jax.experimental.pallas import tpu as pltpu

BN_EPS = 1e-5
LANE = 128
VMEM_LIMIT = 64 * 1024 * 1024


def _round_up(x, m):
    return (x + m - 1) // m * m


def _pick_row_tile(h):
    """Largest row tile <= 32 that divides H and leaves at least two tiles."""
    for t in (32, 16, 8, 4, 2):
        if h % t == 0 and h // t >= 2:
            return t
    return h


# --------------------------------------------------------------------------------------
# Kernels
# --------------------------------------------------------------------------------------
def _conv3x3_stats_kernel(win_ref, scale_ref, shift_ref, w_ref, b_ref,
                          y_ref, sum_ref, sq_ref,
                          *, apply_act, tile_h, width):
    """One (n, h-tile) step: [optional BN-affine+ReLU on the input] -> 3x3 conv (pad=1)
    -> raw conv output tile + per-channel partial sums for the *next* BatchNorm.

    win_ref:   (1, TH+2, Wp, Cin_p)   input window incl. 1-row/1-col halo (raw), f32
    scale_ref: (1, Cin_p)             previous layer's folded BN scale (unused if not apply_act)
    shift_ref: (1, Cin_p)             previous layer's folded BN shift
    w_ref:     (3, 3, Cin_p, Cout_p)  conv weights (HWIO), bf16
    b_ref:     (1, Cout_p)            conv bias, f32
    y_ref:     (1, TH, W, Cout_p)     raw conv output tile (f32, dense / lane-aligned store)
    sum_ref:   (1, 1, Cout_p)         per-batch running sum   (revisited across the h axis)
    sq_ref:    (1, 1, Cout_p)         per-batch running sum^2 (revisited across the h axis)
    """
    h = pl.program_id(1)
    nh = pl.num_programs(1)
    cin = win_ref.shape[-1]
    cout = y_ref.shape[-1]
    wp = win_ref.shape[2]

    xw = win_ref[0]                                        # (TH+2, Wp, Cin_p) f32
    if apply_act:
        # Fused BatchNorm(prev) + ReLU of the previous layer's raw conv output.
        s = scale_ref[...].reshape(1, 1, cin)
        t = shift_ref[...].reshape(1, 1, cin)
        xw = jnp.maximum(xw * s + t, 0.0)
        # The window was built from the *raw* previous output, so positions that are the conv's
        # zero padding (left/right columns, out-of-image halo rows, width round-up columns)
        # became relu(shift) above -- force them back to zero.
        row = lax.broadcasted_iota(jnp.int32, xw.shape, 0)
        col = lax.broadcasted_iota(jnp.int32, xw.shape, 1)
        valid = (col >= 1) & (col <= width)
        valid &= jnp.logical_or(row > 0, h > 0)                 # top halo row real?
        valid &= jnp.logical_or(row < tile_h + 1, h < nh - 1)   # bottom halo row real?
        xw = jnp.where(valid, xw, 0.0)
    xw = xw.astype(jnp.bfloat16)                           # bf16 MXU operands, f32 accumulation

    # 3x3 conv as 9 lane-dense MXU matmuls: (TH*W, Cin_p) x (Cin_p, Cout_p).
    acc = jnp.zeros((tile_h * width, cout), jnp.float32)
    for dx in range(3):
        # Width-shifted view; dx=0 is sublane aligned, dx=1,2 cost one small relayout each
        # (hoisted out of the dy loop). Flattening (rows, W) keeps M = TH*W contiguous.
        xd = xw[:, dx:dx + width, :].reshape((tile_h + 2) * width, cin)
        for dy in range(3):
            lhs = xd[dy * width:(dy + tile_h) * width, :]
            acc = acc + jnp.dot(lhs, w_ref[dy, dx],
                                preferred_element_type=jnp.float32)
    acc = acc + b_ref[...]                                 # (1, Cout_p) broadcast

    # Partial BN statistics of the raw conv output, accumulated across the h (row-tile) axis.
    psum = jnp.sum(acc, axis=0, keepdims=True)             # (1, Cout_p)
    psq = jnp.sum(acc * acc, axis=0, keepdims=True)        # (1, Cout_p)

    @pl.when(h == 0)
    def _init():
        sum_ref[...] = jnp.zeros_like(sum_ref)
        sq_ref[...] = jnp.zeros_like(sq_ref)

    sum_ref[...] += psum.reshape(1, 1, cout)
    sq_ref[...] += psq.reshape(1, 1, cout)

    y_ref[0] = acc.reshape(tile_h, width, cout)            # dense, lane-aligned store


def _bn_relu_kernel(y_ref, scale_ref, shift_ref, o_ref):
    """Elementwise finalize: out = relu(y * scale + shift)."""
    c = y_ref.shape[-1]
    s = scale_ref[...].reshape(1, 1, 1, c)
    t = shift_ref[...].reshape(1, 1, 1, c)
    o_ref[...] = jnp.maximum(y_ref[...] * s + t, 0.0)


# --------------------------------------------------------------------------------------
# pallas_call wrappers
# --------------------------------------------------------------------------------------
def _conv3x3_stats_pass(windows, scale, shift, w, b, *, apply_act, n, tile_h, nh, width):
    cin = windows.shape[-1]
    wp = windows.shape[2]
    cout = w.shape[-1]
    kernel = functools.partial(_conv3x3_stats_kernel, apply_act=apply_act,
                               tile_h=tile_h, width=width)
    flops = 2 * n * nh * tile_h * width * 9 * cin * cout
    bytes_accessed = (windows.size * 4 + w.size * 2 + b.size * 4
                      + n * nh * tile_h * width * cout * 4 + 2 * n * cout * 4)
    return pl.pallas_call(
        kernel,
        out_shape=(
            jax.ShapeDtypeStruct((n, nh * tile_h, width, cout), jnp.float32),  # raw conv out
            jax.ShapeDtypeStruct((n, 1, cout), jnp.float32),                   # per-batch sum
            jax.ShapeDtypeStruct((n, 1, cout), jnp.float32),                   # per-batch sum^2
        ),
        grid=(n, nh),
        in_specs=[
            pl.BlockSpec((1, tile_h + 2, wp, cin), lambda i, j: (i * nh + j, 0, 0, 0)),
            pl.BlockSpec((1, cin), lambda i, j: (0, 0)),
            pl.BlockSpec((1, cin), lambda i, j: (0, 0)),
            pl.BlockSpec((3, 3, cin, cout), lambda i, j: (0, 0, 0, 0)),
            pl.BlockSpec((1, cout), lambda i, j: (0, 0)),
        ],
        out_specs=(
            pl.BlockSpec((1, tile_h, width, cout), lambda i, j: (i, j, 0, 0)),
            pl.BlockSpec((1, 1, cout), lambda i, j: (i, 0, 0)),   # revisited across j
            pl.BlockSpec((1, 1, cout), lambda i, j: (i, 0, 0)),   # revisited across j
        ),
        compiler_params=pltpu.CompilerParams(
            dimension_semantics=("parallel", "arbitrary"),
            vmem_limit_bytes=VMEM_LIMIT),
        cost_estimate=pl.CostEstimate(flops=flops, transcendentals=0,
                                      bytes_accessed=bytes_accessed),
    )(windows, scale, shift, w, b)


def _bn_relu_pass(y, scale, shift, *, tile_h):
    n, hh, width, c = y.shape
    nh = hh // tile_h
    return pl.pallas_call(
        _bn_relu_kernel,
        out_shape=jax.ShapeDtypeStruct((n, hh, width, c), jnp.float32),
        grid=(n, nh),
        in_specs=[
            pl.BlockSpec((1, tile_h, width, c), lambda i, j: (i, j, 0, 0)),
            pl.BlockSpec((1, c), lambda i, j: (0, 0)),
            pl.BlockSpec((1, c), lambda i, j: (0, 0)),
        ],
        out_specs=pl.BlockSpec((1, tile_h, width, c), lambda i, j: (i, j, 0, 0)),
        compiler_params=pltpu.CompilerParams(
            dimension_semantics=("parallel", "parallel"),
            vmem_limit_bytes=VMEM_LIMIT),
    )(y, scale, shift)


# --------------------------------------------------------------------------------------
# Host-side glue
# --------------------------------------------------------------------------------------
def _build_windows(a, tile_h):
    """a: (N, H, W, C) dense activation.  Returns (N*nH, TH+2, Wp, C) overlapping row windows
    with a 1-row / 1-col zero halo (the 3x3 conv's padding); width padded to a sublane multiple."""
    n, hh, width, c = a.shape
    nh = hh // tile_h
    wp = _round_up(width + 2, 8)
    ap = jnp.pad(a, ((0, 0), (1, 1), (1, wp - width - 1), (0, 0)))
    rows = jnp.arange(nh)[:, None] * tile_h + jnp.arange(tile_h + 2)[None, :]   # (nH, TH+2)
    win = ap[:, rows]                                                           # (N, nH, TH+2, Wp, C)
    return win.reshape(n * nh, tile_h + 2, wp, c)


def _bn_affine(ssum, ssq, gamma, beta, count):
    """Per-batch partial sums (N,1,Cp) -> per-channel (1,Cp) BN scale/shift (training mode)."""
    total = jnp.sum(ssum, axis=0)                     # (1, Cp)
    total_sq = jnp.sum(ssq, axis=0)                   # (1, Cp)
    mean = total / count
    var = jnp.maximum(total_sq / count - mean * mean, 0.0)   # biased variance
    scale = gamma.reshape(1, -1) * lax.rsqrt(var + BN_EPS)
    shift = beta.reshape(1, -1) - mean * scale
    return scale, shift


@jax.jit
def conv_block_forward(x_nchw, params):
    """Mirrors conv_block.forward (training-mode BatchNorm).  x: (N, Cin, H, W) -> (N, Cout, H, W)."""
    n, cin, hh, width = x_nchw.shape
    cout = params[-1][0].shape[-1]
    tile_h = _pick_row_tile(hh)
    nh = hh // tile_h
    count = n * hh * width

    x = jnp.transpose(x_nchw, (0, 2, 3, 1)).astype(jnp.float32)   # NCHW -> NHWC
    cin_p = _round_up(cin, LANE)
    cur = jnp.pad(x, ((0, 0), (0, 0), (0, 0), (0, cin_p - cin)))  # lane-dense channels

    pending = None   # previous layer's (scale, shift), folded into the next conv pass
    for (w, b, gamma, beta) in params:
        ci, co = w.shape[2], w.shape[3]
        ci_p, co_p = _round_up(ci, LANE), _round_up(co, LANE)
        assert ci_p == cur.shape[-1]
        w_p = jnp.pad(w, ((0, 0), (0, 0), (0, ci_p - ci), (0, co_p - co))).astype(jnp.bfloat16)
        b_p = jnp.pad(b.reshape(-1), (0, co_p - co)).reshape(1, co_p)
        g_p = jnp.pad(gamma.reshape(-1), (0, co_p - co))   # padded channels get gamma=0 -> output 0
        be_p = jnp.pad(beta.reshape(-1), (0, co_p - co))

        if pending is None:
            scale = jnp.ones((1, ci_p), jnp.float32)   # unused (apply_act=False)
            shift = jnp.zeros((1, ci_p), jnp.float32)
        else:
            scale, shift = pending

        windows = _build_windows(cur, tile_h)
        y, ssum, ssq = _conv3x3_stats_pass(
            windows, scale, shift, w_p, b_p,
            apply_act=pending is not None, n=n, tile_h=tile_h, nh=nh, width=width)
        pending = _bn_affine(ssum, ssq, g_p, be_p, count)
        cur = y

    out = _bn_relu_pass(cur, pending[0], pending[1], tile_h=tile_h)
    out = out[:, :, :, :cout]
    return jnp.transpose(out, (0, 3, 1, 2))              # NHWC -> NCHW


# --------------------------------------------------------------------------------------
# Reference + test harness
# --------------------------------------------------------------------------------------
def reference_forward(x_nchw, params):
    """Pure-JAX f32 reference (lax conv + training-mode BN + ReLU)."""
    x = jnp.transpose(x_nchw, (0, 2, 3, 1)).astype(jnp.float32)
    for (w, b, gamma, beta) in params:
        y = lax.conv_general_dilated(
            x, w, window_strides=(1, 1), padding="SAME",
            dimension_numbers=("NHWC", "HWIO", "NHWC")) + b.reshape(1, 1, 1, -1)
        mean = jnp.mean(y, axis=(0, 1, 2), keepdims=True)
        var = jnp.mean((y - mean) ** 2, axis=(0, 1, 2), keepdims=True)
        x = jnp.maximum((y - mean) * lax.rsqrt(var + BN_EPS)
                        * gamma.reshape(1, 1, 1, -1) + beta.reshape(1, 1, 1, -1), 0.0)
    return jnp.transpose(x, (0, 3, 1, 2))


def init_params(key, ch_in, ch_out):
    """Deterministic synthetic parameters matching nn.Conv2d / nn.BatchNorm2d shapes."""
    params = []
    c_in = ch_in
    for _ in range(2):
        key, k_w, k_b, k_g, k_be = jax.random.split(key, 5)
        fan_in = c_in * 3 * 3
        bound = 1.0 / (fan_in ** 0.5)
        w = jax.random.uniform(k_w, (3, 3, c_in, ch_out), jnp.float32, -bound, bound)  # HWIO
        b = jax.random.uniform(k_b, (ch_out,), jnp.float32, -bound, bound)
        gamma = 1.0 + 0.1 * jax.random.normal(k_g, (ch_out,), jnp.float32)
        beta = 0.1 * jax.random.normal(k_be, (ch_out,), jnp.float32)
        params.append((w, b, gamma, beta))
        c_in = ch_out
    return params


if __name__ == "__main__":
    key = jax.random.PRNGKey(0)
    k_x, k_p = jax.random.split(key)

    N, CH_IN, CH_OUT, H, W = 2, 4, 8, 16, 16
    x = jax.random.normal(k_x, (N, CH_IN, H, W), jnp.float32)   # NCHW like PyTorch
    params = init_params(k_p, CH_IN, CH_OUT)

    out = jax.block_until_ready(conv_block_forward(x, params))
    assert out.shape == (N, CH_OUT, H, W)

    ref = jax.block_until_ready(reference_forward(x, params))
    # bf16 MXU operands (with f32 accumulation) -> compare with a bf16-appropriate tolerance.
    assert jnp.allclose(out, ref, atol=5e-2, rtol=5e-2), \
        f"max abs err {jnp.max(jnp.abs(out - ref))}"

    print("KERNEL_OK")
</pallas_src>

<mosaic_0001>
module attributes {stable_mosaic.version = 11 : i64} {
  func.func @_conv3x3_stats_kernel(%arg0: i32, %arg1: i32, %arg2: memref<1x10x24x128xf32, #tpu.memory_space<vmem>>, %arg3: memref<1x128xf32, #tpu.memory_space<vmem>>, %arg4: memref<1x128xf32, #tpu.memory_space<vmem>>, %arg5: memref<3x3x128x128xbf16, #tpu.memory_space<vmem>>, %arg6: memref<1x128xf32, #tpu.memory_space<vmem>>, %arg7: memref<1x8x16x128xf32, #tpu.memory_space<vmem>>, %arg8: memref<1x1x128xf32, #tpu.memory_space<vmem>>, %arg9: memref<1x1x128xf32, #tpu.memory_space<vmem>>) attributes {dimension_semantics = [#tpu.dimension_semantics<parallel>, #tpu.dimension_semantics<arbitrary>], iteration_bounds = array<i64: 2, 2>, scalar_prefetch = 0 : i64, scratch_operands = 0 : i64, tpu.core_type = #tpu.core_type<tc>, window_params = [{transform_indices = @transform_0, window_bounds = array<i64: 1, 10, 24, 128>}, {pipeline_mode = #tpu.pipeline_mode<synchronous>, transform_indices = @transform_1, window_bounds = array<i64: 1, 128>}, {pipeline_mode = #tpu.pipeline_mode<synchronous>, transform_indices = @transform_2, window_bounds = array<i64: 1, 128>}, {pipeline_mode = #tpu.pipeline_mode<synchronous>, transform_indices = @transform_3, window_bounds = array<i64: 3, 3, 128, 128>}, {pipeline_mode = #tpu.pipeline_mode<synchronous>, transform_indices = @transform_4, window_bounds = array<i64: 1, 128>}, {transform_indices = @transform_5, window_bounds = array<i64: 1, 8, 16, 128>}, {transform_indices = @transform_6, window_bounds = array<i64: 1, 1, 128>}, {transform_indices = @transform_7, window_bounds = array<i64: 1, 1, 128>}]} {
    %c0 = arith.constant 0 : index
    %c0_0 = arith.constant 0 : index
    %c0_1 = arith.constant 0 : index
    %c0_2 = arith.constant 0 : index
    %0 = vector.load %arg2[%c0, %c0_0, %c0_1, %c0_2] : memref<1x10x24x128xf32, #tpu.memory_space<vmem>>, vector<1x10x24x128xf32>
    %1 = vector.shape_cast %0 : vector<1x10x24x128xf32> to vector<10x24x128xf32>
    %2 = arith.truncf %1 : vector<10x24x128xf32> to vector<10x24x128xbf16>
    %cst = arith.constant 0.000000e+00 : f32
    %3 = vector.broadcast %cst : f32 to vector<128x128xf32>
    %4 = vector.extract_strided_slice %2 {offsets = [0, 0, 0], sizes = [10, 16, 128], strides = [1, 1, 1]} : vector<10x24x128xbf16> to vector<10x16x128xbf16>
    %5 = vector.shape_cast %4 : vector<10x16x128xbf16> to vector<160x128xbf16>
    %6 = vector.extract_strided_slice %5 {offsets = [0, 0], sizes = [128, 128], strides = [1, 1]} : vector<160x128xbf16> to vector<128x128xbf16>
    %c0_3 = arith.constant 0 : index
    %c0_4 = arith.constant 0 : index
    %c0_5 = arith.constant 0 : index
    %c0_6 = arith.constant 0 : index
    %7 = vector.load %arg5[%c0_3, %c0_4, %c0_5, %c0_6] : memref<3x3x128x128xbf16, #tpu.memory_space<vmem>>, vector<1x1x128x128xbf16>
    %8 = vector.shape_cast %7 : vector<1x1x128x128xbf16> to vector<128x128xbf16>
    %cst_7 = arith.constant dense<0.000000e+00> : vector<128x128xf32>
    %9 = tpu.matmul %6, %8, %cst_7 {dimension_numbers = #tpu.dot_dimension_numbers<[1], [0], [0], [1], [0, 0, 1, 1], [], []>} : vector<128x128xbf16>, vector<128x128xbf16>, vector<128x128xf32> -> vector<128x128xf32>
    %10 = arith.addf %3, %9 : vector<128x128xf32>
    %11 = vector.extract_strided_slice %5 {offsets = [16, 0], sizes = [128, 128], strides = [1, 1]} : vector<160x128xbf16> to vector<128x128xbf16>
    %c1 = arith.constant 1 : index
    %c0_8 = arith.constant 0 : index
    %c0_9 = arith.constant 0 : index
    %c0_10 = arith.constant 0 : index
    %12 = vector.load %arg5[%c1, %c0_8, %c0_9, %c0_10] : memref<3x3x128x128xbf16, #tpu.memory_space<vmem>>, vector<1x1x128x128xbf16>
    %13 = vector.shape_cast %12 : vector<1x1x128x128xbf16> to vector<128x128xbf16>
    %cst_11 = arith.constant dense<0.000000e+00> : vector<128x128xf32>
    %14 = tpu.matmul %11, %13, %cst_11 {dimension_numbers = #tpu.dot_dimension_numbers<[1], [0], [0], [1], [0, 0, 1, 1], [], []>} : vector<128x128xbf16>, vector<128x128xbf16>, vector<128x128xf32> -> vector<128x128xf32>
    %15 = arith.addf %10, %14 : vector<128x128xf32>
    %16 = vector.extract_strided_slice %5 {offsets = [32, 0], sizes = [128, 128], strides = [1, 1]} : vector<160x128xbf16> to vector<128x128xbf16>
    %c2 = arith.constant 2 : index
    %c0_12 = arith.constant 0 : index
    %c0_13 = arith.constant 0 : index
    %c0_14 = arith.constant 0 : index
    %17 = vector.load %arg5[%c2, %c0_12, %c0_13, %c0_14] : memref<3x3x128x128xbf16, #tpu.memory_space<vmem>>, vector<1x1x128x128xbf16>
    %18 = vector.shape_cast %17 : vector<1x1x128x128xbf16> to vector<128x128xbf16>
    %cst_15 = arith.constant dense<0.000000e+00> : vector<128x128xf32>
    %19 = tpu.matmul %16, %18, %cst_15 {dimension_numbers = #tpu.dot_dimension_numbers<[1], [0], [0], [1], [0, 0, 1, 1], [], []>} : vector<128x128xbf16>, vector<128x128xbf16>, vector<128x128xf32> -> vector<128x128xf32>
    %20 = arith.addf %15, %19 : vector<128x128xf32>
    %21 = vector.extract_strided_slice %2 {offsets = [0, 1, 0], sizes = [10, 16, 128], strides = [1, 1, 1]} : vector<10x24x128xbf16> to vector<10x16x128xbf16>
    %22 = vector.shape_cast %21 : vector<10x16x128xbf16> to vector<160x128xbf16>
    %23 = vector.extract_strided_slice %22 {offsets = [0, 0], sizes = [128, 128], strides = [1, 1]} : vector<160x128xbf16> to vector<128x128xbf16>
    %c0_16 = arith.constant 0 : index
    %c1_17 = arith.constant 1 : index
    %c0_18 = arith.constant 0 : index
    %c0_19 = arith.constant 0 : index
    %24 = vector.load %arg5[%c0_16, %c1_17, %c0_18, %c0_19] : memref<3x3x128x128xbf16, #tpu.memory_space<vmem>>, vector<1x1x128x128xbf16>
    %25 = vector.shape_cast %24 : vector<1x1x128x128xbf16> to vector<128x128xbf16>
    %cst_20 = arith.constant dense<0.000000e+00> : vector<128x128xf32>
    %26 = tpu.matmul %23, %25, %cst_20 {dimension_numbers = #tpu.dot_dimension_numbers<[1], [0], [0], [1], [0, 0, 1, 1], [], []>} : vector<128x128xbf16>, vector<128x128xbf16>, vector<128x128xf32> -> vector<128x128xf32>
    %27 = arith.addf %20, %26 : vector<128x128xf32>
    %28 = vector.extract_strided_slice %22 {offsets = [16, 0], sizes = [128, 128], strides = [1, 1]} : vector<160x128xbf16> to vector<128x128xbf16>
    %c1_21 = arith.constant 1 : index
    %c1_22 = arith.constant 1 : index
    %c0_23 = arith.constant 0 : index
    %c0_24 = arith.constant 0 : index
    %29 = vector.load %arg5[%c1_21, %c1_22, %c0_23, %c0_24] : memref<3x3x128x128xbf16, #tpu.memory_space<vmem>>, vector<1x1x128x128xbf16>
    %30 = vector.shape_cast %29 : vector<1x1x128x128xbf16> to vector<128x128xbf16>
    %cst_25 = arith.constant dense<0.000000e+00> : vector<128x128xf32>
    %31 = tpu.matmul %28, %30, %cst_25 {dimension_numbers = #tpu.dot_dimension_numbers<[1], [0], [0], [1], [0, 0, 1, 1], [], []>} : vector<128x128xbf16>, vector<128x128xbf16>, vector<128x128xf32> -> vector<128x128xf32>
    %32 = arith.addf %27, %31 : vector<128x128xf32>
    %33 = vector.extract_strided_slice %22 {offsets = [32, 0], sizes = [128, 128], strides = [1, 1]} : vector<160x128xbf16> to vector<128x128xbf16>
    %c2_26 = arith.constant 2 : index
    %c1_27 = arith.constant 1 : index
    %c0_28 = arith.constant 0 : index
    %c0_29 = arith.constant 0 : index
    %34 = vector.load %arg5[%c2_26, %c1_27, %c0_28, %c0_29] : memref<3x3x128x128xbf16, #tpu.memory_space<vmem>>, vector<1x1x128x128xbf16>
    %35 = vector.shape_cast %34 : vector<1x1x128x128xbf16> to vector<128x128xbf16>
    %cst_30 = arith.constant dense<0.000000e+00> : vector<128x128xf32>
    %36 = tpu.matmul %33, %35, %cst_30 {dimension_numbers = #tpu.dot_dimension_numbers<[1], [0], [0], [1], [0, 0, 1, 1], [], []>} : vector<128x128xbf16>, vector<128x128xbf16>, vector<128x128xf32> -> vector<128x128xf32>
    %37 = arith.addf %32, %36 : vector<128x128xf32>
    %38 = vector.extract_strided_slice %2 {offsets = [0, 2, 0], sizes = [10, 16, 128], strides = [1, 1, 1]} : vector<10x24x128xbf16> to vector<10x16x128xbf16>
    %39 = vector.shape_cast %38 : vector<10x16x128xbf16> to vector<160x128xbf16>
    %40 = vector.extract_strided_slice %39 {offsets = [0, 0], sizes = [128, 128], strides = [1, 1]} : vector<160x128xbf16> to vector<128x128xbf16>
    %c0_31 = arith.constant 0 : index
    %c2_32 = arith.constant 2 : index
    %c0_33 = arith.constant 0 : index
    %c0_34 = arith.constant 0 : index
    %41 = vector.load %arg5[%c0_31, %c2_32, %c0_33, %c0_34] : memref<3x3x128x128xbf16, #tpu.memory_space<vmem>>, vector<1x1x128x128xbf16>
    %42 = vector.shape_cast %41 : vector<1x1x128x128xbf16> to vector<128x128xbf16>
    %cst_35 = arith.constant dense<0.000000e+00> : vector<128x128xf32>
    %43 = tpu.matmul %40, %42, %cst_35 {dimension_numbers = #tpu.dot_dimension_numbers<[1], [0], [0], [1], [0, 0, 1, 1], [], []>} : vector<128x128xbf16>, vector<128x128xbf16>, vector<128x128xf32> -> vector<128x128xf32>
    %44 = arith.addf %37, %43 : vector<128x128xf32>
    %45 = vector.extract_strided_slice %39 {offsets = [16, 0], sizes = [128, 128], strides = [1, 1]} : vector<160x128xbf16> to vector<128x128xbf16>
    %c1_36 = arith.constant 1 : index
    %c2_37 = arith.constant 2 : index
    %c0_38 = arith.constant 0 : index
    %c0_39 = arith.constant 0 : index
    %46 = vector.load %arg5[%c1_36, %c2_37, %c0_38, %c0_39] : memref<3x3x128x128xbf16, #tpu.memory_space<vmem>>, vector<1x1x128x128xbf16>
    %47 = vector.shape_cast %46 : vector<1x1x128x128xbf16> to vector<128x128xbf16>
    %cst_40 = arith.constant dense<0.000000e+00> : vector<128x128xf32>
    %48 = tpu.matmul %45, %47, %cst_40 {dimension_numbers = #tpu.dot_dimension_numbers<[1], [0], [0], [1], [0, 0, 1, 1], [], []>} : vector<128x128xbf16>, vector<128x128xbf16>, vector<128x128xf32> -> vector<128x128xf32>
    %49 = arith.addf %44, %48 : vector<128x128xf32>
    %50 = vector.extract_strided_slice %39 {offsets = [32, 0], sizes = [128, 128], strides = [1, 1]} : vector<160x128xbf16> to vector<128x128xbf16>
    %c2_41 = arith.constant 2 : index
    %c2_42 = arith.constant 2 : index
    %c0_43 = arith.constant 0 : index
    %c0_44 = arith.constant 0 : index
    %51 = vector.load %arg5[%c2_41, %c2_42, %c0_43, %c0_44] : memref<3x3x128x128xbf16, #tpu.memory_space<vmem>>, vector<1x1x128x128xbf16>
    %52 = vector.shape_cast %51 : vector<1x1x128x128xbf16> to vector<128x128xbf16>
    %cst_45 = arith.constant dense<0.000000e+00> : vector<128x128xf32>
    %53 = tpu.matmul %50, %52, %cst_45 {dimension_numbers = #tpu.dot_dimension_numbers<[1], [0], [0], [1], [0, 0, 1, 1], [], []>} : vector<128x128xbf16>, vector<128x128xbf16>, vector<128x128xf32> -> vector<128x128xf32>
    %54 = arith.addf %49, %53 : vector<128x128xf32>
    %c0_46 = arith.constant 0 : index
    %c0_47 = arith.constant 0 : index
    %55 = vector.load %arg6[%c0_46, %c0_47] : memref<1x128xf32, #tpu.memory_space<vmem>>, vector<1x128xf32>
    %56 = vector.broadcast %55 : vector<1x128xf32> to vector<128x128xf32>
    %57 = arith.addf %54, %56 : vector<128x128xf32>
    %cst_48 = arith.constant dense<0.000000e+00> : vector<128xf32>
    %58 = vector.multi_reduction <add>, %57, %cst_48 [0] : vector<128x128xf32> to vector<128xf32>
    %59 = vector.shape_cast %58 : vector<128xf32> to vector<1x128xf32>
    %60 = arith.mulf %57, %57 : vector<128x128xf32>
    %cst_49 = arith.constant dense<0.000000e+00> : vector<128xf32>
    %61 = vector.multi_reduction <add>, %60, %cst_49 [0] : vector<128x128xf32> to vector<128xf32>
    %62 = vector.shape_cast %61 : vector<128xf32> to vector<1x128xf32>
    %c0_i32 = arith.constant 0 : i32
    %63 = arith.cmpi eq, %arg1, %c0_i32 : i32
    %64 = arith.extui %63 : i1 to i32
    %c0_i32_50 = arith.constant 0 : i32
    %65 = arith.cmpi ne, %64, %c0_i32_50 : i32
    scf.if %65 {
      %cst_67 = arith.constant 0.000000e+00 : f32
      %78 = vector.broadcast %cst_67 : f32 to vector<1x1x128xf32>
      %c0_68 = arith.constant 0 : index
      %c0_69 = arith.constant 0 : index
      %c0_70 = arith.constant 0 : index
      %79 = vector.load %arg8[%c0_68, %c0_69, %c0_70] : memref<1x1x128xf32, #tpu.memory_space<vmem>>, vector<1x1x128xf32>
      tpu.vector_store %arg8[%c0_68, %c0_69, %c0_70], %78 {strides = array<i32>} : memref<1x1x128xf32, #tpu.memory_space<vmem>>, vector<1x1x128xf32>,
      %cst_71 = arith.constant 0.000000e+00 : f32
      %80 = vector.broadcast %cst_71 : f32 to vector<1x1x128xf32>
      %c0_72 = arith.constant 0 : index
      %c0_73 = arith.constant 0 : index
      %c0_74 = arith.constant 0 : index
      %81 = vector.load %arg9[%c0_72, %c0_73, %c0_74] : memref<1x1x128xf32, #tpu.memory_space<vmem>>, vector<1x1x128xf32>
      tpu.vector_store %arg9[%c0_72, %c0_73, %c0_74], %80 {strides = array<i32>} : memref<1x1x128xf32, #tpu.memory_space<vmem>>, vector<1x1x128xf32>,
    } else {
    }
    %c0_51 = arith.constant 0 : index
    %c0_52 = arith.constant 0 : index
    %c0_53 = arith.constant 0 : index
    %66 = vector.load %arg8[%c0_51, %c0_52, %c0_53] : memref<1x1x128xf32, #tpu.memory_space<vmem>>, vector<1x1x128xf32>
    %67 = vector.shape_cast %59 : vector<1x128xf32> to vector<1x1x128xf32>
    %68 = arith.addf %66, %67 : vector<1x1x128xf32>
    %c0_54 = arith.constant 0 : index
    %c0_55 = arith.constant 0 : index
    %c0_56 = arith.constant 0 : index
    %69 = vector.load %arg8[%c0_54, %c0_55, %c0_56] : memref<1x1x128xf32, #tpu.memory_space<vmem>>, vector<1x1x128xf32>
    tpu.vector_store %arg8[%c0_54, %c0_55, %c0_56], %68 {strides = array<i32>} : memref<1x1x128xf32, #tpu.memory_space<vmem>>, vector<1x1x128xf32>,
    %c0_57 = arith.constant 0 : index
    %c0_58 = arith.constant 0 : index
    %c0_59 = arith.constant 0 : index
    %70 = vector.load %arg9[%c0_57, %c0_58, %c0_59] : memref<1x1x128xf32, #tpu.memory_space<vmem>>, vector<1x1x128xf32>
    %71 = vector.shape_cast %62 : vector<1x128xf32> to vector<1x1x128xf32>
    %72 = arith.addf %70, %71 : vector<1x1x128xf32>
    %c0_60 = arith.constant 0 : index
    %c0_61 = arith.constant 0 : index
    %c0_62 = arith.constant 0 : index
    %73 = vector.load %arg9[%c0_60, %c0_61, %c0_62] : memref<1x1x128xf32, #tpu.memory_space<vmem>>, vector<1x1x128xf32>
    tpu.vector_store %arg9[%c0_60, %c0_61, %c0_62], %72 {strides = array<i32>} : memref<1x1x128xf32, #tpu.memory_space<vmem>>, vector<1x1x128xf32>,
    %74 = vector.shape_cast %57 : vector<128x128xf32> to vector<8x16x128xf32>
    %c0_63 = arith.constant 0 : index
    %c0_64 = arith.constant 0 : index
    %c0_65 = arith.constant 0 : index
    %c0_66 = arith.constant 0 : index
    %75 = vector.load %arg7[%c0_63, %c0_64, %c0_65, %c0_66] : memref<1x8x16x128xf32, #tpu.memory_space<vmem>>, vector<1x8x16x128xf32>
    %76 = vector.shape_cast %75 : vector<1x8x16x128xf32> to vector<8x16x128xf32>
    %77 = vector.shape_cast %74 : vector<8x16x128xf32> to vector<1x8x16x128xf32>
    tpu.vector_store %arg7[%c0_63, %c0_64, %c0_65, %c0_66], %77 {strides = array<i32>} : memref<1x8x16x128xf32, #tpu.memory_space<vmem>>, vector<1x8x16x128xf32>,
    return
  }
  func.func @transform_0(%arg0: i32, %arg1: i32) -> (i32, i32, i32, i32) {
    %c2_i32 = arith.constant 2 : i32
    %0 = arith.muli %arg0, %c2_i32 : i32
    %1 = arith.addi %0, %arg1 : i32
    %c0_i32 = arith.constant 0 : i32
    %c0_i32_0 = arith.constant 0 : i32
    %c0_i32_1 = arith.constant 0 : i32
    %c0_i32_2 = arith.constant 0 : i32
    return %1, %c0_i32, %c0_i32_0, %c0_i32_1 : i32, i32, i32, i32
  }
  func.func @transform_1(%arg0: i32, %arg1: i32) -> (i32, i32) {
    %c0_i32 = arith.constant 0 : i32
    %c0_i32_0 = arith.constant 0 : i32
    %c0_i32_1 = arith.constant 0 : i32
    return %c0_i32, %c0_i32_0 : i32, i32
  }
  func.func @transform_2(%arg0: i32, %arg1: i32) -> (i32, i32) {
    %c0_i32 = arith.constant 0 : i32
    %c0_i32_0 = arith.constant 0 : i32
    %c0_i32_1 = arith.constant 0 : i32
    return %c0_i32, %c0_i32_0 : i32, i32
  }
  func.func @transform_3(%arg0: i32, %arg1: i32) -> (i32, i32, i32, i32) {
    %c0_i32 = arith.constant 0 : i32
    %c0_i32_0 = arith.constant 0 : i32
    %c0_i32_1 = arith.constant 0 : i32
    %c0_i32_2 = arith.constant 0 : i32
    %c0_i32_3 = arith.constant 0 : i32
    return %c0_i32, %c0_i32_0, %c0_i32_1, %c0_i32_2 : i32, i32, i32, i32
  }
  func.func @transform_4(%arg0: i32, %arg1: i32) -> (i32, i32) {
    %c0_i32 = arith.constant 0 : i32
    %c0_i32_0 = arith.constant 0 : i32
    %c0_i32_1 = arith.constant 0 : i32
    return %c0_i32, %c0_i32_0 : i32, i32
  }
  func.func @transform_5(%arg0: i32, %arg1: i32) -> (i32, i32, i32, i32) {
    %c0_i32 = arith.constant 0 : i32
    %c0_i32_0 = arith.constant 0 : i32
    %c0_i32_1 = arith.constant 0 : i32
    return %arg0, %arg1, %c0_i32, %c0_i32_0 : i32, i32, i32, i32
  }
  func.func @transform_6(%arg0: i32, %arg1: i32) -> (i32, i32, i32) {
    %c0_i32 = arith.constant 0 : i32
    %c0_i32_0 = arith.constant 0 : i32
    %c0_i32_1 = arith.constant 0 : i32
    return %arg0, %c0_i32, %c0_i32_0 : i32, i32, i32
  }
  func.func @transform_7(%arg0: i32, %arg1: i32) -> (i32, i32, i32) {
    %c0_i32 = arith.constant 0 : i32
    %c0_i32_0 = arith.constant 0 : i32
    %c0_i32_1 = arith.constant 0 : i32
    return %arg0, %c0_i32, %c0_i32_0 : i32, i32, i32
  }
}

module attributes {stable_mosaic.version = 11 : i64} {
  func.func @_conv3x3_stats_kernel(%arg0: i32, %arg1: i32, %arg2: memref<1x10x24x128xf32, #tpu.memory_space<vmem>>, %arg3: memref<1x128xf32, #tpu.memory_space<vmem>>, %arg4: memref<1x128xf32, #tpu.memory_space<vmem>>, %arg5: memref<3x3x128x128xbf16, #tpu.memory_space<vmem>>, %arg6: memref<1x128xf32, #tpu.memory_space<vmem>>, %arg7: memref<1x8x16x128xf32, #tpu.memory_space<vmem>>, %arg8: memref<1x1x128xf32, #tpu.memory_space<vmem>>, %arg9: memref<1x1x128xf32, #tpu.memory_space<vmem>>) attributes {dimension_semantics = [#tpu.dimension_semantics<parallel>, #tpu.dimension_semantics<arbitrary>], iteration_bounds = array<i64: 2, 2>, scalar_prefetch = 0 : i64, scratch_operands = 0 : i64, tpu.core_type = #tpu.core_type<tc>, window_params = [{transform_indices = @transform_0, window_bounds = array<i64: 1, 10, 24, 128>}, {pipeline_mode = #tpu.pipeline_mode<synchronous>, transform_indices = @transform_1, window_bounds = array<i64: 1, 128>}, {pipeline_mode = #tpu.pipeline_mode<synchronous>, transform_indices = @transform_2, window_bounds = array<i64: 1, 128>}, {pipeline_mode = #tpu.pipeline_mode<synchronous>, transform_indices = @transform_3, window_bounds = array<i64: 3, 3, 128, 128>}, {pipeline_mode = #tpu.pipeline_mode<synchronous>, transform_indices = @transform_4, window_bounds = array<i64: 1, 128>}, {transform_indices = @transform_5, window_bounds = array<i64: 1, 8, 16, 128>}, {transform_indices = @transform_6, window_bounds = array<i64: 1, 1, 128>}, {transform_indices = @transform_7, window_bounds = array<i64: 1, 1, 128>}]} {
    %c0 = arith.constant 0 : index
    %c0_0 = arith.constant 0 : index
    %c0_1 = arith.constant 0 : index
    %c0_2 = arith.constant 0 : index
    %0 = vector.load %arg2[%c0, %c0_0, %c0_1, %c0_2] : memref<1x10x24x128xf32, #tpu.memory_space<vmem>>, vector<1x10x24x128xf32>
    %1 = vector.shape_cast %0 : vector<1x10x24x128xf32> to vector<10x24x128xf32>
    %c0_3 = arith.constant 0 : index
    %c0_4 = arith.constant 0 : index
    %2 = vector.load %arg3[%c0_3, %c0_4] : memref<1x128xf32, #tpu.memory_space<vmem>>, vector<1x128xf32>
    %3 = vector.shape_cast %2 : vector<1x128xf32> to vector<1x1x128xf32>
    %c0_5 = arith.constant 0 : index
    %c0_6 = arith.constant 0 : index
    %4 = vector.load %arg4[%c0_5, %c0_6] : memref<1x128xf32, #tpu.memory_space<vmem>>, vector<1x128xf32>
    %5 = vector.shape_cast %4 : vector<1x128xf32> to vector<1x1x128xf32>
    %6 = vector.broadcast %3 : vector<1x1x128xf32> to vector<10x24x128xf32>
    %7 = arith.mulf %1, %6 : vector<10x24x128xf32>
    %8 = vector.broadcast %5 : vector<1x1x128xf32> to vector<10x24x128xf32>
    %9 = arith.addf %7, %8 : vector<10x24x128xf32>
    %cst = arith.constant 0.000000e+00 : f32
    %10 = vector.broadcast %cst : f32 to vector<10x24x128xf32>
    %11 = arith.maximumf %9, %10 : vector<10x24x128xf32>
    %12 = tpu.iota {dimensions = array<i32: 0>} : vector<10x24x128xi32>
    %13 = tpu.iota {dimensions = array<i32: 1>} : vector<10x24x128xi32>
    %c1_i32 = arith.constant 1 : i32
    %14 = vector.broadcast %c1_i32 : i32 to vector<10x24x128xi32>
    %15 = arith.cmpi sge, %13, %14 : vector<10x24x128xi32>
    %c16_i32 = arith.constant 16 : i32
    %16 = vector.broadcast %c16_i32 : i32 to vector<10x24x128xi32>
    %17 = arith.cmpi sle, %13, %16 : vector<10x24x128xi32>
    %18 = arith.andi %15, %17 : vector<10x24x128xi1>
    %c0_i32 = arith.constant 0 : i32
    %19 = vector.broadcast %c0_i32 : i32 to vector<10x24x128xi32>
    %20 = arith.cmpi sgt, %12, %19 : vector<10x24x128xi32>
    %c0_i32_7 = arith.constant 0 : i32
    %21 = arith.cmpi sgt, %arg1, %c0_i32_7 : i32
    %22 = vector.broadcast %21 : i1 to vector<10x24x128xi1>
    %23 = arith.ori %20, %22 : vector<10x24x128xi1>
    %24 = arith.andi %18, %23 : vector<10x24x128xi1>
    %c9_i32 = arith.constant 9 : i32
    %25 = vector.broadcast %c9_i32 : i32 to vector<10x24x128xi32>
    %26 = arith.cmpi slt, %12, %25 : vector<10x24x128xi32>
    %c1_i32_8 = arith.constant 1 : i32
    %27 = arith.cmpi slt, %arg1, %c1_i32_8 : i32
    %28 = vector.broadcast %27 : i1 to vector<10x24x128xi1>
    %29 = arith.ori %26, %28 : vector<10x24x128xi1>
    %30 = arith.andi %24, %29 : vector<10x24x128xi1>
    %cst_9 = arith.constant 0.000000e+00 : f32
    %31 = vector.broadcast %cst_9 : f32 to vector<10x24x128xf32>
    %32 = arith.select %30, %11, %31 : vector<10x24x128xi1>, vector<10x24x128xf32>
    %33 = arith.truncf %32 : vector<10x24x128xf32> to vector<10x24x128xbf16>
    %cst_10 = arith.constant 0.000000e+00 : f32
    %34 = vector.broadcast %cst_10 : f32 to vector<128x128xf32>
    %35 = vector.extract_strided_slice %33 {offsets = [0, 0, 0], sizes = [10, 16, 128], strides = [1, 1, 1]} : vector<10x24x128xbf16> to vector<10x16x128xbf16>
    %36 = vector.shape_cast %35 : vector<10x16x128xbf16> to vector<160x128xbf16>
    %37 = vector.extract_strided_slice %36 {offsets = [0, 0], sizes = [128, 128], strides = [1, 1]} : vector<160x128xbf16> to vector<128x128xbf16>
    %c0_11 = arith.constant 0 : index
    %c0_12 = arith.constant 0 : index
    %c0_13 = arith.constant 0 : index
    %c0_14 = arith.constant 0 : index
    %38 = vector.load %arg5[%c0_11, %c0_12, %c0_13, %c0_14] : memref<3x3x128x128xbf16, #tpu.memory_space<vmem>>, vector<1x1x128x128xbf16>
    %39 = vector.shape_cast %38 : vector<1x1x128x128xbf16> to vector<128x128xbf16>
    %cst_15 = arith.constant dense<0.000000e+00> : vector<128x128xf32>
    %40 = tpu.matmul %37, %39, %cst_15 {dimension_numbers = #tpu.dot_dimension_numbers<[1], [0], [0], [1], [0, 0, 1, 1], [], []>} : vector<128x128xbf16>, vector<128x128xbf16>, vector<128x128xf32> -> vector<128x128xf32>
    %41 = arith.addf %34, %40 : vector<128x128xf32>
    %42 = vector.extract_strided_slice %36 {offsets = [16, 0], sizes = [128, 128], strides = [1, 1]} : vector<160x128xbf16> to vector<128x128xbf16>
    %c1 = arith.constant 1 : index
    %c0_16 = arith.constant 0 : index
    %c0_17 = arith.constant 0 : index
    %c0_18 = arith.constant 0 : index
    %43 = vector.load %arg5[%c1, %c0_16, %c0_17, %c0_18] : memref<3x3x128x128xbf16, #tpu.memory_space<vmem>>, vector<1x1x128x128xbf16>
    %44 = vector.shape_cast %43 : vector<1x1x128x128xbf16> to vector<128x128xbf16>
    %cst_19 = arith.constant dense<0.000000e+00> : vector<128x128xf32>
    %45 = tpu.matmul %42, %44, %cst_19 {dimension_numbers = #tpu.dot_dimension_numbers<[1], [0], [0], [1], [0, 0, 1, 1], [], []>} : vector<128x128xbf16>, vector<128x128xbf16>, vector<128x128xf32> -> vector<128x128xf32>
    %46 = arith.addf %41, %45 : vector<128x128xf32>
    %47 = vector.extract_strided_slice %36 {offsets = [32, 0], sizes = [128, 128], strides = [1, 1]} : vector<160x128xbf16> to vector<128x128xbf16>
    %c2 = arith.constant 2 : index
    %c0_20 = arith.constant 0 : index
    %c0_21 = arith.constant 0 : index
    %c0_22 = arith.constant 0 : index
    %48 = vector.load %arg5[%c2, %c0_20, %c0_21, %c0_22] : memref<3x3x128x128xbf16, #tpu.memory_space<vmem>>, vector<1x1x128x128xbf16>
    %49 = vector.shape_cast %48 : vector<1x1x128x128xbf16> to vector<128x128xbf16>
    %cst_23 = arith.constant dense<0.000000e+00> : vector<128x128xf32>
    %50 = tpu.matmul %47, %49, %cst_23 {dimension_numbers = #tpu.dot_dimension_numbers<[1], [0], [0], [1], [0, 0, 1, 1], [], []>} : vector<128x128xbf16>, vector<128x128xbf16>, vector<128x128xf32> -> vector<128x128xf32>
    %51 = arith.addf %46, %50 : vector<128x128xf32>
    %52 = vector.extract_strided_slice %33 {offsets = [0, 1, 0], sizes = [10, 16, 128], strides = [1, 1, 1]} : vector<10x24x128xbf16> to vector<10x16x128xbf16>
    %53 = vector.shape_cast %52 : vector<10x16x128xbf16> to vector<160x128xbf16>
    %54 = vector.extract_strided_slice %53 {offsets = [0, 0], sizes = [128, 128], strides = [1, 1]} : vector<160x128xbf16> to vector<128x128xbf16>
    %c0_24 = arith.constant 0 : index
    %c1_25 = arith.constant 1 : index
    %c0_26 = arith.constant 0 : index
    %c0_27 = arith.constant 0 : index
    %55 = vector.load %arg5[%c0_24, %c1_25, %c0_26, %c0_27] : memref<3x3x128x128xbf16, #tpu.memory_space<vmem>>, vector<1x1x128x128xbf16>
    %56 = vector.shape_cast %55 : vector<1x1x128x128xbf16> to vector<128x128xbf16>
    %cst_28 = arith.constant dense<0.000000e+00> : vector<128x128xf32>
    %57 = tpu.matmul %54, %56, %cst_28 {dimension_numbers = #tpu.dot_dimension_numbers<[1], [0], [0], [1], [0, 0, 1, 1], [], []>} : vector<128x128xbf16>, vector<128x128xbf16>, vector<128x128xf32> -> vector<128x128xf32>
    %58 = arith.addf %51, %57 : vector<128x128xf32>
    %59 = vector.extract_strided_slice %53 {offsets = [16, 0], sizes = [128, 128], strides = [1, 1]} : vector<160x128xbf16> to vector<128x128xbf16>
    %c1_29 = arith.constant 1 : index
    %c1_30 = arith.constant 1 : index
    %c0_31 = arith.constant 0 : index
    %c0_32 = arith.constant 0 : index
    %60 = vector.load %arg5[%c1_29, %c1_30, %c0_31, %c0_32] : memref<3x3x128x128xbf16, #tpu.memory_space<vmem>>, vector<1x1x128x128xbf16>
    %61 = vector.shape_cast %60 : vector<1x1x128x128xbf16> to vector<128x128xbf16>
    %cst_33 = arith.constant dense<0.000000e+00> : vector<128x128xf32>
    %62 = tpu.matmul %59, %61, %cst_33 {dimension_numbers = #tpu.dot_dimension_numbers<[1], [0], [0], [1], [0, 0, 1, 1], [], []>} : vector<128x128xbf16>, vector<128x128xbf16>, vector<128x128xf32> -> vector<128x128xf32>
    %63 = arith.addf %58, %62 : vector<128x128xf32>
    %64 = vector.extract_strided_slice %53 {offsets = [32, 0], sizes = [128, 128], strides = [1, 1]} : vector<160x128xbf16> to vector<128x128xbf16>
    %c2_34 = arith.constant 2 : index
    %c1_35 = arith.constant 1 : index
    %c0_36 = arith.constant 0 : index
    %c0_37 = arith.constant 0 : index
    %65 = vector.load %arg5[%c2_34, %c1_35, %c0_36, %c0_37] : memref<3x3x128x128xbf16, #tpu.memory_space<vmem>>, vector<1x1x128x128xbf16>
    %66 = vector.shape_cast %65 : vector<1x1x128x128xbf16> to vector<128x128xbf16>
    %cst_38 = arith.constant dense<0.000000e+00> : vector<128x128xf32>
    %67 = tpu.matmul %64, %66, %cst_38 {dimension_numbers = #tpu.dot_dimension_numbers<[1], [0], [0], [1], [0, 0, 1, 1], [], []>} : vector<128x128xbf16>, vector<128x128xbf16>, vector<128x128xf32> -> vector<128x128xf32>
    %68 = arith.addf %63, %67 : vector<128x128xf32>
    %69 = vector.extract_strided_slice %33 {offsets = [0, 2, 0], sizes = [10, 16, 128], strides = [1, 1, 1]} : vector<10x24x128xbf16> to vector<10x16x128xbf16>
    %70 = vector.shape_cast %69 : vector<10x16x128xbf16> to vector<160x128xbf16>
    %71 = vector.extract_strided_slice %70 {offsets = [0, 0], sizes = [128, 128], strides = [1, 1]} : vector<160x128xbf16> to vector<128x128xbf16>
    %c0_39 = arith.constant 0 : index
    %c2_40 = arith.constant 2 : index
    %c0_41 = arith.constant 0 : index
    %c0_42 = arith.constant 0 : index
    %72 = vector.load %arg5[%c0_39, %c2_40, %c0_41, %c0_42] : memref<3x3x128x128xbf16, #tpu.memory_space<vmem>>, vector<1x1x128x128xbf16>
    %73 = vector.shape_cast %72 : vector<1x1x128x128xbf16> to vector<128x128xbf16>
    %cst_43 = arith.constant dense<0.000000e+00> : vector<128x128xf32>
    %74 = tpu.matmul %71, %73, %cst_43 {dimension_numbers = #tpu.dot_dimension_numbers<[1], [0], [0], [1], [0, 0, 1, 1], [], []>} : vector<128x128xbf16>, vector<128x128xbf16>, vector<128x128xf32> -> vector<128x128xf32>
    %75 = arith.addf %68, %74 : vector<128x128xf32>
    %76 = vector.extract_strided_slice %70 {offsets = [16, 0], sizes = [128, 128], strides = [1, 1]} : vector<160x128xbf16> to vector<128x128xbf16>
    %c1_44 = arith.constant 1 : index
    %c2_45 = arith.constant 2 : index
    %c0_46 = arith.constant 0 : index
    %c0_47 = arith.constant 0 : index
    %77 = vector.load %arg5[%c1_44, %c2_45, %c0_46, %c0_47] : memref<3x3x128x128xbf16, #tpu.memory_space<vmem>>, vector<1x1x128x128xbf16>
    %78 = vector.shape_cast %77 : vector<1x1x128x128xbf16> to vector<128x128xbf16>
    %cst_48 = arith.constant dense<0.000000e+00> : vector<128x128xf32>
    %79 = tpu.matmul %76, %78, %cst_48 {dimension_numbers = #tpu.dot_dimension_numbers<[1], [0], [0], [1], [0, 0, 1, 1], [], []>} : vector<128x128xbf16>, vector<128x128xbf16>, vector<128x128xf32> -> vector<128x128xf32>
    %80 = arith.addf %75, %79 : vector<128x128xf32>
    %81 = vector.extract_strided_slice %70 {offsets = [32, 0], sizes = [128, 128], strides = [1, 1]} : vector<160x128xbf16> to vector<128x128xbf16>
    %c2_49 = arith.constant 2 : index
    %c2_50 = arith.constant 2 : index
    %c0_51 = arith.constant 0 : index
    %c0_52 = arith.constant 0 : index
    %82 = vector.load %arg5[%c2_49, %c2_50, %c0_51, %c0_52] : memref<3x3x128x128xbf16, #tpu.memory_space<vmem>>, vector<1x1x128x128xbf16>
    %83 = vector.shape_cast %82 : vector<1x1x128x128xbf16> to vector<128x128xbf16>
    %cst_53 = arith.constant dense<0.000000e+00> : vector<128x128xf32>
    %84 = tpu.matmul %81, %83, %cst_53 {dimension_numbers = #tpu.dot_dimension_numbers<[1], [0], [0], [1], [0, 0, 1, 1], [], []>} : vector<128x128xbf16>, vector<128x128xbf16>, vector<128x128xf32> -> vector<128x128xf32>
    %85 = arith.addf %80, %84 : vector<128x128xf32>
    %c0_54 = arith.constant 0 : index
    %c0_55 = arith.constant 0 : index
    %86 = vector.load %arg6[%c0_54, %c0_55] : memref<1x128xf32, #tpu.memory_space<vmem>>, vector<1x128xf32>
    %87 = vector.broadcast %86 : vector<1x128xf32> to vector<128x128xf32>
    %88 = arith.addf %85, %87 : vector<128x128xf32>
    %cst_56 = arith.constant dense<0.000000e+00> : vector<128xf32>
    %89 = vector.multi_reduction <add>, %88, %cst_56 [0] : vector<128x128xf32> to vector<128xf32>
    %90 = vector.shape_cast %89 : vector<128xf32> to vector<1x128xf32>
    %91 = arith.mulf %88, %88 : vector<128x128xf32>
    %cst_57 = arith.constant dense<0.000000e+00> : vector<128xf32>
    %92 = vector.multi_reduction <add>, %91, %cst_57 [0] : vector<128x128xf32> to vector<128xf32>
    %93 = vector.shape_cast %92 : vector<128xf32> to vector<1x128xf32>
    %c0_i32_58 = arith.constant 0 : i32
    %94 = arith.cmpi eq, %arg1, %c0_i32_58 : i32
    %95 = arith.extui %94 : i1 to i32
    %c0_i32_59 = arith.constant 0 : i32
    %96 = arith.cmpi ne, %95, %c0_i32_59 : i32
    scf.if %96 {
      %cst_76 = arith.constant 0.000000e+00 : f32
      %109 = vector.broadcast %cst_76 : f32 to vector<1x1x128xf32>
      %c0_77 = arith.constant 0 : index
      %c0_78 = arith.constant 0 : index
      %c0_79 = arith.constant 0 : index
      %110 = vector.load %arg8[%c0_77, %c0_78, %c0_79] : memref<1x1x128xf32, #tpu.memory_space<vmem>>, vector<1x1x128xf32>
      tpu.vector_store %arg8[%c0_77, %c0_78, %c0_79], %109 {strides = array<i32>} : memref<1x1x128xf32, #tpu.memory_space<vmem>>, vector<1x1x128xf32>,
      %cst_80 = arith.constant 0.000000e+00 : f32
      %111 = vector.broadcast %cst_80 : f32 to vector<1x1x128xf32>
      %c0_81 = arith.constant 0 : index
      %c0_82 = arith.constant 0 : index
      %c0_83 = arith.constant 0 : index
      %112 = vector.load %arg9[%c0_81, %c0_82, %c0_83] : memref<1x1x128xf32, #tpu.memory_space<vmem>>, vector<1x1x128xf32>
      tpu.vector_store %arg9[%c0_81, %c0_82, %c0_83], %111 {strides = array<i32>} : memref<1x1x128xf32, #tpu.memory_space<vmem>>, vector<1x1x128xf32>,
    } else {
    }
    %c0_60 = arith.constant 0 : index
    %c0_61 = arith.constant 0 : index
    %c0_62 = arith.constant 0 : index
    %97 = vector.load %arg8[%c0_60, %c0_61, %c0_62] : memref<1x1x128xf32, #tpu.memory_space<vmem>>, vector<1x1x128xf32>
    %98 = vector.shape_cast %90 : vector<1x128xf32> to vector<1x1x128xf32>
    %99 = arith.addf %97, %98 : vector<1x1x128xf32>
    %c0_63 = arith.constant 0 : index
    %c0_64 = arith.constant 0 : index
    %c0_65 = arith.constant 0 : index
    %100 = vector.load %arg8[%c0_63, %c0_64, %c0_65] : memref<1x1x128xf32, #tpu.memory_space<vmem>>, vector<1x1x128xf32>
    tpu.vector_store %arg8[%c0_63, %c0_64, %c0_65], %99 {strides = array<i32>} : memref<1x1x128xf32, #tpu.memory_space<vmem>>, vector<1x1x128xf32>,
    %c0_66 = arith.constant 0 : index
    %c0_67 = arith.constant 0 : index
    %c0_68 = arith.constant 0 : index
    %101 = vector.load %arg9[%c0_66, %c0_67, %c0_68] : memref<1x1x128xf32, #tpu.memory_space<vmem>>, vector<1x1x128xf32>
    %102 = vector.shape_cast %93 : vector<1x128xf32> to vector<1x1x128xf32>
    %103 = arith.addf %101, %102 : vector<1x1x128xf32>
    %c0_69 = arith.constant 0 : index
    %c0_70 = arith.constant 0 : index
    %c0_71 = arith.constant 0 : index
    %104 = vector.load %arg9[%c0_69, %c0_70, %c0_71] : memref<1x1x128xf32, #tpu.memory_space<vmem>>, vector<1x1x128xf32>
    tpu.vector_store %arg9[%c0_69, %c0_70, %c0_71], %103 {strides = array<i32>} : memref<1x1x128xf32, #tpu.memory_space<vmem>>, vector<1x1x128xf32>,
    %105 = vector.shape_cast %88 : vector<128x128xf32> to vector<8x16x128xf32>
    %c0_72 = arith.constant 0 : index
    %c0_73 = arith.constant 0 : index
    %c0_74 = arith.constant 0 : index
    %c0_75 = arith.constant 0 : index
    %106 = vector.load %arg7[%c0_72, %c0_73, %c0_74, %c0_75] : memref<1x8x16x128xf32, #tpu.memory_space<vmem>>, vector<1x8x16x128xf32>
    %107 = vector.shape_cast %106 : vector<1x8x16x128xf32> to vector<8x16x128xf32>
    %108 = vector.shape_cast %105 : vector<8x16x128xf32> to vector<1x8x16x128xf32>
    tpu.vector_store %arg7[%c0_72, %c0_73, %c0_74, %c0_75], %108 {strides = array<i32>} : memref<1x8x16x128xf32, #tpu.memory_space<vmem>>, vector<1x8x16x128xf32>,
    return
  }
  func.func @transform_0(%arg0: i32, %arg1: i32) -> (i32, i32, i32, i32) {
    %c2_i32 = arith.constant 2 : i32
    %0 = arith.muli %arg0, %c2_i32 : i32
    %1 = arith.addi %0, %arg1 : i32
    %c0_i32 = arith.constant 0 : i32
    %c0_i32_0 = arith.constant 0 : i32
    %c0_i32_1 = arith.constant 0 : i32
    %c0_i32_2 = arith.constant 0 : i32
    return %1, %c0_i32, %c0_i32_0, %c0_i32_1 : i32, i32, i32, i32
  }
  func.func @transform_1(%arg0: i32, %arg1: i32) -> (i32, i32) {
    %c0_i32 = arith.constant 0 : i32
    %c0_i32_0 = arith.constant 0 : i32
    %c0_i32_1 = arith.constant 0 : i32
    return %c0_i32, %c0_i32_0 : i32, i32
  }
  func.func @transform_2(%arg0: i32, %arg1: i32) -> (i32, i32) {
    %c0_i32 = arith.constant 0 : i32
    %c0_i32_0 = arith.constant 0 : i32
    %c0_i32_1 = arith.constant 0 : i32
    return %c0_i32, %c0_i32_0 : i32, i32
  }
  func.func @transform_3(%arg0: i32, %arg1: i32) -> (i32, i32, i32, i32) {
    %c0_i32 = arith.constant 0 : i32
    %c0_i32_0 = arith.constant 0 : i32
    %c0_i32_1 = arith.constant 0 : i32
    %c0_i32_2 = arith.constant 0 : i32
    %c0_i32_3 = arith.constant 0 : i32
    return %c0_i32, %c0_i32_0, %c0_i32_1, %c0_i32_2 : i32, i32, i32, i32
  }
  func.func @transform_4(%arg0: i32, %arg1: i32) -> (i32, i32) {
    %c0_i32 = arith.constant 0 : i32
    %c0_i32_0 = arith.constant 0 : i32
    %c0_i32_1 = arith.constant 0 : i32
    return %c0_i32, %c0_i32_0 : i32, i32
  }
  func.func @transform_5(%arg0: i32, %arg1: i32) -> (i32, i32, i32, i32) {
    %c0_i32 = arith.constant 0 : i32
    %c0_i32_0 = arith.constant 0 : i32
    %c0_i32_1 = arith.constant 0 : i32
    return %arg0, %arg1, %c0_i32, %c0_i32_0 : i32, i32, i32, i32
  }
  func.func @transform_6(%arg0: i32, %arg1: i32) -> (i32, i32, i32) {
    %c0_i32 = arith.constant 0 : i32
    %c0_i32_0 = arith.constant 0 : i32
    %c0_i32_1 = arith.constant 0 : i32
    return %arg0, %c0_i32, %c0_i32_0 : i32, i32, i32
  }
  func.func @transform_7(%arg0: i32, %arg1: i32) -> (i32, i32, i32) {
    %c0_i32 = arith.constant 0 : i32
    %c0_i32_0 = arith.constant 0 : i32
    %c0_i32_1 = arith.constant 0 : i32
    return %arg0, %c0_i32, %c0_i32_0 : i32, i32, i32
  }
}

module attributes {stable_mosaic.version = 11 : i64} {
  func.func @_bn_relu_kernel(%arg0: i32, %arg1: i32, %arg2: memref<1x8x16x128xf32, #tpu.memory_space<vmem>>, %arg3: memref<1x128xf32, #tpu.memory_space<vmem>>, %arg4: memref<1x128xf32, #tpu.memory_space<vmem>>, %arg5: memref<1x8x16x128xf32, #tpu.memory_space<vmem>>) attributes {dimension_semantics = [#tpu.dimension_semantics<parallel>, #tpu.dimension_semantics<parallel>], iteration_bounds = array<i64: 2, 2>, scalar_prefetch = 0 : i64, scratch_operands = 0 : i64, tpu.core_type = #tpu.core_type<tc>, window_params = [{transform_indices = @transform_0, window_bounds = array<i64: 1, 8, 16, 128>}, {pipeline_mode = #tpu.pipeline_mode<synchronous>, transform_indices = @transform_1, window_bounds = array<i64: 1, 128>}, {pipeline_mode = #tpu.pipeline_mode<synchronous>, transform_indices = @transform_2, window_bounds = array<i64: 1, 128>}, {transform_indices = @transform_3, window_bounds = array<i64: 1, 8, 16, 128>}]} {
    %c0 = arith.constant 0 : index
    %c0_0 = arith.constant 0 : index
    %0 = vector.load %arg3[%c0, %c0_0] : memref<1x128xf32, #tpu.memory_space<vmem>>, vector<1x128xf32>
    %1 = vector.shape_cast %0 : vector<1x128xf32> to vector<1x1x1x128xf32>
    %c0_1 = arith.constant 0 : index
    %c0_2 = arith.constant 0 : index
    %2 = vector.load %arg4[%c0_1, %c0_2] : memref<1x128xf32, #tpu.memory_space<vmem>>, vector<1x128xf32>
    %3 = vector.shape_cast %2 : vector<1x128xf32> to vector<1x1x1x128xf32>
    %c0_3 = arith.constant 0 : index
    %c0_4 = arith.constant 0 : index
    %c0_5 = arith.constant 0 : index
    %c0_6 = arith.constant 0 : index
    %4 = vector.load %arg2[%c0_3, %c0_4, %c0_5, %c0_6] : memref<1x8x16x128xf32, #tpu.memory_space<vmem>>, vector<1x8x16x128xf32>
    %5 = vector.broadcast %1 : vector<1x1x1x128xf32> to vector<1x8x16x128xf32>
    %6 = arith.mulf %4, %5 : vector<1x8x16x128xf32>
    %7 = vector.broadcast %3 : vector<1x1x1x128xf32> to vector<1x8x16x128xf32>
    %8 = arith.addf %6, %7 : vector<1x8x16x128xf32>
    %cst = arith.constant 0.000000e+00 : f32
    %9 = vector.broadcast %cst : f32 to vector<1x8x16x128xf32>
    %10 = arith.maximumf %8, %9 : vector<1x8x16x128xf32>
    %c0_7 = arith.constant 0 : index
    %c0_8 = arith.constant 0 : index
    %c0_9 = arith.constant 0 : index
    %c0_10 = arith.constant 0 : index
    %11 = vector.load %arg5[%c0_7, %c0_8, %c0_9, %c0_10] : memref<1x8x16x128xf32, #tpu.memory_space<vmem>>, vector<1x8x16x128xf32>
    tpu.vector_store %arg5[%c0_7, %c0_8, %c0_9, %c0_10], %10 {strides = array<i32>} : memref<1x8x16x128xf32, #tpu.memory_space<vmem>>, vector<1x8x16x128xf32>,
    return
  }
  func.func @transform_0(%arg0: i32, %arg1: i32) -> (i32, i32, i32, i32) {
    %c0_i32 = arith.constant 0 : i32
    %c0_i32_0 = arith.constant 0 : i32
    %c0_i32_1 = arith.constant 0 : i32
    return %arg0, %arg1, %c0_i32, %c0_i32_0 : i32, i32, i32, i32
  }
  func.func @transform_1(%arg0: i32, %arg1: i32) -> (i32, i32) {
    %c0_i32 = arith.constant 0 : i32
    %c0_i32_0 = arith.constant 0 : i32
    %c0_i32_1 = arith.constant 0 : i32
    return %c0_i32, %c0_i32_0 : i32, i32
  }
  func.func @transform_2(%arg0: i32, %arg1: i32) -> (i32, i32) {
    %c0_i32 = arith.constant 0 : i32
    %c0_i32_0 = arith.constant 0 : i32
    %c0_i32_1 = arith.constant 0 : i32
    return %c0_i32, %c0_i32_0 : i32, i32
  }
  func.func @transform_3(%arg0: i32, %arg1: i32) -> (i32, i32, i32, i32) {
    %c0_i32 = arith.constant 0 : i32
    %c0_i32_0 = arith.constant 0 : i32
    %c0_i32_1 = arith.constant 0 : i32
    return %arg0, %arg1, %c0_i32, %c0_i32_0 : i32, i32, i32, i32
  }
}

</mosaic_0001>

<bundles_post_ra>
// kernel: conv_block_forward.5
= control target key start
LH: loop header
LB: loop body
LE: loop exit
PB: predicated region body
PF: predicated region fallthrough
CT: control target
= control target key end

     0   :  { %s1154_s0 = inlined_call_operand.hbm [shape: f32[2,16,16,128], index: 0, kind: input, shape index: {}]   ;;  %s1155_s1 = inlined_call_operand.hbm [shape: f32[1,128], index: 1, kind: input, shape index: {}]   ;;  %s1156_s2 = inlined_call_operand.hbm [shape: f32[1,128], index: 2, kind: input, shape index: {}]   ;;  %s1157_s3 = inlined_call_operand.hbm [shape: f32[2,16,16,128], index: 3, kind: output, shape index: {}]  }
   0x1   :  { %1166 = sst [smem:[#allocation14_spill]] %s1155_s1 }
   0x2   :  { %1167 = sst [smem:[#allocation15_spill]] %s1156_s2 }
   0x3   :  { %8 = vsyncpa [#allocation3], 0 }
   0x4   :  { %10 = vsyncpa [#allocation3 + $0x1], 0 }
   0x5   :  { %11 = vsyncpa [#allocation6], 0 }
   0x6   :  { %12 = vsyncpa [#allocation4], 0 }
   0x7   :  { %14 = vsyncpa [#allocation4 + $0x1], 0  ;;  %s803_s12 = smov 0   ;;  %s805_s13 = smov 0  }
   0x8   :  { %s807_s14 = smov 0   ;;  %s809_s15 = smov 0  }
   0x9   :  { %s811_s16 = smov 0   ;;  %s813_s17 = smov 0  }
   0xa   :  { %s815_s18 = smov 0   ;;  %s817_s19 = smov 0  }
   0xb LB: > { %1168 = sst [smem:[#allocation12_spill]] %s765_s17  ;;  %s455_s20 = sadd.s32 4294967295, %s773_s19   ;;  %s773_s19 = sphi %s817_s19, %s20_s19   ;;  %s769_s18 = sphi %s815_s18, %s1193_s18   ;;  %s765_s17 = sphi %s813_s17, %s1188_s17   ;;  %s761_s16 = sphi %s811_s16, %s1192_s16   ;;  %s757_s15 = sphi %s809_s15, %s1187_s15   ;;  %s753_s14 = sphi %s807_s14, %s1191_s14   ;;  %s749_s13 = sphi %s805_s13, %s1190_s13   ;;  %s745_s12 = sphi %s803_s12, %s1189_s12  }
   0xc   : > { %s456_s21 = sadd.s32 4294967294, %s773_s19   ;;  %p48_p0 = scmp.ne.s32.totalorder %s753_s14, %s749_s13 }
   0xd   : > { %p49_p1 = scmp.eq.s32.totalorder %s773_s19, 0  ;;  %p54_p2 = scmp.ne.s32.totalorder %s749_s13, %s745_s12 }
   0xe   : > { %p851_p3 = scmp.eq.s32.totalorder %s455_s20, 0  ;;  %p122_p4 = scmp.eq.s32.totalorder %s455_s20, 3 }
   0xf   : > { %p855_p5 = por %p49_p1, %p48_p0  ;;  %p128_p6 = scmp.eq.s32.totalorder %s456_s21, 3 }
  0x10   : > { %s1169_s23 = scalar_select %p851_p3, 1, 0 }
  0x11   : > { %p861_p7 = por %p851_p3, %p54_p2  ;;  %p865_p8 = por %p122_p4, %p48_p0 }
  0x12   : > { %p869_p9 = por %p128_p6, %p54_p2  ;;  %p457_p10 = scmp.ge.s32.totalorder %s773_s19, 1 }
  0x13   : > { %s1171_s25 = scalar_select %p861_p7, 1, 0 }
  0x14   : > { %s1172_s26 = scalar_select %p865_p8, 1, 0 }
  0x15   : > { %s1173_s27 = scalar_select %p869_p9, 1, 0 }
  0x16   : > { %p135_p11 = scmp.lt.s32.totalorder %s773_s19, 5  ;;  %s775_s29 = smov [#allocation5]  }
  0x17   : > { %s148_s30 = sshll.u32 %s775_s29, 4  ;;  %p511_p13 = scmp.lt.s32.totalorder %s773_s19, 4  ;;  %s149_s30 = int_to_ptr.vmem [resolvable:$true] %s148_s30 }
  0x18   : > { %p875_p12 = pnand %p457_p10, %p135_p11  ;;  %s776_s5 = smov [#allocation7]  }
  0x19   : > { %p884_p1 = pnand %p511_p13, %p855_p5  ;;  %s159_s6 = sshll.u32 %s776_s5, 4  ;;  %s894_s6 = int_to_ptr.vmem [resolvable:$true] %s159_s6 }
  0x1a   : > { %s1174_s28 = scalar_select %p875_p12, 1, 0 }
  0x1b   : > { %p494_p0 = pneg %p875_p12  ;;  %s1177_s1 = sld [smem:[#allocation14_spill]] }
  0x1c   : > { %s1175_s4 = scalar_select %p884_p1, 1, 0 }
  0x1d   : > { %p890_p2 = pnand %p494_p0, %p851_p3 }
  0x1f   : > { %p587_p5 = pneg %p890_p2 }
  0x21   : > { %s585_s10 = scalar_lea.hbm %s1177_s1, 16 }
  0x22   : > { %p586_p4 = scmp.ne.s32.totalorder %s1177_s1, %s585_s10  ;;  %p592_p11 = scmp.lt.u32.totalorder %s585_s10, %s1177_s1 }
  0x24   : > { %p588_p6 = pnand %p587_p5, %p586_p4 }
  0x26   : > { %p589_p10 = pneg %p588_p6 }
  0x28   : > { %p594_p13 = pnand %p592_p11, %p589_p10 }
  0x2a   : > { %597 = shalt.err (!%p594_p13)
}
  0x2b   : > { %s598_s29 = scalar_lea.vmem %s149_s30, 16  ;;  %s605_s5 = scalar_lea.vmem %s149_s30, 32 }
  0x2c   : > { %p599_p0 = scmp.ne.s32.totalorder %s149_s30, %s598_s29  ;;  %p606_p3 = scmp.lt.s32.totalorder %s149_s30, %s149_s30 }
  0x2d   : > { %p607_p7 = scmp.lt.s32.totalorder %s605_s5, %s598_s29 }
  0x2e   : > { %p601_p9 = pnand %p599_p0, %p587_p5 }
  0x2f   : > { %p608_p12 = por %p607_p7, %p606_p3 }
  0x30   : > { %p602_p8 = pneg %p601_p9 }
  0x32   : > { %p609_p1 = pnand %p608_p12, %p602_p8 }
  0x34   : > { %612 = shalt.err (!%p609_p1)
}
  0x35   : > { %497 = dma.hbm_to_vmem [thread:$0]  (!%p890_p2), %s1177_s1, 16, %s149_s30, [#allocation6]  }
  0x36   : > { %s1178_s2 = sld [smem:[#allocation15_spill]] }
  0x3c   : > { %s613_s20 = scalar_lea.hbm %s1178_s2, 16 }
  0x3d   : > { %p614_p9 = scmp.ne.s32.totalorder %s1178_s2, %s613_s20  ;;  %p620_p8 = scmp.lt.u32.totalorder %s613_s20, %s1178_s2 }
  0x3f   : > { %p616_p3 = pnand %p614_p9, %p587_p5 }
  0x41   : > { %p617_p7 = pneg %p616_p3 }
  0x43   : > { %p622_p12 = pnand %p620_p8, %p617_p7 }
  0x45   : > { %625 = shalt.err (!%p622_p12)
}
  0x46   : > { %s626_s30 = scalar_lea.vmem %s894_s6, 16  ;;  %s633_s8 = scalar_lea.vmem %s894_s6, 32 }
  0x47   : > { %p627_p1 = scmp.ne.s32.totalorder %s894_s6, %s626_s30  ;;  %p634_p10 = scmp.lt.s32.totalorder %s894_s6, %s894_s6 }
  0x48   : > { %p635_p11 = scmp.lt.s32.totalorder %s633_s8, %s626_s30 }
  0x49   : > { %p629_p4 = pnand %p627_p1, %p587_p5 }
  0x4a   : > { %p636_p13 = por %p635_p11, %p634_p10 }
  0x4b   : > { %p630_p6 = pneg %p629_p4 }
  0x4d   : > { %p637_p0 = pnand %p636_p13, %p630_p6 }
  0x4f   : > { %640 = shalt.err (!%p637_p0)
}
  0x50   : > { %500 = dma.hbm_to_vmem [thread:$0]  (!%p890_p2), %s1178_s2, 16, %s894_s6, [#allocation6]  }
  0x51   : > { %s29_s11 = sadd.s32 1, %s765_s17  ;;  %s32_s20 = sadd.s32 1, %s769_s18 }
  0x52   : > { %p30_p5 = scmp.ge.s32.totalorder %s29_s11, 2  ;;  %s170_s21 = sand.u32 1, %s753_s14  }
  0x53   : > { %s461_s24 = sshll.u32 %s170_s21, 7  ;;  %s480_s29 = sshll.u32 %s765_s17, 4 }
  0x54   : > { %s1195_s11 = smov (%p30_p5, %s29_s11), 0  ;;  %s1197_s20 = smov (!%p30_p5, %s32_s20), %s769_s18 }
  0x55   : > { %1179 = sst [smem:[#allocation13_spill]] %s1195_s11  ;;  %s37_s7 = ssub.s32 %s765_s17, %s1195_s11 }
  0x56   : > { %p34_p9 = scmp.ge.s32.totalorder %s1197_s20, 2  ;;  %s464_s5 = sshll.u32 %s769_s18, 5 }
  0x57   : > { %s174_s30 = scalar_lea.vmem [#allocation2], %s461_s24  ;;  %s181_s8 = sadd.s32 %s480_s29, %s464_s5 }
  0x58   : > { %s184_s6 = sshll.u32 %s174_s30, 4  ;;  %s1199_s20 = smov (%p34_p9, %s1197_s20), 0  ;;  %s956_s6 = int_to_ptr.vmem [resolvable:$true] %s184_s6 }
  0x59   : > { %s36_s9 = ssub.s32 %s769_s18, %s1199_s20  ;;  %s465_s10 = sshll.u32 %s181_s8, 7 }
  0x5a   : > { %s38_s22 = sor.u32 %s37_s7, %s36_s9  ;;  %s963_s11 = scalar_lea.hbm %s1154_s0, %s465_s10 }
  0x5b   : > { %p39_p2 = scmp.eq.s32.totalorder %s38_s22, 0  ;;  %s1180_s24 = sadd.s32 1, %s753_s14 }
  0x5c   : > { %s970_s17 = scalar_lea.sflag [#allocation3], %s170_s21  ;;  %s641_s29 = scalar_lea.hbm %s963_s11, 2048 }
  0x5d   : > { %s968_s30 = scalar_select %p39_p2, %s753_s14, %s1180_s24  }
  0x5e   : > { %p642_p3 = scmp.ne.s32.totalorder %s963_s11, %s641_s29  ;;  %p1181_p7 = scmp.ne.s32.totalorder %s1175_s4, 0 }
  0x5f   : > { %s646_s7 = scalar_lea.hbm %s1154_s0, 8192  ;;  %p647_p4 = scmp.lt.u32.totalorder %s963_s11, %s1154_s0 }
  0x60   : > { %p643_p8 = pneg %p1181_p7  ;;  %p648_p6 = scmp.lt.u32.totalorder %s646_s7, %s641_s29 }
  0x61   : > { %p650_p11 = scmp.lt.u32.totalorder %s641_s29, %s963_s11 }
  0x62   : > { %p644_p12 = pnand %p643_p8, %p642_p3  ;;  %p649_p10 = por %p648_p6, %p647_p4 }
  0x64   : > { %p645_p1 = pneg %p644_p12  ;;  %p651_p13 = por %p650_p11, %p649_p10 }
  0x66   : > { %p652_p0 = pnand %p651_p13, %p645_p1 }
  0x68   : > { %655 = shalt.err (!%p652_p0)
}
  0x69   : > { %s656_s22 = scalar_lea.vmem %s956_s6, 2048  ;;  %s777_s21 = smov [#allocation2]  }
  0x6a   : > { %p657_p5 = scmp.ne.s32.totalorder %s956_s6, %s656_s22  ;;  %s661_s9 = sshll.u32 %s777_s21, 4  ;;  %s662_s9 = int_to_ptr.vmem [resolvable:$false] %s661_s9 }
  0x6b   : > { %s663_s10 = scalar_lea.vmem %s662_s9, 4096  ;;  %p664_p3 = scmp.lt.s32.totalorder %s956_s6, %s662_s9 }
  0x6c   : > { %p659_p9 = pnand %p657_p5, %p643_p8  ;;  %p665_p12 = scmp.lt.s32.totalorder %s663_s10, %s656_s22 }
  0x6e   : > { %p660_p2 = pneg %p659_p9  ;;  %p666_p4 = por %p665_p12, %p664_p3 }
  0x70   : > { %p667_p6 = pnand %p666_p4, %p660_p2 }
  0x72   : > { %670 = shalt.err (!%p667_p6)
}
  0x73   : > { %s778_s24 = smov 128   ;;  %s779_s29 = smov 8  }
  0x74   : > { %504 = dma.hbm_to_vmem [thread:$0]  (!%p1181_p7), %s963_s11, 2048, %s956_s6, %s970_s17, %s778_s24, %s778_s24, %s779_s29  }
  0x75   : > { %p1182_p8 = scmp.ne.s32.totalorder %s1174_s28, 0 }
  0x76   : > { %s1001_s1 = sand.u32 (!%p1182_p8), 1, %s749_s13   ;;  %p1183_p1 = scmp.ne.s32.totalorder (!%p1182_p8), %s1171_s25, 0 }
  0x77   : > { %196 = sbr.rel (%p1182_p8) target bundleno = 163 (0xa3), region = 32  ;;  %s467_s2 = sshll.u32 (!%p1182_p8), %s1001_s1, 7 }
  0x78   : > { %s199_s7 = scalar_lea.sflag (!%p1182_p8), [#allocation3], %s1001_s1  ;;  %s1007_s5 = scalar_lea.vmem (!%p1182_p8), [#allocation2], %s467_s2 }
  0x7e   : > { %732 = dma.done.wait (%p1183_p1), %s199_s7, 2048  }
  0x7f   : > { %734 = vsyncadd (%p1183_p1), %s199_s7, 4294965248  ;;  %p1184_p7 = scmp.ne.s32.totalorder %s1169_s23, 0 }
  0x81   : > { %736 = dma.done.wait (%p1184_p7), [#allocation6], 32  }
  0x82   : > { %738 = vsyncadd (%p1184_p7), [#allocation6], 4294967264  ;;  %v1017_v0 = vld [vmem:[#allocation5] ss:$0 sm:$0xff]  ;;  %v1019_v1 = vld [vmem:[#allocation7] ss:$0 sm:$0xff] }
  0x83   : > { %v237_v2 = vld [vmem:[%s1007_s5] sm:$0xff]  ;;  %v238_v4 = vld [vmem:[%s1007_s5 + $0x8] sm:$0xff]  ;;  %v239_v5 = vld [vmem:[%s1007_s5 + $0x10] sm:$0xff]  ;;  %s481_s17 = sshll.u32 %s757_s15, 4  ;;  %s476_s23 = sshll.u32 %s761_s16, 5 }
  0x84   : > { %v259_v3 = vmul.f32 %v1017_v0, %v237_v2  ;;  %v240_v6 = vld [vmem:[%s1007_s5 + $0x18] sm:$0xff]  ;;  %v260_v7 = vmul.f32 %v1017_v0, %v238_v4  ;;  %v261_v8 = vmul.f32 %v1017_v0, %v239_v5  ;;  %v241_v10 = vld [vmem:[%s1007_s5 + $0x20] sm:$0xff]  ;;  %v242_v11 = vld [vmem:[%s1007_s5 + $0x28] sm:$0xff]  ;;  %s1056_s15 = scalar_lea.vmem [#allocation8], %s467_s2  ;;  %s1061_s16 = sadd.s32 %s481_s17, %s476_s23 }
  0x85   : > { %v262_v9 = vmul.f32 %v1017_v0, %v240_v6  ;;  %v243_v12 = vld [vmem:[%s1007_s5 + $0x30] sm:$0xff]  ;;  %v263_v14 = vmul.f32 %v1017_v0, %v241_v10  ;;  %v264_v15 = vmul.f32 %v1017_v0, %v242_v11  ;;  %v244_v17 = vld [vmem:[%s1007_s5 + $0x38] sm:$0xff]  ;;  %v245_v22 = vld [vmem:[%s1007_s5 + $0x40] sm:$0xff]  ;;  %s477_s25 = sshll.u32 %s1061_s16, 7  ;;  %s346_s28 = sshll.u32 %s1056_s15, 4  ;;  %s1093_s28 = int_to_ptr.vmem [resolvable:$true] %s346_s28 }
  0x86   : > { %v281_v13 = vadd.f32 %v1019_v1, %v259_v3  ;;  %v265_v16 = vmul.f32 %v1017_v0, %v243_v12  ;;  %v282_v18 = vadd.f32 %v1019_v1, %v260_v7  ;;  %v283_v19 = vadd.f32 %v1019_v1, %v261_v8  ;;  %v246_v27 = vld [vmem:[%s1007_s5 + $0x48] sm:$0xff]  ;;  %v247_v28 = vld [vmem:[%s1007_s5 + $0x50] sm:$0xff]  ;;  %v248_v29 = vld [vmem:[%s1007_s5 + $0x58] sm:$0xff]  ;;  %s1091_s6 = scalar_lea.hbm %s1157_s3, %s477_s25  ;;  %s330_s8 = scalar_lea.sflag [#allocation4], %s1001_s1 }
  0x87   : > { %v284_v20 = vadd.f32 %v1019_v1, %v262_v9  ;;  %v266_v21 = vmul.f32 %v1017_v0, %v244_v17  ;;  %v285_v24 = vadd.f32 %v1019_v1, %v263_v14  ;;  %v286_v25 = vadd.f32 %v1019_v1, %v264_v15  ;;  %v249_v34 = vld [vmem:[%s1007_s5 + $0x60] sm:$0xff]  ;;  %v250_v35 = vld [vmem:[%s1007_s5 + $0x68] sm:$0xff]  ;;  %v251_v36 = vld [vmem:[%s1007_s5 + $0x70] sm:$0xff]  ;;  %s671_s22 = scalar_lea.vmem %s1093_s28, 2048  ;;  %p1185_p11 = scmp.ne.s32.totalorder %s1172_s26, 0 }
  0x88   : > { %v297_v23 = vmax.f32 %v281_v13, 0.0  ;;  %v287_v26 = vadd.f32 %v1019_v1, %v265_v16  ;;  %v298_v30 = vmax.f32 %v282_v18, 0.0  ;;  %v299_v31 = vmax.f32 %v283_v19, 0.0  ;;  %v252_v41 = vld [vmem:[%s1007_s5 + $0x78] sm:$0xff]  ;;  %p672_p10 = scmp.ne.s32.totalorder %s1093_s28, %s671_s22  ;;  %s780_s21 = smov [#allocation8]  }
  0x89   : > { %v300_v32 = vmax.f32 %v284_v20, 0.0  ;;  %v288_v33 = vadd.f32 %v1019_v1, %v266_v21  ;;  %v301_v37 = vmax.f32 %v285_v24, 0.0  ;;  %v302_v38 = vmax.f32 %v286_v25, 0.0  ;;  %s675_s9 = sshll.u32 %s780_s21, 4  ;;  %s676_s9 = int_to_ptr.vmem [resolvable:$false] %s675_s9 }
  0x8a   : > { %313 = vst [vmem:[%s1056_s15] sm:$0xff] %v297_v23  ;;  %v303_v39 = vmax.f32 %v287_v26, 0.0  ;;  %v267_v40 = vmul.f32 %v1017_v0, %v245_v22  ;;  %314 = vst [vmem:[%s1056_s15 + $0x8] sm:$0xff] %v298_v30  ;;  %v268_v43 = vmul.f32 %v1017_v0, %v246_v27  ;;  %v269_v44 = vmul.f32 %v1017_v0, %v247_v28  ;;  %p673_p13 = pnand %p672_p10, %p1185_p11  ;;  %s677_s10 = scalar_lea.vmem %s676_s9, 4096 }
  0x8b   : > { %315 = vst [vmem:[%s1056_s15 + $0x10] sm:$0xff] %v299_v31  ;;  %316 = vst [vmem:[%s1056_s15 + $0x18] sm:$0xff] %v300_v32  ;;  %v304_v42 = vmax.f32 %v288_v33, 0.0  ;;  %v270_v45 = vmul.f32 %v1017_v0, %v248_v29  ;;  %v271_v47 = vmul.f32 %v1017_v0, %v249_v34  ;;  %v272_v48 = vmul.f32 %v1017_v0, %v250_v35  ;;  %p678_p5 = scmp.lt.s32.totalorder %s1093_s28, %s676_s9  ;;  %p679_p9 = scmp.lt.s32.totalorder %s677_s10, %s671_s22 }
  0x8c   : > { %317 = vst [vmem:[%s1056_s15 + $0x20] sm:$0xff] %v301_v37  ;;  %318 = vst [vmem:[%s1056_s15 + $0x28] sm:$0xff] %v302_v38  ;;  %v289_v46 = vadd.f32 %v1019_v1, %v267_v40  ;;  %v273_v49 = vmul.f32 %v1017_v0, %v251_v36  ;;  %v290_v50 = vadd.f32 %v1019_v1, %v268_v43  ;;  %p674_p0 = pneg %p673_p13 }
  0x8d   : > { %319 = vst [vmem:[%s1056_s15 + $0x30] sm:$0xff] %v303_v39  ;;  %320 = vst [vmem:[%s1056_s15 + $0x38] sm:$0xff] %v304_v42  ;;  %v291_v51 = vadd.f32 %v1019_v1, %v269_v44  ;;  %v292_v52 = vadd.f32 %v1019_v1, %v270_v45  ;;  %v274_v53 = vmul.f32 %v1017_v0, %v252_v41  ;;  %p680_p2 = por %p679_p9, %p678_p5 }
  0x8e   : > { %v305_v54 = vmax.f32 %v289_v46, 0.0  ;;  %v293_v55 = vadd.f32 %v1019_v1, %v271_v47  ;;  %v294_v56 = vadd.f32 %v1019_v1, %v272_v48  ;;  %v295_v57 = vadd.f32 %v1019_v1, %v273_v49 }
  0x8f   : > { %v306_v58 = vmax.f32 %v290_v50, 0.0  ;;  %v307_v59 = vmax.f32 %v291_v51, 0.0  ;;  %v308_v60 = vmax.f32 %v292_v52, 0.0  ;;  %v296_v61 = vadd.f32 %v1019_v1, %v274_v53  ;;  %p681_p3 = pnand %p680_p2, %p674_p0 }
  0x90   : > { %321 = vst [vmem:[%s1056_s15 + $0x40] sm:$0xff] %v305_v54  ;;  %v309_v62 = vmax.f32 %v293_v55, 0.0  ;;  %v310_v63 = vmax.f32 %v294_v56, 0.0  ;;  %v311_v0 = vmax.f32 %v295_v57, 0.0 }
  0x91   : > { %322 = vst [vmem:[%s1056_s15 + $0x48] sm:$0xff] %v306_v58  ;;  %323 = vst [vmem:[%s1056_s15 + $0x50] sm:$0xff] %v307_v59  ;;  %v312_v2 = vmax.f32 %v296_v61, 0.0 }
  0x92   : > { %324 = vst [vmem:[%s1056_s15 + $0x58] sm:$0xff] %v308_v60  ;;  %325 = vst [vmem:[%s1056_s15 + $0x60] sm:$0xff] %v309_v62 }
  0x93   : > { %326 = vst [vmem:[%s1056_s15 + $0x68] sm:$0xff] %v310_v63  ;;  %327 = vst [vmem:[%s1056_s15 + $0x70] sm:$0xff] %v311_v0 }
  0x94   : > { %328 = vst [vmem:[%s1056_s15 + $0x78] sm:$0xff] %v312_v2 }
  0x95   : > { %684 = shalt.err (!%p681_p3)
}
  0x96   : > { %s685_s24 = scalar_lea.hbm %s1091_s6, 2048  ;;  %s689_s7 = scalar_lea.hbm %s1157_s3, 8192 }
  0x97   : > { %p686_p12 = scmp.ne.s32.totalorder %s1091_s6, %s685_s24  ;;  %p690_p8 = scmp.lt.u32.totalorder %s1091_s6, %s1157_s3 }
  0x98   : > { %p691_p1 = scmp.lt.u32.totalorder %s689_s7, %s685_s24  ;;  %p693_p10 = scmp.lt.u32.totalorder %s685_s24, %s1091_s6 }
  0x99   : > { %p687_p4 = pnand %p686_p12, %p1185_p11 }
  0x9a   : > { %p692_p7 = por %p691_p1, %p690_p8 }
  0x9b   : > { %p688_p6 = pneg %p687_p4 }
  0x9c   : > { %p694_p13 = por %p693_p10, %p692_p7 }
  0x9e   : > { %p695_p0 = pnand %p694_p13, %p688_p6 }
  0xa0   : > { %698 = shalt.err (!%p695_p0)
}
  0xa1   : > { %s781_s23 = smov 128   ;;  %s782_s15 = smov 8  }
  0xa2   : > { %492 = dma.vmem_to_hbm [thread:$0]  (%p1185_p11), %s1093_s28, 2048, %s1091_s6, %s330_s8, %s781_s23, %s781_s23, %s782_s15  }
  0xa3 PF: > { %p514_p5 = scmp.ge.s32.totalorder %s773_s19, 2  ;;  %s361_s16 = sand.u32 1, %s745_s12  }
  0xa4   : > { %p1186_p9 = scmp.ne.s32.totalorder %s1173_s27, 0  ;;  %s362_s25 = scalar_lea.sflag [#allocation4], %s361_s16 }
  0xa6   : > { %p506_p2 = pnand %p514_p5, %p1186_p9 }
  0xa8   : > { %740 = dma.done.wait (!%p506_p2), %s362_s25, 2048  }
  0xa9   : > { %742 = vsyncadd (!%p506_p2), %s362_s25, 4294965248  ;;  %s20_s19 = sadd.s32 1, %s773_s19   ;;  %s1187_s15 = sld [smem:[#allocation12_spill]] }
  0xaa   : > { %p17_p3 = scmp.ge.s32.totalorder %s20_s19, 6   ;;  %s1188_s17 = sld [smem:[#allocation13_spill]] }
  0xab   : > { %s1189_s12 = smov %s749_s13  ;;  %s1190_s13 = smov %s753_s14 }
  0xac   : > { %s1191_s14 = smov %s968_s30  ;;  %s1192_s16 = smov %s769_s18 }
  0xad   : > { %s1193_s18 = smov %s1199_s20  ;;  %19 = sbr.rel (!%p17_p3) target bundleno = 11 (0xb), region = 85 }
  0xb4   :  { %367 = vsyncpa [#allocation3], 1 }
  0xb5   :  { %369 = vsyncpa [#allocation3 + $0x1], 1 }
  0xb6   :  { %370 = vsyncpa [#allocation6], 1 }
  0xb7   :  { %371 = vsyncpa [#allocation4], 1 }
  0xb8   :  { %373 = vsyncpa [#allocation4 + $0x1], 1 }

// kernel: conv_block_forward.3
= control target key start
LH: loop header
LB: loop body
LE: loop exit
PB: predicated region body
PF: predicated region fallthrough
CT: control target
= control target key end

     0   :  { %s4697_s0 = inlined_call_operand.hbm [shape: f32[4,10,24,128], index: 0, kind: input, shape index: {}]   ;;  %s4698_s1 = inlined_call_operand.hbm [shape: f32[1,128], index: 1, kind: input, shape index: {}]   ;;  %s4699_s2 = inlined_call_operand.hbm [shape: f32[1,128], index: 2, kind: input, shape index: {}]   ;;  %s4700_s3 = inlined_call_operand.hbm [shape: bf16[3,3,128,128], index: 3, kind: input, shape index: {}]   ;;  %s4701_s4 = inlined_call_operand.hbm [shape: f32[1,128], index: 4, kind: input, shape index: {}]   ;;  %s4702_s5 = inlined_call_operand.hbm [shape: f32[2,16,16,128], index: 5, kind: output, shape index: {0}]   ;;  %s4703_s6 = inlined_call_operand.hbm [shape: f32[2,1,128], index: 6, kind: output, shape index: {1}]   ;;  %s4704_s7 = inlined_call_operand.hbm [shape: f32[2,1,128], index: 7, kind: output, shape index: {2}]  }
   0x1   :  { %4732 = sst [smem:[#allocation34_spill]] %s4697_s0 }
   0x2   :  { %4733 = sst [smem:[#allocation35_spill]] %s4698_s1 }
   0x3   :  { %4734 = sst [smem:[#allocation36_spill]] %s4699_s2 }
   0x4   :  { %4735 = sst [smem:[#allocation37_spill]] %s4700_s3 }
   0x5   :  { %4736 = sst [smem:[#allocation38_spill]] %s4701_s4 }
   0x6   :  { %4737 = sst [smem:[#allocation39_spill]] %s4702_s5 }
   0x7   :  { %4738 = sst [smem:[#allocation40_spill]] %s4703_s6 }
   0x8   :  { %4739 = sst [smem:[#allocation41_spill]] %s4704_s7 }
   0x9   :  { %13 = vsyncpa [#allocation3], 0 }
   0xa   :  { %15 = vsyncpa [#allocation3 + $0x1], 0 }
   0xb   :  { %16 = vsyncpa [#allocation6], 0 }
   0xc   :  { %17 = vsyncpa [#allocation9], 0 }
   0xd   :  { %18 = vsyncpa [#allocation4], 0 }
   0xe   :  { %20 = vsyncpa [#allocation4 + $0x1], 0 }
   0xf   :  { %21 = vsyncpa [#allocation13], 0 }
  0x10   :  { %23 = vsyncpa [#allocation13 + $0x1], 0  ;;  %s3890_s24 = smov 0   ;;  %s3892_s25 = smov 0  }
  0x11   :  { %s3894_s26 = smov 0   ;;  %s3896_s27 = smov 0  }
  0x12   :  { %s3898_s28 = smov 0   ;;  %s3900_s29 = smov 0  }
  0x13   :  { %s3902_s30 = smov 0   ;;  %s3904_s8 = smov 0  }
  0x14   :  { %s3906_s9 = smov 0   ;;  %s3908_s10 = smov 0  }
  0x15   :  { %s3910_s11 = smov 0   ;;  %s3912_s12 = smov 0  }
  0x16   :  { %s3914_s13 = smov 0   ;;  %s3916_s14 = smov 0  }
  0x17 LB: > { %4740 = sst [smem:[#allocation20_spill]] %s3785_s25  ;;  %s3957_s15 = sadd.s32 4294967295, %s3833_s14   ;;  %s3833_s14 = sphi %s3916_s14, %s29_s14   ;;  %s3829_s13 = sphi %s3914_s13, %s4814_s13   ;;  %s3825_s12 = sphi %s3912_s12, %s4802_s12   ;;  %s3821_s11 = sphi %s3910_s11, %s4801_s11   ;;  %s3817_s10 = sphi %s3908_s10, %s4813_s10   ;;  %s3813_s9 = sphi %s3906_s9, %s4812_s9   ;;  %s3809_s8 = sphi %s3904_s8, %s4811_s8   ;;  %s3805_s30 = sphi %s3902_s30, %s4810_s30   ;;  %s3801_s29 = sphi %s3900_s29, %s4809_s29   ;;  %s3797_s28 = sphi %s3898_s28, %s4808_s28   ;;  %s3793_s27 = sphi %s3896_s27, %s4807_s27   ;;  %s3789_s26 = sphi %s3894_s26, %s4806_s26   ;;  %s3785_s25 = sphi %s3892_s25, %s4805_s25   ;;  %s3781_s24 = sphi %s3890_s24, %s4796_s24  }
  0x18   : > { %4741 = sst [smem:[#allocation21_spill]] %s3793_s27  ;;  %s4705_s16 = sadd.s32 4294967294, %s3833_s14  }
  0x19   : > { %4742 = sst [smem:[#allocation22_spill]] %s3797_s28  ;;  %p65_p0 = scmp.ne.s32.totalorder %s3809_s8, %s3805_s30 }
  0x1a   : > { %4743 = sst [smem:[#allocation23_spill]] %s3817_s10  ;;  %p4716_p1 = scmp.eq.s32.totalorder %s3957_s15, 0 }
  0x1b   : > { %4744 = sst [smem:[#allocation24_spill]] %s3821_s11  ;;  %p174_p2 = scmp.ne.s32.totalorder %s3801_s29, %s3797_s28 }
  0x1c   : > { %4745 = sst [smem:[#allocation25_spill]] %s3825_s12  ;;  %p175_p3 = scmp.eq.s32.totalorder %s3957_s15, 3 }
  0x1d   : > { %4746 = sst [smem:[#allocation26_spill]] %s3829_s13  ;;  %p3967_p4 = por %p4716_p1, %p65_p0 }
  0x1e   : > { %p180_p5 = scmp.ne.s32.totalorder %s3797_s28, %s3793_s27  ;;  %p3973_p6 = por %p175_p3, %p174_p2 }
  0x1f   : > { %s4747_s17 = scalar_select %p3967_p4, 1, 0 }
  0x20   : > { %s4748_s18 = scalar_select %p3973_p6, 1, 0 }
  0x21   : > { %p181_p7 = scmp.eq.s32.totalorder %s4705_s16, 3  ;;  %p200_p8 = scmp.ne.s32.totalorder %s3789_s26, %s3785_s25 }
  0x22   : > { %4749 = sst [smem:[#allocation27_spill]] %s4748_s18  ;;  %p206_p9 = scmp.ne.s32.totalorder %s3785_s25, %s3781_s24 }
  0x23   : > { %p3982_p10 = por %p181_p7, %p180_p5  ;;  %p2544_p11 = scmp.ge.s32.totalorder %s3833_s14, 1 }
  0x24   : > { %p3987_p12 = por %p200_p8, %p175_p3  ;;  %p3991_p13 = por %p206_p9, %p181_p7 }
  0x25   : > { %s4750_s19 = scalar_select %p3982_p10, 1, 0 }
  0x26   : > { %s4752_s20 = scalar_select %p3987_p12, 1, 0 }
  0x27   : > { %4751 = sst [smem:[#allocation28_spill]] %s4750_s19  ;;  %p240_p0 = scmp.lt.s32.totalorder %s3833_s14, 5 }
  0x28   : > { %4753 = sst [smem:[#allocation29_spill]] %s4752_s20  ;;  %s3835_s23 = smov [#allocation5]  }
  0x29   : > { %s4754_s21 = scalar_select %p3991_p13, 1, 0 }
  0x2a   : > { %p3996_p2 = pnand %p2544_p11, %p240_p0  ;;  %s253_s24 = sshll.u32 %s3835_s23, 4  ;;  %s254_s24 = int_to_ptr.vmem [resolvable:$true] %s253_s24 }
  0x2b   : > { %4755 = sst [smem:[#allocation30_spill]] %s4754_s21  ;;  %s3836_s30 = smov [#allocation8]  }
  0x2c   : > { %s4756_s22 = scalar_select %p3996_p2, 1, 0 }
  0x2d   : > { %p3245_p5 = pneg %p3996_p2  ;;  %s274_s16 = sshll.u32 %s3836_s30, 4  ;;  %s4002_s16 = int_to_ptr.vmem [resolvable:$true] %s274_s16 }
  0x2e   : > { %s3837_s21 = smov [#allocation7]   ;;  %s4758_s1 = sld [smem:[#allocation35_spill]] }
  0x2f   : > { %p4006_p3 = pnand %p3245_p5, %p4716_p1  ;;  %s4010_s27 = sshll.u32 %s3837_s21, 4  ;;  %s265_s27 = int_to_ptr.vmem [resolvable:$true] %s4010_s27 }
  0x31   : > { %p4020_p8 = pneg %p4006_p3 }
  0x34   : > { %s3477_s23 = scalar_lea.hbm %s4758_s1, 16 }
  0x35   : > { %p3478_p7 = scmp.ne.s32.totalorder %s4758_s1, %s3477_s23  ;;  %p3484_p0 = scmp.lt.u32.totalorder %s3477_s23, %s4758_s1 }
  0x37   : > { %p3480_p9 = pnand %p4020_p8, %p3478_p7 }
  0x39   : > { %p3481_p11 = pneg %p3480_p9 }
  0x3b   : > { %p3486_p5 = pnand %p3484_p0, %p3481_p11 }
  0x3d   : > { %3489 = shalt.err (!%p3486_p5)
}
  0x3e   : > { %s3490_s5 = scalar_lea.vmem %s254_s24, 16  ;;  %s3497_s6 = scalar_lea.vmem %s254_s24, 32 }
  0x3f   : > { %p3491_p1 = scmp.ne.s32.totalorder %s254_s24, %s3490_s5  ;;  %p3498_p6 = scmp.lt.s32.totalorder %s254_s24, %s254_s24 }
  0x40   : > { %p3499_p12 = scmp.lt.s32.totalorder %s3497_s6, %s3490_s5 }
  0x41   : > { %p3493_p13 = pnand %p3491_p1, %p4020_p8 }
  0x42   : > { %p3500_p4 = por %p3499_p12, %p3498_p6 }
  0x43   : > { %p3494_p10 = pneg %p3493_p13 }
  0x45   : > { %p3501_p2 = pnand %p3500_p4, %p3494_p10 }
  0x47   : > { %3504 = shalt.err (!%p3501_p2)
}
  0x48   : > { %3248 = dma.hbm_to_vmem [thread:$0]  (!%p4006_p3), %s4758_s1, 16, %s254_s24, [#allocation6]  }
  0x49   : > { %s4760_s3 = sld [smem:[#allocation37_spill]] }
  0x4f   : > { %s3505_s21 = scalar_lea.hbm %s4760_s3, 9216 }
  0x50   : > { %p3506_p1 = scmp.ne.s32.totalorder %s4760_s3, %s3505_s21  ;;  %p3512_p4 = scmp.lt.u32.totalorder %s3505_s21, %s4760_s3 }
  0x52   : > { %p3508_p13 = pnand %p3506_p1, %p4020_p8 }
  0x54   : > { %p3509_p6 = pneg %p3508_p13 }
  0x56   : > { %p3514_p10 = pnand %p3512_p4, %p3509_p6 }
  0x58   : > { %3517 = shalt.err (!%p3514_p10)
}
  0x59   : > { %s3518_s24 = scalar_lea.vmem %s4002_s16, 9216  ;;  %p3526_p9 = scmp.lt.s32.totalorder %s4002_s16, %s4002_s16 }
  0x5a   : > { %p3519_p12 = scmp.ne.s32.totalorder %s4002_s16, %s3518_s24  ;;  %p3527_p11 = scmp.lt.s32.totalorder %s3518_s24, %s3518_s24 }
  0x5c   : > { %p3521_p2 = pnand %p3519_p12, %p4020_p8  ;;  %p3528_p0 = por %p3527_p11, %p3526_p9 }
  0x5e   : > { %p3522_p7 = pneg %p3521_p2 }
  0x60   : > { %p3529_p5 = pnand %p3528_p0, %p3522_p7 }
  0x62   : > { %3532 = shalt.err (!%p3529_p5)
}
  0x63   : > { %s3838_s10 = smov 64   ;;  %s3839_s11 = smov 4  }
  0x64   : > { %3254 = dma.hbm_to_vmem [thread:$0]  (!%p4006_p3), %s4760_s3, 9216, %s4002_s16, [#allocation9], %s3838_s10, %s3838_s10, %s3839_s11  }
  0x65   : > { %s3840_s20 = smov [#allocation10]   ;;  %s4761_s2 = sld [smem:[#allocation36_spill]] }
  0x66   : > { %s288_s23 = sshll.u32 %s3840_s20, 4  ;;  %s289_s23 = int_to_ptr.vmem [resolvable:$true] %s288_s23 }
  0x6b   : > { %s3533_s6 = scalar_lea.hbm %s4761_s2, 16 }
  0x6c   : > { %p3534_p1 = scmp.ne.s32.totalorder %s4761_s2, %s3533_s6  ;;  %p3540_p4 = scmp.lt.u32.totalorder %s3533_s6, %s4761_s2 }
  0x6e   : > { %p3536_p13 = pnand %p3534_p1, %p4020_p8 }
  0x70   : > { %p3537_p6 = pneg %p3536_p13 }
  0x72   : > { %p3542_p10 = pnand %p3540_p4, %p3537_p6 }
  0x74   : > { %3545 = shalt.err (!%p3542_p10)
}
  0x75   : > { %s3546_s16 = scalar_lea.vmem %s265_s27, 16  ;;  %s3553_s10 = scalar_lea.vmem %s265_s27, 32 }
  0x76   : > { %p3547_p12 = scmp.ne.s32.totalorder %s265_s27, %s3546_s16  ;;  %p3554_p9 = scmp.lt.s32.totalorder %s265_s27, %s265_s27 }
  0x77   : > { %p3555_p11 = scmp.lt.s32.totalorder %s3553_s10, %s3546_s16 }
  0x78   : > { %p3549_p2 = pnand %p3547_p12, %p4020_p8 }
  0x79   : > { %p3556_p0 = por %p3555_p11, %p3554_p9 }
  0x7a   : > { %p3550_p7 = pneg %p3549_p2 }
  0x7c   : > { %p3557_p5 = pnand %p3556_p0, %p3550_p7 }
  0x7e   : > { %3560 = shalt.err (!%p3557_p5)
}
  0x7f   : > { %3251 = dma.hbm_to_vmem [thread:$0]  (!%p4006_p3), %s4761_s2, 16, %s265_s27, [#allocation6]  }
  0x80   : > { %s4762_s4 = sld [smem:[#allocation38_spill]] }
  0x86   : > { %s3561_s7 = scalar_lea.hbm %s4762_s4, 16 }
  0x87   : > { %p3562_p1 = scmp.ne.s32.totalorder %s4762_s4, %s3561_s7  ;;  %p3568_p4 = scmp.lt.u32.totalorder %s3561_s7, %s4762_s4 }
  0x89   : > { %p3564_p13 = pnand %p3562_p1, %p4020_p8 }
  0x8b   : > { %p3565_p6 = pneg %p3564_p13 }
  0x8d   : > { %p3570_p10 = pnand %p3568_p4, %p3565_p6 }
  0x8f   : > { %3573 = shalt.err (!%p3570_p10)
}
  0x90   : > { %s3574_s6 = scalar_lea.vmem %s289_s23, 16  ;;  %s3581_s27 = scalar_lea.vmem %s289_s23, 32 }
  0x91   : > { %p3575_p12 = scmp.ne.s32.totalorder %s289_s23, %s3574_s6  ;;  %p3582_p9 = scmp.lt.s32.totalorder %s289_s23, %s289_s23 }
  0x92   : > { %p3583_p11 = scmp.lt.s32.totalorder %s3581_s27, %s3574_s6 }
  0x93   : > { %p3577_p2 = pnand %p3575_p12, %p4020_p8 }
  0x94   : > { %p3584_p0 = por %p3583_p11, %p3582_p9 }
  0x95   : > { %p3578_p7 = pneg %p3577_p2 }
  0x97   : > { %p3585_p5 = pnand %p3584_p0, %p3578_p7 }
  0x99   : > { %3588 = shalt.err (!%p3585_p5)
}
  0x9a   : > { %3257 = dma.hbm_to_vmem [thread:$0]  (!%p4006_p3), %s4762_s4, 16, %s289_s23, [#allocation9]  }
  0x9b   : > { %s38_s30 = sadd.s32 1, %s3825_s12  ;;  %s41_s19 = sadd.s32 1, %s3829_s13 }
  0x9c   : > { %p39_p8 = scmp.ge.s32.totalorder %s38_s30, 2  ;;  %s2542_s10 = sshll.u32 %s3829_s13, 1 }
  0x9d   : > { %s52_s1 = sadd.s32 1, %s3813_s9  ;;  %s46_s11 = sadd.s32 %s3825_s12, %s2542_s10 }
  0x9e   : > { %s4816_s30 = smov (%p39_p8, %s38_s30), 0  ;;  %s4818_s19 = smov (!%p39_p8, %s41_s19), %s3829_s13 }
  0x9f   : > { %4763 = sst [smem:[#allocation31_spill]] %s4816_s30  ;;  %p59_p1 = scmp.ne.s32.totalorder %s3813_s9, %s3809_s8 }
  0xa0   : > { %p43_p13 = scmp.ge.s32.totalorder %s4818_s19, 2  ;;  %p60_p6 = scmp.eq.s32.totalorder %s3833_s14, 0 }
  0xa1   : > { %s160_s23 = ssub.s32 %s3825_s12, %s4816_s30  ;;  %s164_s25 = sadd.s32 1, %s3801_s29 }
  0xa2   : > { %s4820_s19 = smov (%p43_p13, %s4818_s19), 0  ;;  %p4112_p3 = por %p60_p6, %p59_p1 }
  0xa3   : > { %4764 = sst [smem:[#allocation32_spill]] %s4820_s19  ;;  %s190_s7 = sadd.s32 1, %s3789_s26 }
  0xa4   : > { %s2543_s18 = sshll.u32 %s4820_s19, 1  ;;  %s159_s20 = ssub.s32 %s3829_s13, %s4820_s19 }
  0xa5   : > { %s48_s21 = sadd.s32 %s2543_s18, %s4816_s30  ;;  %s161_s5 = sor.u32 %s160_s23, %s159_s20 }
  0xa6   : > { %s49_s6 = ssub.s32 %s46_s11, %s48_s21  ;;  %p162_p4 = scmp.eq.s32.totalorder %s161_s5, 0 }
  0xa7   : > { %p50_p10 = scmp.eq.s32.totalorder %s49_s6, 0  ;;  %p188_p12 = scmp.eq.s32.totalorder %s159_s20, 0 }
  0xa8   : > { %s4122_s27 = scalar_select %p162_p4, %s3801_s29, %s164_s25  }
  0xa9   : > { %s4125_s24 = scalar_select %p50_p10, %s3813_s9, %s52_s1  }
  0xaa   : > { %s4128_s16 = scalar_select %p188_p12, %s3789_s26, %s190_s7  }
  0xab   : > { %4766 = sst [smem:[#allocation33_spill]] %s4125_s24  ;;  %p3276_p2 = scmp.lt.s32.totalorder %s3833_s14, 4 }
  0xac   : > { %s299_s10 = sand.u32 1, %s3813_s9   ;;  %s3219_s3 = smul.u32 3840, %s46_s11 }
  0xad   : > { %s3218_s2 = smul.u32 240, %s299_s10  ;;  %p4134_p7 = pnand %p3276_p2, %p4112_p3 }
  0xae   : > { %s4768_s0 = sld [smem:[#allocation34_spill]]  ;;  %s4145_s11 = scalar_lea.sflag [#allocation3], %s299_s10 }
  0xaf   : > { %s303_s1 = scalar_lea.vmem [#allocation2], %s3218_s2  ;;  %p3591_p11 = pneg %p4134_p7 }
  0xb0   : > { %s312_s7 = sshll.u32 %s303_s1, 4  ;;  %s4143_s7 = int_to_ptr.vmem [resolvable:$true] %s312_s7 }
  0xb4   : > { %s4141_s25 = scalar_lea.hbm %s4768_s0, %s3219_s3  ;;  %s3594_s21 = scalar_lea.hbm %s4768_s0, 15360 }
  0xb5   : > { %s3589_s28 = scalar_lea.hbm %s4141_s25, 3840  ;;  %p3595_p8 = scmp.lt.u32.totalorder %s4141_s25, %s4768_s0 }
  0xb6   : > { %p3590_p9 = scmp.ne.s32.totalorder %s4141_s25, %s3589_s28  ;;  %p3596_p1 = scmp.lt.u32.totalorder %s3594_s21, %s3589_s28 }
  0xb7   : > { %p3598_p6 = scmp.lt.u32.totalorder %s3589_s28, %s4141_s25 }
  0xb8   : > { %p3592_p0 = pnand %p3591_p11, %p3590_p9  ;;  %p3597_p13 = por %p3596_p1, %p3595_p8 }
  0xba   : > { %p3593_p5 = pneg %p3592_p0  ;;  %p3599_p3 = por %p3598_p6, %p3597_p13 }
  0xbc   : > { %p3600_p4 = pnand %p3599_p3, %p3593_p5 }
  0xbe   : > { %3603 = shalt.err (!%p3600_p4)
}
  0xbf   : > { %s3604_s2 = scalar_lea.vmem %s4143_s7, 3840  ;;  %s3841_s10 = smov [#allocation2]  }
  0xc0   : > { %p3605_p10 = scmp.ne.s32.totalorder %s4143_s7, %s3604_s2  ;;  %s3609_s23 = sshll.u32 %s3841_s10, 4  ;;  %s3610_s23 = int_to_ptr.vmem [resolvable:$false] %s3609_s23 }
  0xc1   : > { %s3611_s18 = scalar_lea.vmem %s3610_s23, 7680  ;;  %p3612_p9 = scmp.lt.s32.totalorder %s4143_s7, %s3610_s23 }
  0xc2   : > { %p3607_p12 = pnand %p3605_p10, %p3591_p11  ;;  %p3613_p0 = scmp.lt.s32.totalorder %s3611_s18, %s3604_s2 }
  0xc4   : > { %p3608_p2 = pneg %p3607_p12  ;;  %p3614_p8 = por %p3613_p0, %p3612_p9 }
  0xc6   : > { %p3615_p1 = pnand %p3614_p8, %p3608_p2 }
  0xc8   : > { %3618 = shalt.err (!%p3615_p1)
}
  0xc9   : > { %s3842_s1 = smov 128   ;;  %s3843_s28 = smov 8  }
  0xca   : > { %3261 = dma.hbm_to_vmem [thread:$0]  (!%p4134_p7), %s4141_s25, 3840, %s4143_s7, %s4145_s11, %s3842_s1, %s3842_s1, %s3843_s28  }
  0xcb   : > { %p4769_p11 = scmp.ne.s32.totalorder %s4756_s22, 0 }
  0xcc   : > { %s326_s3 = sand.u32 (!%p4769_p11), 1, %s3809_s8   ;;  %p4770_p5 = scmp.ne.s32.totalorder (!%p4769_p11), %s4747_s17, 0 }
  0xcd   : > { %324 = sbr.rel (%p4769_p11) target bundleno = 724 (0x2d4), region = 40  ;;  %s327_s21 = scalar_lea.sflag (!%p4769_p11), [#allocation3], %s326_s3 }
  0xce   : > { %s3220_s20 = smul.u32 (!%p4769_p11), 240, %s326_s3 }
  0xd0   : > { %s4176_s5 = scalar_lea.vmem (!%p4769_p11), [#allocation2], %s3220_s20 }
  0xd4   : > { %3760 = dma.done.wait (%p4770_p5), %s327_s21, 3840  }
  0xd5   : > { %3762 = vsyncadd (%p4770_p5), %s327_s21, 4294963456  ;;  %p4771_p13 = scmp.eq.s32.totalorder %s3957_s15, 0 }
  0xd7   : > { %3764 = dma.done.wait (%p4771_p13), [#allocation6], 32   ;;  %p4772_p7 = pmov %p4771_p13 }
  0xd9   : > { %3766 = vsyncadd (%p4772_p7), [#allocation6], 4294967264  ;;  %p4773_p6 = pmov %p4772_p7 }
  0xdb   : > { %3768 = dma.done.wait (%p4773_p6), [#allocation9], 9232   ;;  %p4774_p3 = pmov %p4773_p6 }
  0xdc   : > { %s4775_s4 = sld [smem:[#allocation22_spill]]  ;;  %s4776_s22 = sld [smem:[#allocation20_spill]]  ;;  %v3405_v0 = vld [vmem:[#allocation8 + $0xc0] sm:$0xff]   ;;  %v3407_v2 = vld [vmem:[#allocation8 + $0xc8] sm:$0xff]   ;;  %v3409_v4 = vld [vmem:[#allocation8 + $0xd0] sm:$0xff]   ;;  %vm1625_vm1 = vcmask 1046528  }
  0xdd   : > { %3770 = vsyncadd (%p4774_p3), [#allocation9], 4294958064  ;;  %v3406_v1 = vld [vmem:[#allocation8 + $0x100] sm:$0xff]   ;;  %2786 = vmatprep.subr.bf16.mxu1 %v3405_v0  ;;  %v3408_v3 = vld [vmem:[#allocation8 + $0x108] sm:$0xff]   ;;  %vm940_vm0 = vsmask.f32 7424 }
  0xde   : > { %2914 = vmatprep.subr.bf16.mxu0 %v3406_v1  ;;  %2787 = vmatpush3.bf16.msra.mxu1 %v3405_v0  ;;  %v3410_v5 = vld [vmem:[#allocation8 + $0x110] sm:$0xff]   ;;  %v3411_v6 = vld [vmem:[#allocation8 + $0xd8] sm:$0xff]   ;;  %v3413_v8 = vld [vmem:[#allocation8 + $0xe0] sm:$0xff]   ;;  %s4777_s10 = sld [smem:[#allocation23_spill]] }
  0xdf   : > { %2915 = vmatpush3.bf16.msra.mxu0 %v3406_v1  ;;  %2788 = vmatprep.subr.bf16.mxu1 %v3407_v2  ;;  %v3412_v7 = vld [vmem:[#allocation8 + $0x118] sm:$0xff]   ;;  %v3414_v9 = vld [vmem:[#allocation8 + $0x120] sm:$0xff]   ;;  %v3415_v10 = vld [vmem:[#allocation8 + $0xe8] sm:$0xff]  }
  0xe0   : > { %2916 = vmatprep.subr.bf16.mxu0 %v3408_v3  ;;  %v3416_v11 = vld [vmem:[#allocation8 + $0x128] sm:$0xff]   ;;  %v3417_v24 = vld [vmem:[#allocation8 + $0xf0] sm:$0xff]   ;;  %v3419_v31 = vld [vmem:[#allocation8 + $0xf8] sm:$0xff]  }
  0xe1   : > { %v392_v12 = vld [vmem:[%s4176_s5 + $0x18] sm:$0xff]  ;;  %v393_v13 = vld [vmem:[%s4176_s5 + $0x20] sm:$0xff]  ;;  %v394_v14 = vld [vmem:[%s4176_s5 + $0x28] sm:$0xff] }
  0xe2   : > { %s4726_s25 = sand.u32 1, %s4775_s4   ;;  %s377_s7 = sand.u32 1, %s4776_s22   ;;  %2789 = vmatpush3.bf16.msra.mxu1 %v3407_v2  ;;  %v4199_v15 = vpack.c.bf16 %v393_v13, %v392_v12  ;;  %v422_v16 = vpack.c.bf16 %v394_v14, %v394_v14  ;;  %v395_v17 = vld [vmem:[%s4176_s5 + $0x30] sm:$0xff]  ;;  %v396_v18 = vld [vmem:[%s4176_s5 + $0x38] sm:$0xff]  ;;  %v397_v20 = vld [vmem:[%s4176_s5 + $0x40] sm:$0xff] }
  0xe3   : > { %s4194_s17 = sshll.u32 %s4726_s25, 7  ;;  %2917 = vmatpush3.bf16.msra.mxu0 %v3408_v3  ;;  %2790 = vmatprep.subr.bf16.mxu1 %v3409_v4  ;;  %v4203_v19 = vpack.c.bf16 %v396_v18, %v395_v17  ;;  %v3418_v25 = vld [vmem:[#allocation8 + $0x130] sm:$0xff]   ;;  %v4209_v27 = vpack.c.bf16 %v397_v20, %v397_v20  ;;  %v3420_v43 = vld [vmem:[#allocation8 + $0x138] sm:$0xff]   ;;  %v3421_v50 = vld [vmem:[#allocation8] sm:$0xff]   ;;  %s4511_s6 = scalar_lea.vmem [#allocation12], %s377_s7 }
  0xe4   : > { %2918 = vmatprep.subr.bf16.mxu0 %v3410_v5  ;;  %2802 = vmatprep.mubr.bf16.mxu1 %v4199_v15  ;;  %v954_v21 = vshrl.u32 %v4199_v15, 16  ;;  %v956_v22 = vshll.u32 %v4199_v15, 16  ;;  %v961_v23 = vshll.u32 %v422_v16, 16  ;;  %v1630_v26 = vrot.slane %v422_v16, 1  ;;  %v398_v33 = vld [vmem:[%s4176_s5 + $0x48] sm:$0xff]  ;;  %v399_v34 = vld [vmem:[%s4176_s5 + $0x50] sm:$0xff] }
  0xe5   : > { %v968_v28 = vshll.u32 %v4203_v19, 16  ;;  %v1629_v35 = vrot.slane %v4199_v15, 1  ;;  %v966_v36 = vshrl.u32 %v4203_v19, 16  ;;  %v973_v38 = vshll.u32 %v4209_v27, 16  ;;  %v400_v40 = vld [vmem:[%s4176_s5 + $0x58] sm:$0xff]  ;;  %v401_v41 = vld [vmem:[%s4176_s5 + $0x60] sm:$0xff] }
  0xe6   : > { %2791 = vmatpush3.bf16.msra.mxu1 %v3409_v4  ;;  %v958_v29 = vrot.slane %v956_v22, 1  ;;  %v963_v30 = vrot.slane %v961_v23, 1  ;;  %v4217_v39 = vpack.c.bf16 %v399_v34, %v398_v33  ;;  %v402_v42 = vld [vmem:[%s4176_s5 + $0x68] sm:$0xff]  ;;  %v4225_v45 = vpack.c.bf16 %v400_v40, %v400_v40  ;;  %v403_v49 = vld [vmem:[%s4176_s5 + $0x70] sm:$0xff]  ;;  %v404_v60 = vld [vmem:[%s4176_s5 + $0x78] sm:$0xff]  ;;  %s4507_s11 = scalar_lea.vmem [#allocation11], %s4194_s17 }
  0xe7   : > { %2919 = vmatpush3.bf16.msra.mxu0 %v3410_v5  ;;  %2792 = vmatprep.subr.bf16.mxu1 %v3411_v6  ;;  %v970_v37 = vrot.slane %v968_v28, 1  ;;  %v4227_v46 = vpack.c.bf16 %v402_v42, %v401_v41  ;;  %v4230_v47 = vsel %vm1625_vm1, %v1629_v35, %v1630_v26  ;;  %v4237_v53 = vpack.c.bf16 %v403_v49, %v403_v49  ;;  %v3422_v58 = vld [vmem:[#allocation8 + $0x1c0] sm:$0xff]   ;;  %v3425_v17 = vld [vmem:[#allocation8 + $0x10] sm:$0xff]   ;;  %v3427_v33 = vld [vmem:[#allocation8 + $0x18] sm:$0xff]   ;;  %s4515_s2 = scalar_lea.vmem [#allocation14], %s377_s7  ;;  %p2631_p4 = scmp.ne.s32.totalorder %s4777_s10, 0 }
  0xe8   : > { %2920 = vmatprep.subr.bf16.mxu0 %v3412_v7  ;;  %v959_v32 = vor.u32 %v958_v29, %v954_v21  ;;  %v980_v48 = vshll.u32 %v4217_v39, 16  ;;  %v978_v51 = vshrl.u32 %v4217_v39, 16  ;;  %v985_v52 = vshll.u32 %v4225_v45, 16  ;;  %v405_v63 = vld [vmem:[%s4176_s5 + $0x80] sm:$0xff]  ;;  %v406_v0 = vld [vmem:[%s4176_s5 + $0x88] sm:$0xff]  ;;  %v407_v5 = vld [vmem:[%s4176_s5 + $0x90] sm:$0xff] }
  0xe9   : > { %v992_v54 = vshll.u32 %v4227_v46, 16  ;;  %v971_v55 = vor.u32 %v970_v37, %v966_v36  ;;  %v975_v56 = vrot.slane %v973_v38, 1  ;;  %v990_v59 = vshrl.u32 %v4227_v46, 16  ;;  %v409_v12 = vld [vmem:[%s4176_s5 + $0xa0] sm:$0xff]  ;;  %v411_v26 = vld [vmem:[%s4176_s5 + $0xb0] sm:$0xff]  ;;  %v412_v28 = vld [vmem:[%s4176_s5 + $0xb8] sm:$0xff] }
  0xea   : > { %2793 = vmatpush3.bf16.msra.mxu1 %v3411_v6  ;;  %v4223_v44 = vsel %vm940_vm0, %v959_v32, %v963_v30  ;;  %v982_v57 = vrot.slane %v980_v48, 1  ;;  %v997_v62 = vshll.u32 %v4237_v53, 16  ;;  %v987_v2 = vrot.slane %v985_v52, 1  ;;  %v408_v6 = vld [vmem:[%s4176_s5 + $0x98] sm:$0xff]  ;;  %v414_v32 = vld [vmem:[%s4176_s5 + $0xc8] sm:$0xff]  ;;  %v415_v48 = vld [vmem:[%s4176_s5 + $0xd0] sm:$0xff] }
  0xeb   : > { %2921 = vmatpush3.bf16.msra.mxu0 %v3412_v7  ;;  %2794 = vmatprep.subr.bf16.mxu1 %v3413_v8  ;;  %v994_v61 = vrot.slane %v992_v54, 1  ;;  %v4245_v3 = vpack.c.bf16 %v405_v63, %v404_v60  ;;  %v4247_v4 = vpack.c.bf16 %v406_v0, %v406_v0  ;;  %v4252_v7 = vsel %vm940_vm0, %v971_v55, %v975_v56  ;;  %v3426_v22 = vld [vmem:[#allocation8 + $0x1d0] sm:$0xff]   ;;  %v3428_v38 = vld [vmem:[#allocation8 + $0x1d8] sm:$0xff]   ;;  %v3429_v54 = vld [vmem:[#allocation8 + $0x20] sm:$0xff]  }
  0xec   : > { %2922 = vmatprep.subr.bf16.mxu0 %v3414_v9  ;;  %2930 = vmatprep.mubr.bf16.mxu0 %v4223_v44  ;;  %v983_v1 = vor.u32 %v982_v57, %v978_v51  ;;  %v999_v14 = vrot.slane %v997_v62, 1  ;;  %v4265_v23 = vpack.c.bf16 %v409_v12, %v409_v12  ;;  %v4281_v37 = vpack.c.bf16 %v412_v28, %v412_v28  ;;  %v3431_v60 = vld [vmem:[#allocation8 + $0x28] sm:$0xff]   ;;  %v3434_v12 = vld [vmem:[#allocation8 + $0x1f0] sm:$0xff]  }
  0xed   : > { %v995_v13 = vor.u32 %v994_v61, %v990_v59  ;;  %v1002_v18 = vshrl.u32 %v4245_v3, 16  ;;  %v1009_v21 = vshll.u32 %v4247_v4, 16  ;;  %v4295_v57 = vpack.c.bf16 %v415_v48, %v415_v48  ;;  %v3430_v59 = vld [vmem:[#allocation8 + $0x1e0] sm:$0xff]  }
  0xee   : > { %2795 = vmatpush3.bf16.msra.mxu1 %v3413_v8  ;;  %v3423_v8 = vld [vmem:[#allocation8 + $0x8] sm:$0xff]   ;;  %v4261_v16 = vsel %vm940_vm0, %v983_v1, %v987_v2  ;;  %v1021_v41 = vshll.u32 %v4265_v23, 16  ;;  %v1033_v52 = vshll.u32 %v4281_v37, 16  ;;  %v3445_v48 = vld [vmem:[#allocation8 + $0x1a0] sm:$0xff]  }
  0xef   : > { %2923 = vmatpush3.bf16.msra.mxu0 %v3414_v9  ;;  %2796 = vmatprep.subr.bf16.mxu1 %v3415_v10  ;;  %v4254_v9 = vpack.c.bf16 %v408_v6, %v407_v5  ;;  %v4274_v29 = vsel %vm940_vm0, %v995_v13, %v999_v14  ;;  %v1011_v35 = vrot.slane %v1009_v21, 1  ;;  %v1045_v2 = vshll.u32 %v4295_v57, 16  ;;  %v3432_v5 = vld [vmem:[#allocation8 + $0x1e8] sm:$0xff]  }
  0xf0   : > { %2924 = vmatprep.subr.bf16.mxu0 %v3416_v11  ;;  %v1023_v56 = vrot.slane %v1021_v41, 1  ;;  %v1035_v62 = vrot.slane %v1033_v52, 1  ;;  %v389_v13 = vld [vmem:[%s4176_s5] sm:$0xff]  ;;  %v390_v14 = vld [vmem:[%s4176_s5 + $0x8] sm:$0xff] }
  0xf1   : > { %v1014_v36 = vshrl.u32 %v4254_v9, 16  ;;  %v4317_v21 = vpack.c.bf16 %v390_v14, %v389_v13  ;;  %v418_v28 = vld [vmem:[%s4176_s5 + $0xe8] sm:$0xff] }
  0xf2   : > { %2797 = vmatpush3.bf16.msra.mxu1 %v3415_v10  ;;  %v3424_v10 = vld [vmem:[#allocation8 + $0x1c8] sm:$0xff]   ;;  %v3453_v13 = vld [vmem:[#allocation8 + $0x40] sm:$0xff]  }
  0xf3   : > { %2925 = vmatpush3.bf16.msra.mxu0 %v3416_v11  ;;  %2798 = vmatprep.subr.bf16.mxu1 %v3417_v24  ;;  %v1004_v11 = vshll.u32 %v4245_v3, 16  ;;  %v3447_v52 = vld [vmem:[#allocation8 + $0x1a8] sm:$0xff]   ;;  %v3454_v14 = vld [vmem:[#allocation8 + $0x140] sm:$0xff]  }
  0xf4   : > { %2926 = vmatprep.subr.bf16.mxu0 %v3418_v25 }
  0xf5   : > { %v1006_v20 = vrot.slane %v1004_v11, 1  ;;  %v1047_v11 = vrot.slane %v1045_v2, 1  ;;  %v1626_v2 = vrot.slane %v4317_v21, 1 }
  0xf6   : > { %2799 = vmatpush3.bf16.msra.mxu1 %v3417_v24  ;;  %v1016_v24 = vshll.u32 %v4254_v9, 16 }
  0xf7   : > { %2927 = vmatpush3.bf16.msra.mxu0 %v3418_v25  ;;  %2800 = vmatprep.subr.bf16.mxu1 %v3419_v31  ;;  %v410_v25 = vld [vmem:[%s4176_s5 + $0xa8] sm:$0xff]  ;;  %v1007_v34 = vor.u32 %v1006_v20, %v1002_v18 }
  0xf8   : > { %2928 = vmatprep.subr.bf16.mxu0 %v3420_v43  ;;  %v4276_v30 = vpack.c.bf16 %v411_v26, %v410_v25  ;;  %v1018_v40 = vrot.slane %v1016_v24, 1  ;;  %v3435_v18 = vld [vmem:[#allocation8 + $0x38] sm:$0xff]   ;;  %v3438_v26 = vld [vmem:[#allocation8 + $0x80] sm:$0xff]  }
  0xf9   : > { %v3436_v20 = vld [vmem:[#allocation8 + $0x1f8] sm:$0xff]  }
  0xfa   : > { %2801 = vmatpush3.bf16.msra.mxu1 %v3419_v31  ;;  %v413_v31 = vld [vmem:[%s4176_s5 + $0xc0] sm:$0xff]  ;;  %v1028_v42 = vshll.u32 %v4276_v30, 16  ;;  %v1026_v49 = vshrl.u32 %v4276_v30, 16  ;;  %v1019_v55 = vor.u32 %v1018_v40, %v1014_v36  ;;  %v416_v24 = vld [vmem:[%s4176_s5 + $0xd8] sm:$0xff] }
  0xfb   : > { %2929 = vmatpush3.bf16.msra.mxu0 %v3420_v43  ;;  %2818 = vmatprep.subr.bf16.mxu1 %v3421_v50  ;;  %v4285_v43 = vpack.c.bf16 %v414_v32, %v413_v31  ;;  %v417_v25 = vld [vmem:[%s4176_s5 + $0xe0] sm:$0xff] }
  0xfc   : > { %2946 = vmatprep.subr.bf16.mxu0 %v3422_v58  ;;  %v1030_v51 = vrot.slane %v1028_v42, 1  ;;  %v4302_v0 = vsel %vm940_vm0, %v1019_v55, %v1023_v56  ;;  %v3439_v31 = vld [vmem:[#allocation8 + $0x188] sm:$0xff]   ;;  %v4326_v32 = vpack.c.bf16 %v417_v25, %v416_v24  ;;  %v3442_v40 = vld [vmem:[#allocation8 + $0x90] sm:$0xff]   ;;  %v3444_v42 = vld [vmem:[#allocation8 + $0x98] sm:$0xff]  }
  0xfd   : > { %2803 = vmatmul.mubr.bf16.vlgmr.msra.gmra.mrb[0].mxu1 %v4203_v19  ;;  %v1038_v63 = vshrl.u32 %v4285_v43, 16  ;;  %v3457_v25 = vld [vmem:[#allocation8 + $0x50] sm:$0xff]  }
  0xfe   : > { %2931 = vmatmul.mubr.bf16.vlgmr.msra.gmra.mrb[0].mxu0 %v4252_v7  ;;  %2819 = vmatpush3.bf16.msra.mxu1 %v3421_v50  ;;  %v4292_v50 = vsel %vm940_vm0, %v1007_v34, %v1011_v35  ;;  %v1031_v61 = vor.u32 %v1030_v51, %v1026_v49  ;;  %v438_v34 = vpack.c.bf16 %v418_v28, %v418_v28  ;;  %v1653_v35 = vrot.slane %v4326_v32, 1  ;;  %v3446_v51 = vld [vmem:[#allocation8 + $0xa0] sm:$0xff]  }
  0xff   : > { %2947 = vmatpush3.bf16.msra.mxu0 %v3422_v58  ;;  %2820 = vmatprep.subr.bf16.mxu1 %v3423_v8  ;;  %v1040_v58 = vshll.u32 %v4285_v43, 16  ;;  %v1052_v49 = vshll.u32 %v4326_v32, 16  ;;  %v1638_v28 = vrot.slane %v4227_v46, 1 }
 0x100   : > { %2948 = vmatprep.subr.bf16.mxu0 %v3424_v10  ;;  %2806 = vmatprep.mubr.bf16.mxu1 %v4217_v39  ;;  %v4308_v6 = vsel %vm940_vm0, %v1031_v61, %v1035_v62  ;;  %v1654_v36 = vrot.slane %v438_v34, 1  ;;  %v1057_v55 = vshll.u32 %v438_v34, 16  ;;  %v3449_v61 = vld [vmem:[#allocation8 + $0x1b0] sm:$0xff]   ;;  %v3459_v34 = vld [vmem:[#allocation8 + $0x58] sm:$0xff]  }
 0x101   : > { %2934 = vmatprep.mubr.bf16.mxu0 %v4261_v16  ;;  %v1042_v1 = vrot.slane %v1040_v58, 1  ;;  %v1054_v56 = vrot.slane %v1052_v49, 1  ;;  %v391_v58 = vld [vmem:[%s4176_s5 + $0x10] sm:$0xff] }
 0x102   : > { %2821 = vmatpush3.bf16.msra.mxu1 %v3423_v8  ;;  %v3433_v8 = vld [vmem:[#allocation8 + $0x30] sm:$0xff]   ;;  %v4333_v41 = vsel %vm1625_vm1, %v1653_v35, %v1654_v36  ;;  %v1642_v35 = vrot.slane %v4247_v4, 1  ;;  %v3462_v36 = vld [vmem:[#allocation8 + $0x160] sm:$0xff]   ;;  %v3464_v4 = vld [vmem:[#allocation8 + $0x168] sm:$0xff]  }
 0x103   : > { %2949 = vmatpush3.bf16.msra.mxu0 %v3424_v10  ;;  %2822 = vmatprep.subr.bf16.mxu1 %v3425_v17  ;;  %v1043_v10 = vor.u32 %v1042_v1, %v1038_v63  ;;  %v1059_v63 = vrot.slane %v1057_v55, 1  ;;  %v3450_v1 = vld [vmem:[#allocation8 + $0xb0] sm:$0xff]  }
 0x104   : > { %2950 = vmatprep.subr.bf16.mxu0 %v3426_v22 }
 0x105   : > { %2807 = vmatmul.mubr.bf16.gmra.mrb[4].mxu1 %v4227_v46 }
 0x106   : > { %2935 = vmatmul.mubr.bf16.gmra.mrb[4].mxu0 %v4274_v29  ;;  %2823 = vmatpush3.bf16.msra.mxu1 %v3425_v17  ;;  %v4315_v17 = vsel %vm940_vm0, %v1043_v10, %v1047_v11  ;;  %v3451_v10 = vld [vmem:[#allocation8 + $0x1b8] sm:$0xff]  }
 0x107   : > { %2951 = vmatpush3.bf16.msra.mxu0 %v3426_v22  ;;  %2824 = vmatprep.subr.bf16.mxu1 %v3427_v33  ;;  %v3437_v22 = vld [vmem:[#allocation8 + $0x180] sm:$0xff]   ;;  %v3452_v11 = vld [vmem:[#allocation8 + $0xb8] sm:$0xff]  }
 0x108   : > { %2952 = vmatprep.subr.bf16.mxu0 %v3428_v38  ;;  %2810 = vmatprep.mubr.bf16.mxu1 %v4245_v3 }
 0x109   : > { %2938 = vmatprep.mubr.bf16.mxu0 %v4292_v50 }
 0x10a   : > { %2825 = vmatpush3.bf16.msra.mxu1 %v3427_v33  ;;  %v3440_v33 = vld [vmem:[#allocation8 + $0x88] sm:$0xff]  }
 0x10b   : > { %2953 = vmatpush3.bf16.msra.mxu0 %v3428_v38  ;;  %2826 = vmatprep.subr.bf16.mxu1 %v3429_v54  ;;  %v3441_v38 = vld [vmem:[#allocation8 + $0x190] sm:$0xff]  }
 0x10c   : > { %2954 = vmatprep.subr.bf16.mxu0 %v3430_v59 }
 0x10d   : > { %2811 = vmatmul.mubr.bf16.gmra.mrb[8].mxu1 %v4254_v9 }
 0x10e   : > { %2939 = vmatmul.mubr.bf16.gmra.mrb[8].mxu0 %v4302_v0  ;;  %2827 = vmatpush3.bf16.msra.mxu1 %v3429_v54  ;;  %v1050_v54 = vshrl.u32 %v4326_v32, 16 }
 0x10f   : > { %2955 = vmatpush3.bf16.msra.mxu0 %v3430_v59  ;;  %2828 = vmatprep.subr.bf16.mxu1 %v3431_v60  ;;  %v3448_v59 = vld [vmem:[#allocation8 + $0xa8] sm:$0xff]  }
 0x110   : > { %2956 = vmatprep.subr.bf16.mxu0 %v3432_v5  ;;  %2814 = vmatprep.mubr.bf16.mxu1 %v4276_v30  ;;  %v1055_v62 = vor.u32 %v1054_v56, %v1050_v54  ;;  %v1648_v54 = vrot.slane %v4281_v37, 1  ;;  %v3469_v37 = vld [vmem:[#allocation8 + $0x200] sm:$0xff]  }
 0x111   : > { %2942 = vmatprep.mubr.bf16.mxu0 %v4308_v6 }
 0x112   : > { %2829 = vmatpush3.bf16.msra.mxu1 %v3431_v60  ;;  %v4345_v60 = vpack.c.bf16 %v391_v58, %v391_v58 }
 0x113   : > { %2957 = vmatpush3.bf16.msra.mxu0 %v3432_v5  ;;  %2830 = vmatprep.subr.bf16.mxu1 %v3433_v8 }
 0x114   : > { %2958 = vmatprep.subr.bf16.mxu0 %v3434_v12  ;;  %v1627_v5 = vrot.slane %v4345_v60, 1 }
 0x115   : > { %2815 = vmatmul.mubr.bf16.gmra.mrb[12].mxu1 %v4285_v43 }
 0x116   : > { %2943 = vmatmul.mubr.bf16.gmra.mrb[12].mxu0 %v4315_v17  ;;  %2831 = vmatpush3.bf16.msra.mxu1 %v3433_v8  ;;  %v1060_v8 = vsel %vm940_vm0, %v1055_v62, %v1059_v63  ;;  %v1651_v62 = vrot.slane %v4295_v57, 1  ;;  %v3475_v63 = vld [vmem:[#allocation8 + $0x230] sm:$0xff]  }
 0x117   : > { %2959 = vmatpush3.bf16.msra.mxu0 %v3434_v12  ;;  %2832 = vmatprep.subr.bf16.mxu1 %v3435_v18  ;;  %v1628_v12 = vsel %vm1625_vm1, %v1626_v2, %v1627_v5 }
 0x118   : > { %2960 = vmatprep.subr.bf16.mxu0 %v3436_v20  ;;  %2834 = vmatprep.mubr.bf16.mxu1 %v4317_v21 }
 0x119   : > { %2962 = vmatprep.mubr.bf16.mxu0 %v4252_v7 }
 0x11a   : > { %2833 = vmatpush3.bf16.msra.mxu1 %v3435_v18  ;;  %v1633_v18 = vrot.slane %v4209_v27, 1  ;;  %v1636_v27 = vrot.slane %v4225_v45, 1 }
 0x11b   : > { %2961 = vmatpush3.bf16.msra.mxu0 %v3436_v20  ;;  %2850 = vmatprep.subr.bf16.mxu1 %v3437_v22  ;;  %v3455_v20 = vld [vmem:[#allocation8 + $0x48] sm:$0xff]  }
 0x11c   : > { %2978 = vmatprep.subr.bf16.mxu0 %v3438_v26 }
 0x11d   : > { %2835 = vmatmul.mubr.bf16.vlgmr.msra.gmra.mrb[0].mxu1 %v4199_v15  ;;  %v3443_v15 = vld [vmem:[#allocation8 + $0x198] sm:$0xff]  }
 0x11e   : > { %2963 = vmatmul.mubr.bf16.vlgmr.msra.gmra.mrb[0].mxu0 %v4261_v16  ;;  %2851 = vmatpush3.bf16.msra.mxu1 %v3437_v22  ;;  %v3456_v22 = vld [vmem:[#allocation8 + $0x148] sm:$0xff]  }
 0x11f   : > { %2979 = vmatpush3.bf16.msra.mxu0 %v3438_v26  ;;  %2852 = vmatprep.subr.bf16.mxu1 %v3439_v31  ;;  %v3458_v26 = vld [vmem:[#allocation8 + $0x150] sm:$0xff]  }
 0x120   : > { %2980 = vmatprep.subr.bf16.mxu0 %v3440_v33  ;;  %2838 = vmatprep.mubr.bf16.mxu1 %v4203_v19 }
 0x121   : > { %2966 = vmatprep.mubr.bf16.mxu0 %v4274_v29 }
 0x122   : > { %2853 = vmatpush3.bf16.msra.mxu1 %v3439_v31  ;;  %v1639_v31 = vrot.slane %v4237_v53, 1  ;;  %v1641_v53 = vrot.slane %v4245_v3, 1 }
 0x123   : > { %2981 = vmatpush3.bf16.msra.mxu0 %v3440_v33  ;;  %2854 = vmatprep.subr.bf16.mxu1 %v3441_v38 }
 0x124   : > { %2982 = vmatprep.subr.bf16.mxu0 %v3442_v40  ;;  %v4374_v45 = vsel %vm1625_vm1, %v1638_v28, %v1639_v31 }
 0x125   : > { %2839 = vmatmul.mubr.bf16.gmra.mrb[4].mxu1 %v4217_v39 }
 0x126   : > { %2967 = vmatmul.mubr.bf16.gmra.mrb[4].mxu0 %v4292_v50  ;;  %2855 = vmatpush3.bf16.msra.mxu1 %v3441_v38  ;;  %v944_v38 = vshll.u32 %v4317_v21, 16 }
 0x127   : > { %2983 = vmatpush3.bf16.msra.mxu0 %v3442_v40  ;;  %2856 = vmatprep.subr.bf16.mxu1 %v3443_v15  ;;  %v1644_v40 = vrot.slane %v4254_v9, 1 }
 0x128   : > { %2984 = vmatprep.subr.bf16.mxu0 %v3444_v42  ;;  %2842 = vmatprep.mubr.bf16.mxu1 %v4227_v46  ;;  %v946_v49 = vrot.slane %v944_v38, 1 }
 0x129   : > { %2970 = vmatprep.mubr.bf16.mxu0 %v4302_v0 }
 0x12a   : > { %2857 = vmatpush3.bf16.msra.mxu1 %v3443_v15  ;;  %v1645_v15 = vrot.slane %v4265_v23, 1  ;;  %v3465_v23 = vld [vmem:[#allocation8 + $0x70] sm:$0xff]  }
 0x12b   : > { %2985 = vmatpush3.bf16.msra.mxu0 %v3444_v42  ;;  %2858 = vmatprep.subr.bf16.mxu1 %v3445_v48  ;;  %v4384_v42 = vsel %vm1625_vm1, %v1641_v53, %v1642_v35 }
 0x12c   : > { %2986 = vmatprep.subr.bf16.mxu0 %v3446_v51 }
 0x12d   : > { %2843 = vmatmul.mubr.bf16.gmra.mrb[8].mxu1 %v4245_v3 }
 0x12e   : > { %2971 = vmatmul.mubr.bf16.gmra.mrb[8].mxu0 %v4308_v6  ;;  %2859 = vmatpush3.bf16.msra.mxu1 %v3445_v48  ;;  %v942_v48 = vshrl.u32 %v4317_v21, 16  ;;  %v3466_v21 = vld [vmem:[#allocation8 + $0x170] sm:$0xff]  }
 0x12f   : > { %2987 = vmatpush3.bf16.msra.mxu0 %v3446_v51  ;;  %2860 = vmatprep.subr.bf16.mxu1 %v3447_v52  ;;  %v949_v51 = vshll.u32 %v4345_v60, 16  ;;  %v3468_v60 = vld [vmem:[#allocation8 + $0x178] sm:$0xff]  }
 0x130   : > { %2988 = vmatprep.subr.bf16.mxu0 %v3448_v59  ;;  %2846 = vmatprep.mubr.bf16.mxu1 %v4254_v9  ;;  %v947_v55 = vor.u32 %v946_v49, %v942_v48 }
 0x131   : > { %2974 = vmatprep.mubr.bf16.mxu0 %v4315_v17  ;;  %v1632_v17 = vrot.slane %v4203_v19, 1  ;;  %v951_v56 = vrot.slane %v949_v51, 1 }
 0x132   : > { %2861 = vmatpush3.bf16.msra.mxu1 %v3447_v52  ;;  %v1647_v52 = vrot.slane %v4276_v30, 1 }
 0x133   : > { %2989 = vmatpush3.bf16.msra.mxu0 %v3448_v59  ;;  %2862 = vmatprep.subr.bf16.mxu1 %v3449_v61  ;;  %v4360_v24 = vsel %vm1625_vm1, %v1632_v17, %v1633_v18  ;;  %v3467_v59 = vld [vmem:[#allocation8 + $0x78] sm:$0xff]  }
 0x134   : > { %2990 = vmatprep.subr.bf16.mxu0 %v3450_v1  ;;  %v4398_v58 = vsel %vm1625_vm1, %v1647_v52, %v1648_v54 }
 0x135   : > { %2847 = vmatmul.mubr.bf16.gmra.mrb[12].mxu1 %v4276_v30 }
 0x136   : > { %2975 = vmatmul.mubr.bf16.gmra.mrb[12].mxu0 %v1060_v8  ;;  %2863 = vmatpush3.bf16.msra.mxu1 %v3449_v61  ;;  %v3470_v61 = vld [vmem:[#allocation8 + $0x208] sm:$0xff]  }
 0x137   : > { %2991 = vmatpush3.bf16.msra.mxu0 %v3450_v1  ;;  %2864 = vmatprep.subr.bf16.mxu1 %v3451_v10 }
 0x138   : > { %2992 = vmatprep.subr.bf16.mxu0 %v3452_v11  ;;  %2866 = vmatprep.mubr.bf16.mxu1 %v4203_v19  ;;  %v1635_v19 = vrot.slane %v4217_v39, 1 }
 0x139   : > { %2994 = vmatprep.mubr.bf16.mxu0 %v1628_v12 }
 0x13a   : > { %2865 = vmatpush3.bf16.msra.mxu1 %v3451_v10  ;;  %v4369_v33 = vsel %vm1625_vm1, %v1635_v19, %v1636_v27 }
 0x13b   : > { %2993 = vmatpush3.bf16.msra.mxu0 %v3452_v11  ;;  %2882 = vmatprep.subr.bf16.mxu1 %v3453_v13 }
 0x13c   : > { %3010 = vmatprep.subr.bf16.mxu0 %v3454_v14 }
 0x13d   : > { %2867 = vmatmul.mubr.bf16.vlgmr.msra.gmra.mrb[0].mxu1 %v4217_v39  ;;  %v3460_v39 = vld [vmem:[#allocation8 + $0x158] sm:$0xff]  }
 0x13e   : > { %2995 = vmatmul.mubr.bf16.vlgmr.msra.gmra.mrb[0].mxu0 %v4230_v47  ;;  %2883 = vmatpush3.bf16.msra.mxu1 %v3453_v13 }
 0x13f   : > { %3011 = vmatpush3.bf16.msra.mxu0 %v3454_v14  ;;  %2884 = vmatprep.subr.bf16.mxu1 %v3455_v20 }
 0x140   : > { %3012 = vmatprep.subr.bf16.mxu0 %v3456_v22  ;;  %2870 = vmatprep.mubr.bf16.mxu1 %v4227_v46  ;;  %v3461_v46 = vld [vmem:[#allocation8 + $0x60] sm:$0xff]  }
 0x141   : > { %2998 = vmatprep.mubr.bf16.mxu0 %v4360_v24 }
 0x142   : > { %2885 = vmatpush3.bf16.msra.mxu1 %v3455_v20 }
 0x143   : > { %3013 = vmatpush3.bf16.msra.mxu0 %v3456_v22  ;;  %2886 = vmatprep.subr.bf16.mxu1 %v3457_v25 }
 0x144   : > { %3014 = vmatprep.subr.bf16.mxu0 %v3458_v26 }
 0x145   : > { %2871 = vmatmul.mubr.bf16.gmra.mrb[4].mxu1 %v4245_v3  ;;  %v3463_v3 = vld [vmem:[#allocation8 + $0x68] sm:$0xff]  }
 0x146   : > { %2999 = vmatmul.mubr.bf16.gmra.mrb[4].mxu0 %v4369_v33  ;;  %2887 = vmatpush3.bf16.msra.mxu1 %v3457_v25 }
 0x147   : > { %3015 = vmatpush3.bf16.msra.mxu0 %v3458_v26  ;;  %2888 = vmatprep.subr.bf16.mxu1 %v3459_v34 }
 0x148   : > { %3016 = vmatprep.subr.bf16.mxu0 %v3460_v39  ;;  %2874 = vmatprep.mubr.bf16.mxu1 %v4254_v9  ;;  %v4391_v9 = vsel %vm1625_vm1, %v1644_v40, %v1645_v15 }
 0x149   : > { %3002 = vmatprep.mubr.bf16.mxu0 %v4374_v45 }
 0x14a   : > { %2889 = vmatpush3.bf16.msra.mxu1 %v3459_v34 }
 0x14b   : > { %3017 = vmatpush3.bf16.msra.mxu0 %v3460_v39  ;;  %2890 = vmatprep.subr.bf16.mxu1 %v3461_v46 }
 0x14c   : > { %3018 = vmatprep.subr.bf16.mxu0 %v3462_v36 }
 0x14d   : > { %2875 = vmatmul.mubr.bf16.gmra.mrb[8].mxu1 %v4276_v30  ;;  %v952_v30 = vsel %vm940_vm0, %v947_v55, %v951_v56 }
 0x14e   : > { %3003 = vmatmul.mubr.bf16.gmra.mrb[8].mxu0 %v4384_v42  ;;  %2891 = vmatpush3.bf16.msra.mxu1 %v3461_v46 }
 0x14f   : > { %3019 = vmatpush3.bf16.msra.mxu0 %v3462_v36  ;;  %2892 = vmatprep.subr.bf16.mxu1 %v3463_v3 }
 0x150   : > { %3020 = vmatprep.subr.bf16.mxu0 %v3464_v4  ;;  %2878 = vmatprep.mubr.bf16.mxu1 %v4285_v43 }
 0x151   : > { %3006 = vmatprep.mubr.bf16.mxu0 %v4391_v9 }
 0x152   : > { %2893 = vmatpush3.bf16.msra.mxu1 %v3463_v3  ;;  %v4431_v3 = vld [vmem:[#allocation10] ss:$0 sm:$0xff] }
 0x153   : > { %3021 = vmatpush3.bf16.msra.mxu0 %v3464_v4  ;;  %2894 = vmatprep.subr.bf16.mxu1 %v3465_v23 }
 0x154   : > { %3022 = vmatprep.subr.bf16.mxu0 %v3466_v21 }
 0x155   : > { %2879 = vmatmul.mubr.bf16.gmra.mrb[12].mxu1 %v4326_v32  ;;  %v3471_v32 = vld [vmem:[#allocation8 + $0x210] sm:$0xff]  }
 0x156   : > { %3007 = vmatmul.mubr.bf16.gmra.mrb[12].mxu0 %v4398_v58  ;;  %2895 = vmatpush3.bf16.msra.mxu1 %v3465_v23 }
 0x157   : > { %3023 = vmatpush3.bf16.msra.mxu0 %v3466_v21  ;;  %2896 = vmatprep.subr.bf16.mxu1 %v3467_v59 }
 0x158   : > { %3024 = vmatprep.subr.bf16.mxu0 %v3468_v60  ;;  %2898 = vmatprep.mubr.bf16.mxu1 %v952_v30 }
 0x159   : > { %3026 = vmatprep.mubr.bf16.mxu0 %v4230_v47  ;;  %v3472_v47 = vld [vmem:[#allocation8 + $0x218] sm:$0xff]  }
 0x15a   : > { %2897 = vmatpush3.bf16.msra.mxu1 %v3467_v59 }
 0x15b   : > { %3025 = vmatpush3.bf16.msra.mxu0 %v3468_v60  ;;  %3074 = vmatprep.subr.bf16.mxu1 %v3469_v37 }
 0x15c   : > { %3042 = vmatprep.subr.bf16.mxu0 %v3469_v37 }
 0x15d   : > { %2899 = vmatmul.mubr.bf16.vlgmr.msra.gmra.mrb[0].mxu1 %v4223_v44  ;;  %v3473_v44 = vld [vmem:[#allocation8 + $0x220] sm:$0xff]  }
 0x15e   : > { %3027 = vmatmul.mubr.bf16.vlgmr.msra.gmra.mrb[0].mxu0 %v4360_v24  ;;  %3082 = vmatpush3.bf16.msra.mxu1 %v3469_v37 }
 0x15f   : > { %3043 = vmatpush3.bf16.msra.mxu0 %v3469_v37  ;;  %3075 = vmatprep.subr.bf16.mxu1 %v3470_v61 }
 0x160   : > { %3044 = vmatprep.subr.bf16.mxu0 %v3470_v61  ;;  %2902 = vmatprep.mubr.bf16.mxu1 %v4252_v7  ;;  %v3474_v7 = vld [vmem:[#allocation8 + $0x228] sm:$0xff]  }
 0x161   : > { %3030 = vmatprep.mubr.bf16.mxu0 %v4369_v33 }
 0x162   : > { %3083 = vmatpush3.bf16.msra.mxu1 %v3470_v61 }
 0x163   : > { %3045 = vmatpush3.bf16.msra.mxu0 %v3470_v61  ;;  %3076 = vmatprep.subr.bf16.mxu1 %v3471_v32 }
 0x164   : > { %3046 = vmatprep.subr.bf16.mxu0 %v3471_v32 }
 0x165   : > { %2903 = vmatmul.mubr.bf16.gmra.mrb[4].mxu1 %v4261_v16  ;;  %v1650_v16 = vrot.slane %v4285_v43, 1 }
 0x166   : > { %3031 = vmatmul.mubr.bf16.gmra.mrb[4].mxu0 %v4374_v45  ;;  %3084 = vmatpush3.bf16.msra.mxu1 %v3471_v32 }
 0x167   : > { %3047 = vmatpush3.bf16.msra.mxu0 %v3471_v32  ;;  %3077 = vmatprep.subr.bf16.mxu1 %v3472_v47 }
 0x168   : > { %3048 = vmatprep.subr.bf16.mxu0 %v3472_v47  ;;  %2906 = vmatprep.mubr.bf16.mxu1 %v4274_v29  ;;  %v1652_v29 = vsel %vm1625_vm1, %v1650_v16, %v1651_v62 }
 0x169   : > { %3034 = vmatprep.mubr.bf16.mxu0 %v4384_v42 }
 0x16a   : > { %3085 = vmatpush3.bf16.msra.mxu1 %v3472_v47 }
 0x16b   : > { %3049 = vmatpush3.bf16.msra.mxu0 %v3472_v47  ;;  %3078 = vmatprep.subr.bf16.mxu1 %v3473_v44 }
 0x16c   : > { %3050 = vmatprep.subr.bf16.mxu0 %v3473_v44 }
 0x16d   : > { %2907 = vmatmul.mubr.bf16.gmra.mrb[8].mxu1 %v4292_v50  ;;  %v3476_v50 = vld [vmem:[#allocation8 + $0x238] sm:$0xff]  }
 0x16e   : > { %3035 = vmatmul.mubr.bf16.gmra.mrb[8].mxu0 %v4391_v9  ;;  %3086 = vmatpush3.bf16.msra.mxu1 %v3473_v44 }
 0x16f   : > { %3051 = vmatpush3.bf16.msra.mxu0 %v3473_v44  ;;  %3079 = vmatprep.subr.bf16.mxu1 %v3474_v7 }
 0x170   : > { %3052 = vmatprep.subr.bf16.mxu0 %v3474_v7  ;;  %2910 = vmatprep.mubr.bf16.mxu1 %v4302_v0 }
 0x171   : > { %3038 = vmatprep.mubr.bf16.mxu0 %v4398_v58 }
 0x172   : > { %3087 = vmatpush3.bf16.msra.mxu1 %v3474_v7 }
 0x173   : > { %3053 = vmatpush3.bf16.msra.mxu0 %v3474_v7  ;;  %3080 = vmatprep.subr.bf16.mxu1 %v3475_v63 }
 0x174   : > { %3054 = vmatprep.subr.bf16.mxu0 %v3475_v63 }
 0x175   : > { %2911 = vmatmul.mubr.bf16.gmra.mrb[12].mxu1 %v4308_v6 }
 0x176   : > { %3039 = vmatmul.mubr.bf16.gmra.mrb[12].mxu0 %v1652_v29  ;;  %3088 = vmatpush3.bf16.msra.mxu1 %v3475_v63 }
 0x177   : > { %3055 = vmatpush3.bf16.msra.mxu0 %v3475_v63  ;;  %3081 = vmatprep.subr.bf16.mxu1 %v3476_v50 }
 0x178   : > { %3056 = vmatprep.subr.bf16.mxu0 %v3476_v50  ;;  %3058 = vmatprep.mubr.bf16.mxu0 %v4360_v24 }
 0x179   : > { %3066 = vmatprep.mubr.bf16.mxu1 %v4391_v9 }
 0x17a   : > { %3089 = vmatpush3.bf16.msra.mxu1 %v3476_v50 }
 0x17b   : > { %3057 = vmatpush3.bf16.msra.mxu0 %v3476_v50 }
 0x17d   : > { %3067 = vmatmul.mubr.bf16.vlgmr.msra.gmra.mrb[16].mxu1 %v4398_v58 }
 0x17e   : > { %3059 = vmatmul.mubr.bf16.vlgmr.msra.gmra.mrb[0].mxu0 %v4369_v33  ;;  %3070 = vmatprep.mubr.bf16.mxu1 %v1652_v29 }
 0x17f   : > { %3062 = vmatprep.mubr.bf16.mxu0 %v4374_v45 }
 0x185   : > { %3071 = vmatmul.mubr.bf16.gmra.mrb[20].mxu1 %v4333_v41 }
 0x186   : > { %3063 = vmatmul.mubr.bf16.gmra.mrb[4].mxu0 %v4384_v42 }
 0x230   : > { %v2900_v43 = vpop.f32.mrb[0].mxu1 }
 0x231   : > { %v1170_v57 = vpop.f32.mrb[1].mxu1 }
 0x232   : > { %v2901_v0 = vpop.f32.mrb[2].mxu1 }
 0x233   : > { %v1173_v6 = vpop.f32.mrb[3].mxu1 }
 0x238   : > { %v2904_v1 = vpop.f32.mrb[4].mxu1 }
 0x239   : > { %v1186_v2 = vpop.f32.mrb[5].mxu1 }
 0x23a   : > { %v4427_v5 = vpop.f32.mrb[6].mxu1 }
 0x23b   : > { %v4429_v8 = vpop.f32.mrb[7].mxu1 }
 0x240   : > { %v2908_v10 = vpop.f32.mrb[8].mxu1 }
 0x241   : > { %v3036_v11 = vpop.f32.mrb[8].mxu0  ;;  %v1202_v12 = vpop.f32.mrb[9].mxu1 }
 0x242   : > { %v3098_v13 = vadd.f32 %v3036_v11, %v2908_v10  ;;  %v1975_v14 = vpop.f32.mrb[9].mxu0  ;;  %v2909_v17 = vpop.f32.mrb[10].mxu1 }
 0x243   : > { %v3100_v18 = vadd.f32 %v1975_v14, %v1202_v12  ;;  %v3037_v41 = vpop.f32.mrb[10].mxu0  ;;  %v1205_v20 = vpop.f32.mrb[11].mxu1 }
 0x244   : > { %v3102_v22 = vadd.f32 %v3037_v41, %v2909_v17  ;;  %v1978_v24 = vpop.f32.mrb[11].mxu0 }
 0x245   : > { %v3104_v25 = vadd.f32 %v1978_v24, %v1205_v20 }
 0x248   : > { %v2912_v19 = vpop.f32.mrb[12].mxu1 }
 0x249   : > { %v3040_v27 = vpop.f32.mrb[12].mxu0  ;;  %v1218_v26 = vpop.f32.mrb[13].mxu1 }
 0x24a   : > { %v3106_v28 = vadd.f32 %v3040_v27, %v2912_v19  ;;  %v1991_v31 = vpop.f32.mrb[13].mxu0  ;;  %v2913_v33 = vpop.f32.mrb[14].mxu1 }
 0x24b   : > { %v3108_v34 = vadd.f32 %v1991_v31, %v1218_v26  ;;  %v3041_v39 = vpop.f32.mrb[14].mxu0  ;;  %v1221_v45 = vpop.f32.mrb[15].mxu1 }
 0x24c   : > { %v3110_v46 = vadd.f32 %v3041_v39, %v2913_v33  ;;  %v1994_v53 = vpop.f32.mrb[15].mxu0 }
 0x24d   : > { %v3112_v35 = vadd.f32 %v1994_v53, %v1221_v45 }
 0x250   : > { %v3068_v36 = vpop.f32.mrb[16].mxu1 }
 0x251   : > { %v3060_v38 = vpop.f32.mrb[0].mxu0  ;;  %v3099_v40 = vadd.f32 %v3098_v13, %v3068_v36  ;;  %v2153_v15 = vpop.f32.mrb[17].mxu1 }
 0x252   : > { %v3090_v42 = vadd.f32 %v3060_v38, %v2900_v43  ;;  %v2121_v4 = vpop.f32.mrb[1].mxu0  ;;  %v3101_v48 = vadd.f32 %v3100_v18, %v2153_v15  ;;  %v3069_v49 = vpop.f32.mrb[18].mxu1 }
 0x253   : > { %v3091_v51 = vadd.f32 %v2121_v4, %v1170_v57  ;;  %v3061_v9 = vpop.f32.mrb[2].mxu0  ;;  %v3103_v23 = vadd.f32 %v3102_v22, %v3069_v49  ;;  %v2156_v52 = vpop.f32.mrb[19].mxu1  ;;  %v4490_v36 = vadd.f32 %v3099_v40, %v4431_v3 }
 0x254   : > { %v3092_v54 = vadd.f32 %v3061_v9, %v2901_v0  ;;  %v2124_v21 = vpop.f32.mrb[3].mxu0  ;;  %v3105_v55 = vadd.f32 %v3104_v25, %v2156_v52  ;;  %v4437_v59 = vadd.f32 %v3090_v42, %v4431_v3  ;;  %v4478_v33 = vadd.f32 %v3101_v48, %v4431_v3 }
 0x255   : > { %v4434_v56 = vadd.f32 %v3091_v51, %v4431_v3  ;;  %v3093_v58 = vadd.f32 %v2124_v21, %v1173_v6  ;;  %v2218_v4 = vadd.f32 %v3103_v23, %v4431_v3  ;;  %v2254_v9 = vmul.f32 %v4490_v36, %v4490_v36 }
 0x256   : > { %v4443_v30 = vadd.f32 %v3092_v54, %v4431_v3  ;;  %v2246_v43 = vmul.f32 %v4437_v59, %v4437_v59  ;;  %v4484_v45 = vadd.f32 %v3105_v55, %v4431_v3  ;;  %v2252_v38 = vmul.f32 %v4478_v33, %v4478_v33 }
 0x257   : > { %v4440_v60 = vadd.f32 %v3093_v58, %v4431_v3  ;;  %v2244_v61 = vmul.f32 %v4434_v56, %v4434_v56  ;;  %v2255_v21 = vmul.f32 %v2218_v4, %v2218_v4 }
 0x258   : > { %v3072_v37 = vpop.f32.mrb[20].mxu1  ;;  %v2247_v17 = vmul.f32 %v4443_v30, %v4443_v30  ;;  %v2253_v48 = vmul.f32 %v4484_v45, %v4484_v45 }
 0x259   : > { %v2223_v32 = vadd.f32 %v4440_v60, %v4434_v56  ;;  %v2245_v47 = vmul.f32 %v4440_v60, %v4440_v60  ;;  %v3064_v44 = vpop.f32.mrb[4].mxu0  ;;  %v3107_v7 = vadd.f32 %v3106_v28, %v3072_v37  ;;  %v2169_v16 = vpop.f32.mrb[21].mxu1 }
 0x25a   : > { %v3094_v62 = vadd.f32 %v3064_v44, %v2904_v1  ;;  %v2137_v63 = vpop.f32.mrb[5].mxu0  ;;  %v3109_v29 = vadd.f32 %v3108_v34, %v2169_v16  ;;  %v3073_v50 = vpop.f32.mrb[22].mxu1 }
 0x25b   : > { %v2224_v57 = vadd.f32 %v2223_v32, %v4437_v59  ;;  %v2260_v0 = vadd.f32 %v2245_v47, %v2244_v61  ;;  %v3095_v6 = vadd.f32 %v2137_v63, %v1186_v2  ;;  %v3065_v10 = vpop.f32.mrb[6].mxu0  ;;  %v2172_v11 = vpop.f32.mrb[23].mxu1  ;;  %v3111_v13 = vadd.f32 %v3110_v46, %v3073_v50 }
 0x25c   : > { %v3096_v12 = vadd.f32 %v3065_v10, %v4427_v5  ;;  %v2140_v14 = vpop.f32.mrb[7].mxu0  ;;  %v3113_v5 = vadd.f32 %v3112_v35, %v2172_v11  ;;  %v4466_v25 = vadd.f32 %v3094_v62, %v4431_v3  ;;  %v2219_v40 = vadd.f32 %v3109_v29, %v4431_v3 }
 0x25d   : > { %v2261_v1 = vadd.f32 %v2260_v0, %v2246_v43  ;;  %v4458_v18 = vadd.f32 %v3095_v6, %v4431_v3  ;;  %v2225_v41 = vadd.f32 %v2224_v57, %v4443_v30  ;;  %v3097_v24 = vadd.f32 %v2140_v14, %v4429_v8 }
 0x25e   : > { %v4472_v26 = vadd.f32 %v3096_v12, %v4431_v3  ;;  %v2250_v8 = vmul.f32 %v4466_v25, %v4466_v25  ;;  %v2220_v55 = vadd.f32 %v3113_v5, %v4431_v3  ;;  %v2221_v23 = vadd.f32 %v3107_v7, %v4431_v3 }
 0x25f   : > { %v2226_v20 = vadd.f32 %v2225_v41, %v4458_v18  ;;  %v2248_v2 = vmul.f32 %v4458_v18, %v4458_v18  ;;  %v2262_v22 = vadd.f32 %v2261_v1, %v2247_v17  ;;  %v4469_v27 = vadd.f32 %v3097_v24, %v4431_v3 }
 0x260   : > { %v2251_v46 = vmul.f32 %v4472_v26, %v4472_v26  ;;  %v2256_v61 = vmul.f32 %v2219_v40, %v2219_v40  ;;  %v2222_v44 = vadd.f32 %v3111_v13, %v4431_v3  ;;  %v2257_v62 = vmul.f32 %v2220_v55, %v2220_v55 }
 0x261   : > { %v2263_v19 = vadd.f32 %v2262_v22, %v2248_v2  ;;  %v2227_v28 = vadd.f32 %v2226_v20, %v4469_v27  ;;  %v2249_v31 = vmul.f32 %v4469_v27, %v4469_v27  ;;  %v2258_v50 = vmul.f32 %v2221_v23, %v2221_v23 }
 0x262   : > { %v2259_v57 = vmul.f32 %v2222_v44, %v2222_v44  ;;  %v3844_v24 = vmov (!%p2631_p4), 0.0  }
 0x263   : > { %v2228_v34 = vadd.f32 %v2227_v28, %v4466_v25  ;;  %v2264_v39 = vadd.f32 %v2263_v19, %v2249_v31  ;;  %2285 = vst [vmem:[%s4511_s6] sm:$0x1] (!%p2631_p4), %v3844_v24  ;;  %2286 = vst [vmem:[%s4515_s2] sm:$0x1] (!%p2631_p4), %v3844_v24 }
 0x265   : > { %v2229_v53 = vadd.f32 %v2228_v34, %v4472_v26  ;;  %v2265_v35 = vadd.f32 %v2264_v39, %v2250_v8 }
 0x267   : > { %v2230_v15 = vadd.f32 %v2229_v53, %v4478_v33  ;;  %v2266_v42 = vadd.f32 %v2265_v35, %v2251_v46 }
 0x269   : > { %v2267_v49 = vadd.f32 %v2266_v42, %v2252_v38  ;;  %v2231_v51 = vadd.f32 %v2230_v15, %v4484_v45 }
 0x26b   : > { %v2232_v52 = vadd.f32 %v2231_v51, %v4490_v36  ;;  %v2268_v54 = vadd.f32 %v2267_v49, %v2253_v48 }
 0x26d   : > { %v2233_v58 = vadd.f32 %v2232_v52, %v2218_v4  ;;  %v2269_v37 = vadd.f32 %v2268_v54, %v2254_v9 }
 0x26f   : > { %v2234_v32 = vadd.f32 %v2233_v58, %v2219_v40  ;;  %v2270_v47 = vadd.f32 %v2269_v37, %v2255_v21 }
 0x271   : > { %v2235_v16 = vadd.f32 %v2234_v32, %v2220_v55  ;;  %v2271_v63 = vadd.f32 %v2270_v47, %v2256_v61 }
 0x273   : > { %v2236_v29 = vadd.f32 %v2235_v16, %v2221_v23  ;;  %v2272_v43 = vadd.f32 %v2271_v63, %v2257_v62 }
 0x275   : > { %v2237_v0 = vadd.f32 %v2236_v29, %v2222_v44  ;;  %v2273_v6 = vadd.f32 %v2272_v43, %v2258_v50 }
 0x277   : > { %v2238_v10 = vrot.slane %v2237_v0, 4  ;;  %v2274_v11 = vadd.f32 %v2273_v6, %v2259_v57 }
 0x279   : > { %v2239_v7 = vadd.f32 %v2238_v10, %v2237_v0  ;;  %v2275_v12 = vrot.slane %v2274_v11, 4 }
 0x27b   : > { %v2240_v14 = vrot.slane %v2239_v7, 2  ;;  %v2276_v17 = vadd.f32 %v2275_v12, %v2274_v11 }
 0x27d   : > { %v2241_v1 = vadd.f32 %v2240_v14, %v2239_v7  ;;  %v2277_v3 = vrot.slane %v2276_v17, 2  ;;  %2284 = sbr.rel (%p2631_p4) target bundleno = 644 (0x284), region = 64 }
 0x27f   : > { %v2242_v13 = vrot.slane %v2241_v1, 1  ;;  %v2278_v41 = vadd.f32 %v2277_v3, %v2276_v17 }
 0x281   : > { %v2243_v20 = vadd.f32 %v2242_v13, %v2241_v1  ;;  %v2279_v2 = vrot.slane %v2278_v41, 1 }
 0x283   : > { %v2280_v22 = vadd.f32 %v2279_v2, %v2278_v41 }
 0x284 PF: > { %v2287_v5 = vld [vmem:[%s4511_s6] sm:$0x1]  ;;  %2293 = vst [vmem:[%s4507_s11] sm:$0xff] %v4434_v56  ;;  %2294 = vst [vmem:[%s4507_s11 + $0x8] sm:$0xff] %v4440_v60  ;;  %s4778_s23 = sld [smem:[#allocation24_spill]]  ;;  %s4779_s18 = sld [smem:[#allocation29_spill]] }
 0x285   : > { %v2290_v19 = vld [vmem:[%s4515_s2] sm:$0x1]  ;;  %2295 = vst [vmem:[%s4507_s11 + $0x10] sm:$0xff] %v4437_v59  ;;  %2296 = vst [vmem:[%s4507_s11 + $0x18] sm:$0xff] %v4443_v30  ;;  %s2314_s1 = sand.u32 1, %s3957_s15   ;;  %v2288_v56 = vadd.f32 %v2287_v5, %v2243_v20  ;;  %s4780_s21 = sld [smem:[#allocation40_spill]] }
 0x286   : > { %2297 = vst [vmem:[%s4507_s11 + $0x20] sm:$0xff] %v4458_v18  ;;  %2298 = vst [vmem:[%s4507_s11 + $0x28] sm:$0xff] %v4469_v27  ;;  %v2291_v59 = vadd.f32 %v2290_v19, %v2280_v22  ;;  %s2350_s4 = sshll.u32 %s4511_s6, 4  ;;  %s4781_s17 = sld [smem:[#allocation41_spill]]  ;;  %s2351_s4 = int_to_ptr.vmem [resolvable:$true] %s2350_s4 }
 0x287   : > { %2299 = vst [vmem:[%s4507_s11 + $0x30] sm:$0xff] %v4466_v25  ;;  %2300 = vst [vmem:[%s4507_s11 + $0x38] sm:$0xff] %v4472_v26  ;;  %s4564_s25 = scalar_lea.sflag [#allocation13], %s2314_s1  ;;  %s3619_s15 = scalar_lea.vmem %s2351_s4, 16 }
 0x288   : > { %2301 = vst [vmem:[%s4507_s11 + $0x40] sm:$0xff] %v4478_v33  ;;  %2302 = vst [vmem:[%s4507_s11 + $0x48] sm:$0xff] %v4484_v45  ;;  %p3620_p10 = scmp.ne.s32.totalorder %s2351_s4, %s3619_s15  ;;  %s3845_s0 = smov [#allocation12]  }
 0x289   : > { %2303 = vst [vmem:[%s4507_s11 + $0x50] sm:$0xff] %v4490_v36  ;;  %2304 = vst [vmem:[%s4507_s11 + $0x58] sm:$0xff] %v2218_v4  ;;  %s3623_s3 = sshll.u32 %s3845_s0, 4  ;;  %s3624_s3 = int_to_ptr.vmem [resolvable:$false] %s3623_s3 }
 0x28a   : > { %2305 = vst [vmem:[%s4507_s11 + $0x60] sm:$0xff] %v2219_v40  ;;  %2306 = vst [vmem:[%s4507_s11 + $0x68] sm:$0xff] %v2220_v55  ;;  %s2637_s28 = sshll.u32 %s4778_s23, 4  ;;  %p4782_p12 = scmp.ne.s32.totalorder %s4779_s18, 0 }
 0x28b   : > { %2307 = vst [vmem:[%s4507_s11 + $0x70] sm:$0xff] %v2221_v23  ;;  %2308 = vst [vmem:[%s4507_s11 + $0x78] sm:$0xff] %v2222_v44  ;;  %s4554_s5 = scalar_lea.hbm %s4780_s21, %s2637_s28  ;;  %s3625_s20 = scalar_lea.vmem %s3624_s3, 32 }
 0x28c   : > { %s4560_s10 = scalar_lea.hbm %s4781_s17, %s2637_s28  ;;  %2289 = vst [vmem:[%s4511_s6] sm:$0x1] %v2288_v56  ;;  %2292 = vst [vmem:[%s4515_s2] sm:$0x1] %v2291_v59  ;;  %p3621_p2 = pnand %p3620_p10, %p4782_p12 }
 0x28d   : > { %p3626_p0 = scmp.lt.s32.totalorder %s2351_s4, %s3624_s3  ;;  %p3627_p8 = scmp.lt.s32.totalorder %s3625_s20, %s3619_s15 }
 0x28e   : > { %p3622_p9 = pneg %p3621_p2 }
 0x28f   : > { %p3628_p1 = por %p3627_p8, %p3626_p0 }
 0x291   : > { %p3629_p11 = pnand %p3628_p1, %p3622_p9 }
 0x293   : > { %3632 = shalt.err (!%p3629_p11)
}
 0x294   : > { %s3633_s6 = scalar_lea.hbm %s4554_s5, 16  ;;  %s3637_s0 = scalar_lea.hbm %s4780_s21, 32 }
 0x295   : > { %p3634_p5 = scmp.ne.s32.totalorder %s4554_s5, %s3633_s6  ;;  %p3638_p6 = scmp.lt.u32.totalorder %s4554_s5, %s4780_s21 }
 0x296   : > { %p3639_p3 = scmp.lt.u32.totalorder %s3637_s0, %s3633_s6  ;;  %p3641_p10 = scmp.lt.u32.totalorder %s3633_s6, %s4554_s5 }
 0x297   : > { %p3635_p13 = pnand %p3634_p5, %p4782_p12 }
 0x298   : > { %p3640_p4 = por %p3639_p3, %p3638_p6 }
 0x299   : > { %p3636_p7 = pneg %p3635_p13 }
 0x29a   : > { %p3642_p2 = por %p3641_p10, %p3640_p4 }
 0x29c   : > { %p3643_p9 = pnand %p3642_p2, %p3636_p7 }
 0x29e   : > { %3646 = shalt.err (!%p3643_p9)
}
 0x29f   : > { %s4783_s15 = sld [smem:[#allocation23_spill]]  ;;  %s4784_s3 = sld [smem:[#allocation22_spill]] }
 0x2a0   : > { %s4785_s20 = sld [smem:[#allocation27_spill]]  ;;  %s2635_s28 = sshll.u32 %s4778_s23, 5 }
 0x2a1   : > { %3240 = dma.vmem_to_hbm [thread:$0]  (%p4782_p12), %s2351_s4, 16, %s4554_s5, %s4564_s25  }
 0x2a2   : > { %s2334_s0 = sshll.u32 %s4507_s11, 4  ;;  %s4786_s19 = sld [smem:[#allocation39_spill]]  ;;  %s4587_s0 = int_to_ptr.vmem [resolvable:$true] %s2334_s0 }
 0x2a3   : > { %s2363_s13 = sshll.u32 %s4515_s2, 4  ;;  %s3647_s5 = scalar_lea.vmem %s4587_s0, 2048  ;;  %s2364_s13 = int_to_ptr.vmem [resolvable:$true] %s2363_s13 }
 0x2a4   : > { %p3648_p0 = scmp.ne.s32.totalorder %s4587_s0, %s3647_s5  ;;  %s3846_s11 = smov [#allocation11]  }
 0x2a5   : > { %s2641_s1 = sshll.u32 %s4783_s15, 4  ;;  %s4787_s12 = sand.u32 1, %s4784_s3  }
 0x2a6   : > { %s2331_s22 = sadd.s32 %s2641_s1, %s2635_s28  ;;  %s4597_s24 = scalar_lea.sflag [#allocation4], %s4787_s12 }
 0x2a7   : > { %s2636_s7 = sshll.u32 %s2331_s22, 7  ;;  %p4788_p8 = scmp.ne.s32.totalorder %s4785_s20, 0 }
 0x2a8   : > { %s4592_s30 = scalar_lea.hbm %s4786_s19, %s2636_s7  ;;  %s3651_s23 = sshll.u32 %s3846_s11, 4  ;;  %s3652_s23 = int_to_ptr.vmem [resolvable:$false] %s3651_s23 }
 0x2a9   : > { %p3649_p1 = pnand %p3648_p0, %p4788_p8  ;;  %s3653_s4 = scalar_lea.vmem %s3652_s23, 4096 }
 0x2aa   : > { %p3654_p5 = scmp.lt.s32.totalorder %s4587_s0, %s3652_s23  ;;  %p3655_p13 = scmp.lt.s32.totalorder %s3653_s4, %s3647_s5 }
 0x2ab   : > { %p3650_p11 = pneg %p3649_p1 }
 0x2ac   : > { %p3656_p7 = por %p3655_p13, %p3654_p5 }
 0x2ae   : > { %p3657_p6 = pnand %p3656_p7, %p3650_p11 }
 0x2b0   : > { %3660 = shalt.err (!%p3657_p6)
}
 0x2b1   : > { %s3661_s12 = scalar_lea.hbm %s4592_s30, 2048  ;;  %s3665_s3 = scalar_lea.hbm %s4786_s19, 8192 }
 0x2b2   : > { %p3662_p3 = scmp.ne.s32.totalorder %s4592_s30, %s3661_s12  ;;  %p3666_p2 = scmp.lt.u32.totalorder %s4592_s30, %s4786_s19 }
 0x2b3   : > { %p3667_p9 = scmp.lt.u32.totalorder %s3665_s3, %s3661_s12  ;;  %p3669_p1 = scmp.lt.u32.totalorder %s3661_s12, %s4592_s30 }
 0x2b4   : > { %p3663_p4 = pnand %p3662_p3, %p4788_p8 }
 0x2b5   : > { %p3668_p0 = por %p3667_p9, %p3666_p2 }
 0x2b6   : > { %p3664_p10 = pneg %p3663_p4 }
 0x2b7   : > { %p3670_p11 = por %p3669_p1, %p3668_p0 }
 0x2b9   : > { %p3671_p5 = pnand %p3670_p11, %p3664_p10 }
 0x2bb   : > { %3674 = shalt.err (!%p3671_p5)
}
 0x2bc   : > { %s3847_s22 = smov 128   ;;  %s3848_s7 = smov 8  }
 0x2bd   : > { %3239 = dma.vmem_to_hbm [thread:$0]  (%p4788_p8), %s4587_s0, 2048, %s4592_s30, %s4597_s24, %s3847_s22, %s3847_s22, %s3848_s7  }
 0x2be   : > { %s3675_s6 = scalar_lea.vmem %s2364_s13, 16  ;;  %s3849_s5 = smov [#allocation14]  }
 0x2bf   : > { %p3676_p13 = scmp.ne.s32.totalorder %s2364_s13, %s3675_s6  ;;  %s3679_s11 = sshll.u32 %s3849_s5, 4  ;;  %s3680_s11 = int_to_ptr.vmem [resolvable:$false] %s3679_s11 }
 0x2c0   : > { %s3681_s23 = scalar_lea.vmem %s3680_s11, 32  ;;  %p3682_p3 = scmp.lt.s32.totalorder %s2364_s13, %s3680_s11 }
 0x2c1   : > { %p3677_p7 = pnand %p3676_p13, %p4782_p12  ;;  %p3683_p4 = scmp.lt.s32.totalorder %s3681_s23, %s3675_s6 }
 0x2c3   : > { %p3678_p6 = pneg %p3677_p7  ;;  %p3684_p10 = por %p3683_p4, %p3682_p3 }
 0x2c5   : > { %p3685_p2 = pnand %p3684_p10, %p3678_p6 }
 0x2c7   : > { %3688 = shalt.err (!%p3685_p2)
}
 0x2c8   : > { %s3689_s30 = scalar_lea.hbm %s4560_s10, 16  ;;  %s3693_s20 = scalar_lea.hbm %s4781_s17, 32 }
 0x2c9   : > { %p3690_p8 = scmp.ne.s32.totalorder %s4560_s10, %s3689_s30  ;;  %p3694_p1 = scmp.lt.u32.totalorder %s4560_s10, %s4781_s17 }
 0x2ca   : > { %p3695_p11 = scmp.lt.u32.totalorder %s3693_s20, %s3689_s30  ;;  %p3697_p13 = scmp.lt.u32.totalorder %s3689_s30, %s4560_s10 }
 0x2cb   : > { %p3691_p9 = pnand %p3690_p8, %p4782_p12 }
 0x2cc   : > { %p3696_p5 = por %p3695_p11, %p3694_p1 }
 0x2cd   : > { %p3692_p0 = pneg %p3691_p9 }
 0x2ce   : > { %p3698_p7 = por %p3697_p13, %p3696_p5 }
 0x2d0   : > { %p3699_p6 = pnand %p3698_p7, %p3692_p0 }
 0x2d2   : > { %3702 = shalt.err (!%p3699_p6)
}
 0x2d3   : > { %3241 = dma.vmem_to_hbm [thread:$0]  (%p4782_p12), %s2364_s13, 16, %s4560_s10, %s4564_s25  }
 0x2d4 PF: > { %s4789_s12 = sld [smem:[#allocation21_spill]]  ;;  %s4790_s21 = sld [smem:[#allocation28_spill]] }
 0x2d5   : > { %p3281_p3 = scmp.ge.s32.totalorder %s3833_s14, 2 }
 0x2da   : > { %s2375_s15 = sand.u32 1, %s4789_s12   ;;  %p4791_p4 = scmp.ne.s32.totalorder %s4790_s21, 0 }
 0x2db   : > { %s2376_s3 = scalar_lea.sflag [#allocation4], %s2375_s15 }
 0x2dc   : > { %p3263_p10 = pnand %p3281_p3, %p4791_p4 }
 0x2de   : > { %3772 = dma.done.wait (!%p3263_p10), %s2376_s3, 2048  }
 0x2df   : > { %3774 = vsyncadd (!%p3263_p10), %s2376_s3, 4294965248  ;;  %s4792_s1 = sadd.s32 4294967294, %s3833_s14   ;;  %s4793_s28 = sld [smem:[#allocation30_spill]] }
 0x2e0   : > { %s2384_s22 = sand.u32 1, %s4792_s1  }
 0x2e1   : > { %s2385_s18 = scalar_lea.sflag [#allocation13], %s2384_s22 }
 0x2e5   : > { %p4794_p2 = scmp.ne.s32.totalorder %s4793_s28, 0 }
 0x2e7   : > { %p3266_p8 = pnand %p3281_p3, %p4794_p2 }
 0x2e9   : > { %3776 = dma.done.wait (!%p3266_p8), %s2385_s18, 32  }
 0x2ea   : > { %3778 = vsyncadd (!%p3266_p8), %s2385_s18, 4294967264  ;;  %s29_s14 = sadd.s32 1, %s3833_s14   ;;  %s4796_s24 = sld [smem:[#allocation20_spill]] }
 0x2eb   : > { %p4650_p12 = scmp.ge.s32.totalorder %s29_s14, 6   ;;  %s4797_s10 = sld [smem:[#allocation22_spill]] }
 0x2ec   : > { %s4798_s7 = smov %s4122_s27  ;;  %s4799_s6 = sld [smem:[#allocation33_spill]] }
 0x2ed   : > { %s4800_s5 = sld [smem:[#allocation25_spill]]  ;;  %s4801_s11 = sld [smem:[#allocation26_spill]] }
 0x2ee   : > { %s4802_s12 = sld [smem:[#allocation31_spill]]  ;;  %s4803_s23 = sld [smem:[#allocation32_spill]] }
 0x2ef   : > { %s4805_s25 = smov %s3789_s26  ;;  %s4806_s26 = smov %s4128_s16 }
 0x2f0   : > { %s4808_s28 = smov %s3801_s29  ;;  %s4809_s29 = smov %s4798_s7 }
 0x2f1   : > { %s4807_s27 = smov %s4797_s10  ;;  %s4810_s30 = smov %s3809_s8 }
 0x2f2   : > { %s4811_s8 = smov %s3813_s9  ;;  %s4812_s9 = smov %s4799_s6 }
 0x2f3   : > { %s4813_s10 = smov %s4800_s5  ;;  %28 = sbr.rel (!%p4650_p12) target bundleno = 23 (0x17), region = 145 }
 0x2f4   : > { %s4814_s13 = smov %s4803_s23 }
 0x2fa   :  { %2397 = vsyncpa [#allocation3], 1 }
 0x2fb   :  { %2399 = vsyncpa [#allocation3 + $0x1], 1 }
 0x2fc   :  { %2400 = vsyncpa [#allocation6], 1 }
 0x2fd   :  { %2401 = vsyncpa [#allocation9], 1 }
 0x2fe   :  { %2402 = vsyncpa [#allocation4], 1 }
 0x2ff   :  { %2404 = vsyncpa [#allocation4 + $0x1], 1 }
 0x300   :  { %2405 = vsyncpa [#allocation13], 1 }
 0x301   :  { %2407 = vsyncpa [#allocation13 + $0x1], 1 }

// kernel: conv_block_forward.4
= control target key start
LH: loop header
LB: loop body
LE: loop exit
PB: predicated region body
PF: predicated region fallthrough
CT: control target
= control target key end

     0   :  { %s5225_s0 = inlined_call_operand.hbm [shape: f32[4,10,24,128], index: 0, kind: input, shape index: {}]   ;;  %s5226_s1 = inlined_call_operand.hbm [shape: f32[1,128], index: 1, kind: input, shape index: {}]   ;;  %s5227_s2 = inlined_call_operand.hbm [shape: f32[1,128], index: 2, kind: input, shape index: {}]   ;;  %s5228_s3 = inlined_call_operand.hbm [shape: bf16[3,3,128,128], index: 3, kind: input, shape index: {}]   ;;  %s5229_s4 = inlined_call_operand.hbm [shape: f32[1,128], index: 4, kind: input, shape index: {}]   ;;  %s5230_s5 = inlined_call_operand.hbm [shape: f32[2,16,16,128], index: 5, kind: output, shape index: {0}]   ;;  %s5231_s6 = inlined_call_operand.hbm [shape: f32[2,1,128], index: 6, kind: output, shape index: {1}]   ;;  %s5232_s7 = inlined_call_operand.hbm [shape: f32[2,1,128], index: 7, kind: output, shape index: {2}]  }
   0x1   :  { %5261 = sst [smem:[#allocation34_spill]] %s5225_s0 }
   0x2   :  { %5262 = sst [smem:[#allocation35_spill]] %s5226_s1 }
   0x3   :  { %5263 = sst [smem:[#allocation36_spill]] %s5227_s2 }
   0x4   :  { %5264 = sst [smem:[#allocation37_spill]] %s5228_s3 }
   0x5   :  { %5265 = sst [smem:[#allocation38_spill]] %s5229_s4 }
   0x6   :  { %5266 = sst [smem:[#allocation39_spill]] %s5230_s5 }
   0x7   :  { %5267 = sst [smem:[#allocation40_spill]] %s5231_s6 }
   0x8   :  { %5268 = sst [smem:[#allocation41_spill]] %s5232_s7 }
   0x9   :  { %13 = vsyncpa [#allocation3], 0 }
   0xa   :  { %15 = vsyncpa [#allocation3 + $0x1], 0 }
   0xb   :  { %16 = vsyncpa [#allocation6], 0 }
   0xc   :  { %17 = vsyncpa [#allocation9], 0 }
   0xd   :  { %18 = vsyncpa [#allocation4], 0 }
   0xe   :  { %20 = vsyncpa [#allocation4 + $0x1], 0 }
   0xf   :  { %21 = vsyncpa [#allocation13], 0 }
  0x10   :  { %23 = vsyncpa [#allocation13 + $0x1], 0  ;;  %s4133_s24 = smov 0   ;;  %s4135_s25 = smov 0  }
  0x11   :  { %s4137_s26 = smov 0   ;;  %s4139_s27 = smov 0  }
  0x12   :  { %s4141_s28 = smov 0   ;;  %s4143_s29 = smov 0  }
  0x13   :  { %s4145_s30 = smov 0   ;;  %s4147_s8 = smov 0  }
  0x14   :  { %s4149_s9 = smov 0   ;;  %s4151_s10 = smov 0  }
  0x15   :  { %s4153_s11 = smov 0   ;;  %s4155_s12 = smov 0  }
  0x16   :  { %s4157_s13 = smov 0   ;;  %s4159_s14 = smov 0  }
  0x17 LB: > { %5269 = sst [smem:[#allocation20_spill]] %s4027_s25  ;;  %s4200_s15 = sadd.s32 4294967295, %s4075_s14   ;;  %s4075_s14 = sphi %s4159_s14, %s29_s14   ;;  %s4071_s13 = sphi %s4157_s13, %s5353_s13   ;;  %s4067_s12 = sphi %s4155_s12, %s5341_s12   ;;  %s4063_s11 = sphi %s4153_s11, %s5352_s11   ;;  %s4059_s10 = sphi %s4151_s10, %s5339_s10   ;;  %s4055_s9 = sphi %s4149_s9, %s5351_s9   ;;  %s4051_s8 = sphi %s4147_s8, %s5350_s8   ;;  %s4047_s30 = sphi %s4145_s30, %s5349_s30   ;;  %s4043_s29 = sphi %s4143_s29, %s5348_s29   ;;  %s4039_s28 = sphi %s4141_s28, %s5347_s28   ;;  %s4035_s27 = sphi %s4139_s27, %s5346_s27   ;;  %s4031_s26 = sphi %s4137_s26, %s5345_s26   ;;  %s4027_s25 = sphi %s4135_s25, %s5344_s25   ;;  %s4023_s24 = sphi %s4133_s24, %s5335_s24  }
  0x18   : > { %5270 = sst [smem:[#allocation21_spill]] %s4035_s27  ;;  %s5233_s16 = sadd.s32 4294967294, %s4075_s14  }
  0x19   : > { %5271 = sst [smem:[#allocation22_spill]] %s4039_s28  ;;  %p65_p0 = scmp.ne.s32.totalorder %s4051_s8, %s4047_s30 }
  0x1a   : > { %5272 = sst [smem:[#allocation23_spill]] %s4059_s10  ;;  %p5244_p1 = scmp.eq.s32.totalorder %s4200_s15, 0 }
  0x1b   : > { %5273 = sst [smem:[#allocation24_spill]] %s4063_s11  ;;  %p174_p2 = scmp.ne.s32.totalorder %s4043_s29, %s4039_s28 }
  0x1c   : > { %5274 = sst [smem:[#allocation25_spill]] %s4067_s12  ;;  %p175_p3 = scmp.eq.s32.totalorder %s4200_s15, 3 }
  0x1d   : > { %5275 = sst [smem:[#allocation26_spill]] %s4071_s13  ;;  %p4210_p4 = por %p5244_p1, %p65_p0 }
  0x1e   : > { %p180_p5 = scmp.ne.s32.totalorder %s4039_s28, %s4035_s27  ;;  %p4216_p6 = por %p175_p3, %p174_p2 }
  0x1f   : > { %s5276_s17 = scalar_select %p4210_p4, 1, 0 }
  0x20   : > { %s5277_s18 = scalar_select %p4216_p6, 1, 0 }
  0x21   : > { %p181_p7 = scmp.eq.s32.totalorder %s5233_s16, 3  ;;  %p200_p8 = scmp.ne.s32.totalorder %s4031_s26, %s4027_s25 }
  0x22   : > { %5278 = sst [smem:[#allocation27_spill]] %s5277_s18  ;;  %p206_p9 = scmp.ne.s32.totalorder %s4027_s25, %s4023_s24 }
  0x23   : > { %p4225_p10 = por %p181_p7, %p180_p5  ;;  %p2711_p11 = scmp.ge.s32.totalorder %s4075_s14, 1 }
  0x24   : > { %p4230_p12 = por %p200_p8, %p175_p3  ;;  %p4234_p13 = por %p206_p9, %p181_p7 }
  0x25   : > { %s5279_s19 = scalar_select %p4225_p10, 1, 0 }
  0x26   : > { %s5281_s20 = scalar_select %p4230_p12, 1, 0 }
  0x27   : > { %5280 = sst [smem:[#allocation28_spill]] %s5279_s19  ;;  %p240_p0 = scmp.lt.s32.totalorder %s4075_s14, 5 }
  0x28   : > { %5282 = sst [smem:[#allocation29_spill]] %s5281_s20  ;;  %s4077_s23 = smov [#allocation5]  }
  0x29   : > { %s5283_s21 = scalar_select %p4234_p13, 1, 0 }
  0x2a   : > { %p4239_p2 = pnand %p2711_p11, %p240_p0  ;;  %s253_s24 = sshll.u32 %s4077_s23, 4  ;;  %s254_s24 = int_to_ptr.vmem [resolvable:$true] %s253_s24 }
  0x2b   : > { %5284 = sst [smem:[#allocation30_spill]] %s5283_s21  ;;  %s4078_s30 = smov [#allocation8]  }
  0x2c   : > { %s5285_s22 = scalar_select %p4239_p2, 1, 0 }
  0x2d   : > { %p3486_p5 = pneg %p4239_p2  ;;  %s274_s16 = sshll.u32 %s4078_s30, 4  ;;  %s4245_s16 = int_to_ptr.vmem [resolvable:$true] %s274_s16 }
  0x2e   : > { %s4079_s21 = smov [#allocation7]   ;;  %s5287_s1 = sld [smem:[#allocation35_spill]] }
  0x2f   : > { %p4249_p3 = pnand %p3486_p5, %p5244_p1  ;;  %s4253_s27 = sshll.u32 %s4079_s21, 4  ;;  %s265_s27 = int_to_ptr.vmem [resolvable:$true] %s4253_s27 }
  0x31   : > { %p4263_p8 = pneg %p4249_p3 }
  0x34   : > { %s3719_s23 = scalar_lea.hbm %s5287_s1, 16 }
  0x35   : > { %p3720_p7 = scmp.ne.s32.totalorder %s5287_s1, %s3719_s23  ;;  %p3726_p0 = scmp.lt.u32.totalorder %s3719_s23, %s5287_s1 }
  0x37   : > { %p3722_p9 = pnand %p4263_p8, %p3720_p7 }
  0x39   : > { %p3723_p11 = pneg %p3722_p9 }
  0x3b   : > { %p3728_p5 = pnand %p3726_p0, %p3723_p11 }
  0x3d   : > { %3731 = shalt.err (!%p3728_p5)
}
  0x3e   : > { %s3732_s5 = scalar_lea.vmem %s254_s24, 16  ;;  %s3739_s6 = scalar_lea.vmem %s254_s24, 32 }
  0x3f   : > { %p3733_p1 = scmp.ne.s32.totalorder %s254_s24, %s3732_s5  ;;  %p3740_p6 = scmp.lt.s32.totalorder %s254_s24, %s254_s24 }
  0x40   : > { %p3741_p12 = scmp.lt.s32.totalorder %s3739_s6, %s3732_s5 }
  0x41   : > { %p3735_p13 = pnand %p3733_p1, %p4263_p8 }
  0x42   : > { %p3742_p4 = por %p3741_p12, %p3740_p6 }
  0x43   : > { %p3736_p10 = pneg %p3735_p13 }
  0x45   : > { %p3743_p2 = pnand %p3742_p4, %p3736_p10 }
  0x47   : > { %3746 = shalt.err (!%p3743_p2)
}
  0x48   : > { %3489 = dma.hbm_to_vmem [thread:$0]  (!%p4249_p3), %s5287_s1, 16, %s254_s24, [#allocation6]  }
  0x49   : > { %s5289_s3 = sld [smem:[#allocation37_spill]] }
  0x4f   : > { %s3747_s21 = scalar_lea.hbm %s5289_s3, 9216 }
  0x50   : > { %p3748_p1 = scmp.ne.s32.totalorder %s5289_s3, %s3747_s21  ;;  %p3754_p4 = scmp.lt.u32.totalorder %s3747_s21, %s5289_s3 }
  0x52   : > { %p3750_p13 = pnand %p3748_p1, %p4263_p8 }
  0x54   : > { %p3751_p6 = pneg %p3750_p13 }
  0x56   : > { %p3756_p10 = pnand %p3754_p4, %p3751_p6 }
  0x58   : > { %3759 = shalt.err (!%p3756_p10)
}
  0x59   : > { %s3760_s24 = scalar_lea.vmem %s4245_s16, 9216  ;;  %p3768_p9 = scmp.lt.s32.totalorder %s4245_s16, %s4245_s16 }
  0x5a   : > { %p3761_p12 = scmp.ne.s32.totalorder %s4245_s16, %s3760_s24  ;;  %p3769_p11 = scmp.lt.s32.totalorder %s3760_s24, %s3760_s24 }
  0x5c   : > { %p3763_p2 = pnand %p3761_p12, %p4263_p8  ;;  %p3770_p0 = por %p3769_p11, %p3768_p9 }
  0x5e   : > { %p3764_p7 = pneg %p3763_p2 }
  0x60   : > { %p3771_p5 = pnand %p3770_p0, %p3764_p7 }
  0x62   : > { %3774 = shalt.err (!%p3771_p5)
}
  0x63   : > { %s4080_s10 = smov 64   ;;  %s4081_s11 = smov 4  }
  0x64   : > { %3495 = dma.hbm_to_vmem [thread:$0]  (!%p4249_p3), %s5289_s3, 9216, %s4245_s16, [#allocation9], %s4080_s10, %s4080_s10, %s4081_s11  }
  0x65   : > { %s4082_s20 = smov [#allocation10]   ;;  %s5290_s2 = sld [smem:[#allocation36_spill]] }
  0x66   : > { %s288_s23 = sshll.u32 %s4082_s20, 4  ;;  %s289_s23 = int_to_ptr.vmem [resolvable:$true] %s288_s23 }
  0x6b   : > { %s3775_s6 = scalar_lea.hbm %s5290_s2, 16 }
  0x6c   : > { %p3776_p1 = scmp.ne.s32.totalorder %s5290_s2, %s3775_s6  ;;  %p3782_p4 = scmp.lt.u32.totalorder %s3775_s6, %s5290_s2 }
  0x6e   : > { %p3778_p13 = pnand %p3776_p1, %p4263_p8 }
  0x70   : > { %p3779_p6 = pneg %p3778_p13 }
  0x72   : > { %p3784_p10 = pnand %p3782_p4, %p3779_p6 }
  0x74   : > { %3787 = shalt.err (!%p3784_p10)
}
  0x75   : > { %s3788_s16 = scalar_lea.vmem %s265_s27, 16  ;;  %s3795_s10 = scalar_lea.vmem %s265_s27, 32 }
  0x76   : > { %p3789_p12 = scmp.ne.s32.totalorder %s265_s27, %s3788_s16  ;;  %p3796_p9 = scmp.lt.s32.totalorder %s265_s27, %s265_s27 }
  0x77   : > { %p3797_p11 = scmp.lt.s32.totalorder %s3795_s10, %s3788_s16 }
  0x78   : > { %p3791_p2 = pnand %p3789_p12, %p4263_p8 }
  0x79   : > { %p3798_p0 = por %p3797_p11, %p3796_p9 }
  0x7a   : > { %p3792_p7 = pneg %p3791_p2 }
  0x7c   : > { %p3799_p5 = pnand %p3798_p0, %p3792_p7 }
  0x7e   : > { %3802 = shalt.err (!%p3799_p5)
}
  0x7f   : > { %3492 = dma.hbm_to_vmem [thread:$0]  (!%p4249_p3), %s5290_s2, 16, %s265_s27, [#allocation6]  }
  0x80   : > { %s5291_s4 = sld [smem:[#allocation38_spill]] }
  0x86   : > { %s3803_s7 = scalar_lea.hbm %s5291_s4, 16 }
  0x87   : > { %p3804_p1 = scmp.ne.s32.totalorder %s5291_s4, %s3803_s7  ;;  %p3810_p4 = scmp.lt.u32.totalorder %s3803_s7, %s5291_s4 }
  0x89   : > { %p3806_p13 = pnand %p3804_p1, %p4263_p8 }
  0x8b   : > { %p3807_p6 = pneg %p3806_p13 }
  0x8d   : > { %p3812_p10 = pnand %p3810_p4, %p3807_p6 }
  0x8f   : > { %3815 = shalt.err (!%p3812_p10)
}
  0x90   : > { %s3816_s6 = scalar_lea.vmem %s289_s23, 16  ;;  %s3823_s27 = scalar_lea.vmem %s289_s23, 32 }
  0x91   : > { %p3817_p12 = scmp.ne.s32.totalorder %s289_s23, %s3816_s6  ;;  %p3824_p9 = scmp.lt.s32.totalorder %s289_s23, %s289_s23 }
  0x92   : > { %p3825_p11 = scmp.lt.s32.totalorder %s3823_s27, %s3816_s6 }
  0x93   : > { %p3819_p2 = pnand %p3817_p12, %p4263_p8 }
  0x94   : > { %p3826_p0 = por %p3825_p11, %p3824_p9 }
  0x95   : > { %p3820_p7 = pneg %p3819_p2 }
  0x97   : > { %p3827_p5 = pnand %p3826_p0, %p3820_p7 }
  0x99   : > { %3830 = shalt.err (!%p3827_p5)
}
  0x9a   : > { %3498 = dma.hbm_to_vmem [thread:$0]  (!%p4249_p3), %s5291_s4, 16, %s289_s23, [#allocation9]  }
  0x9b   : > { %s38_s30 = sadd.s32 1, %s4067_s12  ;;  %s41_s19 = sadd.s32 1, %s4071_s13 }
  0x9c   : > { %p39_p8 = scmp.ge.s32.totalorder %s38_s30, 2  ;;  %s2709_s10 = sshll.u32 %s4071_s13, 1 }
  0x9d   : > { %s52_s1 = sadd.s32 1, %s4055_s9  ;;  %s46_s11 = sadd.s32 %s4067_s12, %s2709_s10 }
  0x9e   : > { %s5355_s30 = smov (%p39_p8, %s38_s30), 0  ;;  %s5357_s19 = smov (!%p39_p8, %s41_s19), %s4071_s13 }
  0x9f   : > { %5292 = sst [smem:[#allocation31_spill]] %s5355_s30  ;;  %p59_p1 = scmp.ne.s32.totalorder %s4055_s9, %s4051_s8 }
  0xa0   : > { %p43_p13 = scmp.ge.s32.totalorder %s5357_s19, 2  ;;  %p60_p6 = scmp.eq.s32.totalorder %s4075_s14, 0 }
  0xa1   : > { %s160_s23 = ssub.s32 %s4067_s12, %s5355_s30  ;;  %s164_s25 = sadd.s32 1, %s4043_s29 }
  0xa2   : > { %s5359_s19 = smov (%p43_p13, %s5357_s19), 0  ;;  %p4355_p3 = por %p60_p6, %p59_p1 }
  0xa3   : > { %5293 = sst [smem:[#allocation32_spill]] %s5359_s19  ;;  %s190_s7 = sadd.s32 1, %s4031_s26 }
  0xa4   : > { %s2710_s18 = sshll.u32 %s5359_s19, 1  ;;  %s159_s20 = ssub.s32 %s4071_s13, %s5359_s19 }
  0xa5   : > { %s48_s21 = sadd.s32 %s2710_s18, %s5355_s30  ;;  %s161_s5 = sor.u32 %s160_s23, %s159_s20 }
  0xa6   : > { %s49_s6 = ssub.s32 %s46_s11, %s48_s21  ;;  %p162_p4 = scmp.eq.s32.totalorder %s161_s5, 0 }
  0xa7   : > { %p50_p10 = scmp.eq.s32.totalorder %s49_s6, 0  ;;  %p188_p12 = scmp.eq.s32.totalorder %s159_s20, 0 }
  0xa8   : > { %s4365_s27 = scalar_select %p162_p4, %s4043_s29, %s164_s25  }
  0xa9   : > { %s4368_s24 = scalar_select %p50_p10, %s4055_s9, %s52_s1  }
  0xaa   : > { %s4371_s16 = scalar_select %p188_p12, %s4031_s26, %s190_s7  }
  0xab   : > { %5295 = sst [smem:[#allocation33_spill]] %s4368_s24  ;;  %p3517_p2 = scmp.lt.s32.totalorder %s4075_s14, 4 }
  0xac   : > { %s299_s10 = sand.u32 1, %s4055_s9   ;;  %s3460_s3 = smul.u32 3840, %s46_s11 }
  0xad   : > { %s3459_s2 = smul.u32 240, %s299_s10  ;;  %p4377_p7 = pnand %p3517_p2, %p4355_p3 }
  0xae   : > { %s5297_s0 = sld [smem:[#allocation34_spill]]  ;;  %s4388_s11 = scalar_lea.sflag [#allocation3], %s299_s10 }
  0xaf   : > { %s303_s1 = scalar_lea.vmem [#allocation2], %s3459_s2  ;;  %p3833_p11 = pneg %p4377_p7 }
  0xb0   : > { %s312_s7 = sshll.u32 %s303_s1, 4  ;;  %s4386_s7 = int_to_ptr.vmem [resolvable:$true] %s312_s7 }
  0xb4   : > { %s4384_s25 = scalar_lea.hbm %s5297_s0, %s3460_s3  ;;  %s3836_s21 = scalar_lea.hbm %s5297_s0, 15360 }
  0xb5   : > { %s3831_s28 = scalar_lea.hbm %s4384_s25, 3840  ;;  %p3837_p8 = scmp.lt.u32.totalorder %s4384_s25, %s5297_s0 }
  0xb6   : > { %p3832_p9 = scmp.ne.s32.totalorder %s4384_s25, %s3831_s28  ;;  %p3838_p1 = scmp.lt.u32.totalorder %s3836_s21, %s3831_s28 }
  0xb7   : > { %p3840_p6 = scmp.lt.u32.totalorder %s3831_s28, %s4384_s25 }
  0xb8   : > { %p3834_p0 = pnand %p3833_p11, %p3832_p9  ;;  %p3839_p13 = por %p3838_p1, %p3837_p8 }
  0xba   : > { %p3835_p5 = pneg %p3834_p0  ;;  %p3841_p3 = por %p3840_p6, %p3839_p13 }
  0xbc   : > { %p3842_p4 = pnand %p3841_p3, %p3835_p5 }
  0xbe   : > { %3845 = shalt.err (!%p3842_p4)
}
  0xbf   : > { %s3846_s2 = scalar_lea.vmem %s4386_s7, 3840  ;;  %s4083_s10 = smov [#allocation2]  }
  0xc0   : > { %p3847_p10 = scmp.ne.s32.totalorder %s4386_s7, %s3846_s2  ;;  %s3851_s23 = sshll.u32 %s4083_s10, 4  ;;  %s3852_s23 = int_to_ptr.vmem [resolvable:$false] %s3851_s23 }
  0xc1   : > { %s3853_s18 = scalar_lea.vmem %s3852_s23, 7680  ;;  %p3854_p9 = scmp.lt.s32.totalorder %s4386_s7, %s3852_s23 }
  0xc2   : > { %p3849_p12 = pnand %p3847_p10, %p3833_p11  ;;  %p3855_p0 = scmp.lt.s32.totalorder %s3853_s18, %s3846_s2 }
  0xc4   : > { %p3850_p2 = pneg %p3849_p12  ;;  %p3856_p8 = por %p3855_p0, %p3854_p9 }
  0xc6   : > { %p3857_p1 = pnand %p3856_p8, %p3850_p2 }
  0xc8   : > { %3860 = shalt.err (!%p3857_p1)
}
  0xc9   : > { %s4084_s1 = smov 128   ;;  %s4085_s28 = smov 8  }
  0xca   : > { %3502 = dma.hbm_to_vmem [thread:$0]  (!%p4377_p7), %s4384_s25, 3840, %s4386_s7, %s4388_s11, %s4084_s1, %s4084_s1, %s4085_s28  }
  0xcb   : > { %p5298_p11 = scmp.ne.s32.totalorder %s5285_s22, 0 }
  0xcc   : > { %s326_s3 = sand.u32 (!%p5298_p11), 1, %s4051_s8   ;;  %p5299_p5 = scmp.ne.s32.totalorder (!%p5298_p11), %s5276_s17, 0 }
  0xcd   : > { %324 = sbr.rel (%p5298_p11) target bundleno = 731 (0x2db), region = 40  ;;  %s327_s21 = scalar_lea.sflag (!%p5298_p11), [#allocation3], %s326_s3 }
  0xce   : > { %s3461_s20 = smul.u32 (!%p5298_p11), 240, %s326_s3 }
  0xd0   : > { %s4419_s5 = scalar_lea.vmem (!%p5298_p11), [#allocation2], %s3461_s20 }
  0xd4   : > { %4002 = dma.done.wait (%p5299_p5), %s327_s21, 3840  }
  0xd5   : > { %4004 = vsyncadd (%p5299_p5), %s327_s21, 4294963456  ;;  %p5300_p13 = scmp.eq.s32.totalorder %s4200_s15, 0 }
  0xd7   : > { %4006 = dma.done.wait (%p5300_p13), [#allocation6], 32   ;;  %p5301_p7 = pmov %p5300_p13 }
  0xd9   : > { %4008 = vsyncadd (%p5301_p7), [#allocation6], 4294967264  ;;  %p5302_p6 = pmov %p5301_p7 }
  0xdb   : > { %4010 = dma.done.wait (%p5302_p6), [#allocation9], 9232   ;;  %p5303_p3 = pmov %p5302_p6 }
  0xdc   : > { %s5304_s4 = sld [smem:[#allocation22_spill]]  ;;  %s5305_s22 = sld [smem:[#allocation20_spill]]  ;;  %v3647_v0 = vld [vmem:[#allocation8 + $0xc0] sm:$0xff]   ;;  %v3649_v2 = vld [vmem:[#allocation8 + $0xc8] sm:$0xff]   ;;  %v3651_v4 = vld [vmem:[#allocation8 + $0xd0] sm:$0xff]   ;;  %v523_v7 = vlaneseq  ;;  %vm4086_vm2 = vmmov 1  }
  0xdd   : > { %4012 = vsyncadd (%p5303_p3), [#allocation9], 4294958064  ;;  %v3648_v1 = vld [vmem:[#allocation8 + $0x100] sm:$0xff]   ;;  %3027 = vmatprep.subr.bf16.mxu1 %v3647_v0  ;;  %v3650_v3 = vld [vmem:[#allocation8 + $0x108] sm:$0xff]   ;;  %s5306_s11 = sld [smem:[#allocation23_spill]]  ;;  %vm1792_vm6 = vcmask 1046528  }
  0xde   : > { %3155 = vmatprep.subr.bf16.mxu0 %v3648_v1  ;;  %3028 = vmatpush3.bf16.msra.mxu1 %v3647_v0  ;;  %v3652_v5 = vld [vmem:[#allocation8 + $0x110] sm:$0xff]   ;;  %v3653_v6 = vld [vmem:[#allocation8 + $0xd8] sm:$0xff]   ;;  %v3655_v9 = vld [vmem:[#allocation8 + $0xe0] sm:$0xff]   ;;  %v4439_v10 = vshrl.u32 %v523_v7, 7  ;;  %vm1107_vm4 = vsmask.f32 7424 }
  0xdf   : > { %3156 = vmatpush3.bf16.msra.mxu0 %v3648_v1  ;;  %3029 = vmatprep.subr.bf16.mxu1 %v3649_v2  ;;  %v3654_v8 = vld [vmem:[#allocation8 + $0x118] sm:$0xff]   ;;  %v3656_v11 = vld [vmem:[#allocation8 + $0x120] sm:$0xff]   ;;  %v3657_v12 = vld [vmem:[#allocation8 + $0xe8] sm:$0xff]  }
  0xe0   : > { %3157 = vmatprep.subr.bf16.mxu0 %v3650_v3  ;;  %v3658_v13 = vld [vmem:[#allocation8 + $0x128] sm:$0xff]   ;;  %v4445_v16 = vld [vmem:[#allocation5] ss:$0 sm:$0xff]  ;;  %v4448_v17 = vadd.s32 16, %v4439_v10  ;;  %v4450_v18 = vld [vmem:[#allocation7] ss:$0 sm:$0xff] }
  0xe1   : > { %v392_v14 = vld [vmem:[%s4419_s5 + $0x18] sm:$0xff]  ;;  %v393_v15 = vld [vmem:[%s4419_s5 + $0x20] sm:$0xff]  ;;  %v394_v21 = vld [vmem:[%s4419_s5 + $0x28] sm:$0xff]  ;;  %vm527_vm0 = vcmp.ge.s32.totalorder %v4439_v10, 1 }
  0xe2   : > { %s5255_s25 = sand.u32 1, %s5304_s4   ;;  %s377_s7 = sand.u32 1, %s5305_s22   ;;  %3030 = vmatpush3.bf16.msra.mxu1 %v3649_v2  ;;  %v430_v19 = vmul.f32 %v4445_v16, %v392_v14  ;;  %v431_v20 = vmul.f32 %v4445_v16, %v393_v15  ;;  %v395_v22 = vld [vmem:[%s4419_s5 + $0x30] sm:$0xff]  ;;  %v432_v23 = vmul.f32 %v4445_v16, %v394_v21  ;;  %v396_v24 = vld [vmem:[%s4419_s5 + $0x38] sm:$0xff]  ;;  %v397_v29 = vld [vmem:[%s4419_s5 + $0x40] sm:$0xff]  ;;  %vm532_vm1 = vcmp.le.s32.totalorder %v4448_v17, 16 }
  0xe3   : > { %s4437_s17 = sshll.u32 %s5255_s25, 7  ;;  %3158 = vmatpush3.bf16.msra.mxu0 %v3650_v3  ;;  %3031 = vmatprep.subr.bf16.mxu1 %v3651_v4  ;;  %p536_p4 = scmp.gt.s32.totalorder %s5306_s11, 0  ;;  %v433_v25 = vmul.f32 %v4445_v16, %v395_v22  ;;  %v434_v28 = vmul.f32 %v4445_v16, %v396_v24  ;;  %v3659_v30 = vld [vmem:[#allocation8 + $0xf0] sm:$0xff]   ;;  %v435_v33 = vmul.f32 %v4445_v16, %v397_v29  ;;  %vm4479_vm3 = vmpackc.low %vm4086_vm2, %vm527_vm0  ;;  %v3661_v42 = vld [vmem:[#allocation8 + $0xf8] sm:$0xff]  }
  0xe4   : > { %3159 = vmatprep.subr.bf16.mxu0 %v3652_v5  ;;  %p546_p10 = scmp.lt.s32.totalorder %s5306_s11, 1  ;;  %v466_v26 = vadd.f32 %v4450_v18, %v430_v19  ;;  %v467_v27 = vadd.f32 %v4450_v18, %v431_v20  ;;  %v468_v31 = vadd.f32 %v4450_v18, %v432_v23  ;;  %v3660_v34 = vld [vmem:[#allocation8 + $0x130] sm:$0xff]   ;;  %v3662_v46 = vld [vmem:[#allocation8 + $0x138] sm:$0xff]   ;;  %v3663_v61 = vld [vmem:[#allocation8] sm:$0xff]   ;;  %s5035_s10 = scalar_lea.vmem [#allocation11], %s4437_s17 }
  0xe5   : > { %s4458_s6 = scalar_select %p536_p4, 1, 0  ;;  %v469_v32 = vadd.f32 %v4450_v18, %v433_v25  ;;  %v470_v37 = vadd.f32 %v4450_v18, %v434_v28  ;;  %v471_v41 = vadd.f32 %v4450_v18, %v435_v33  ;;  %v398_v51 = vld [vmem:[%s4419_s5 + $0x48] sm:$0xff]  ;;  %v399_v52 = vld [vmem:[%s4419_s5 + $0x50] sm:$0xff]  ;;  %v400_v55 = vld [vmem:[%s4419_s5 + $0x58] sm:$0xff] }
  0xe6   : > { %3032 = vmatpush3.bf16.msra.mxu1 %v3651_v4  ;;  %s4469_s2 = scalar_select %p546_p10, 1, 0  ;;  %v496_v35 = vmax.f32 %v466_v26, 0.0  ;;  %v497_v36 = vmax.f32 %v467_v27, 0.0  ;;  %v498_v39 = vmax.f32 %v468_v31, 0.0  ;;  %v401_v63 = vld [vmem:[%s4419_s5 + $0x60] sm:$0xff]  ;;  %v436_v7 = vmul.f32 %v4445_v16, %v398_v51 }
  0xe7   : > { %3160 = vmatpush3.bf16.msra.mxu0 %v3652_v5  ;;  %3033 = vmatprep.subr.bf16.mxu1 %v3653_v6  ;;  %v499_v40 = vmax.f32 %v469_v32, 0.0  ;;  %v500_v45 = vmax.f32 %v470_v37, 0.0  ;;  %v501_v50 = vmax.f32 %v471_v41, 0.0  ;;  %v538_v56 = vstv %s4458_s6  ;;  %v402_v4 = vld [vmem:[%s4419_s5 + $0x68] sm:$0xff]  ;;  %v403_v22 = vld [vmem:[%s4419_s5 + $0x70] sm:$0xff]  ;;  %v404_v28 = vld [vmem:[%s4419_s5 + $0x78] sm:$0xff] }
  0xe8   : > { %3161 = vmatprep.subr.bf16.mxu0 %v3654_v8  ;;  %v559_v43 = vsel %vm527_vm0, %v496_v35, 0.0  ;;  %v4486_v44 = vpack.c.bf16 %v497_v36, %v496_v35  ;;  %v561_v48 = vsel %vm532_vm1, %v498_v39, 0.0  ;;  %v548_v57 = vstv %s4469_s2  ;;  %v3665_v24 = vld [vmem:[#allocation8 + $0x8] sm:$0xff]   ;;  %v3711_v38 = vld [vmem:[#allocation8 + $0x200] sm:$0xff]   ;;  %s5039_s23 = scalar_lea.vmem [#allocation12], %s377_s7  ;;  %s5043_s18 = scalar_lea.vmem [#allocation14], %s377_s7 }
  0xe9   : > { %v4488_v47 = vpack.c.bf16 %v497_v36, %v559_v43  ;;  %v562_v49 = vsel %vm527_vm0, %v499_v40, 0.0  ;;  %v4499_v53 = vpack.c.bf16 %v561_v48, %v561_v48  ;;  %v4508_v60 = vpack.c.bf16 %v500_v45, %v499_v40  ;;  %v3666_v33 = vld [vmem:[#allocation8 + $0x1c8] sm:$0xff]   ;;  %p2872_p12 = scmp.ne.s32.totalorder %s5306_s11, 0 }
  0xea   : > { %3034 = vmatpush3.bf16.msra.mxu1 %v3653_v6  ;;  %3043 = vmatprep.mubr.msk.bf16.mxu1 %vm4479_vm3, %v4486_v44  ;;  %v4501_v54 = vpack.c.bf16 %v500_v45, %v562_v49  ;;  %v564_v62 = vsel %vm532_vm1, %v501_v50, 0.0  ;;  %v439_v14 = vmul.f32 %v4445_v16, %v401_v63  ;;  %v472_v20 = vadd.f32 %v4450_v18, %v436_v7  ;;  %v405_v39 = vld [vmem:[%s4419_s5 + $0x80] sm:$0xff] }
  0xeb   : > { %3162 = vmatpush3.bf16.msra.mxu0 %v3654_v8  ;;  %3035 = vmatprep.subr.bf16.mxu1 %v3655_v9  ;;  %v1121_v58 = vshrl.u32 %v4488_v47, 16  ;;  %v1123_v59 = vshll.u32 %v4488_v47, 16  ;;  %v1796_v0 = vrot.slane %v4488_v47, 1  ;;  %v1128_v1 = vshll.u32 %v4499_v53, 16  ;;  %v3667_v50 = vld [vmem:[#allocation8 + $0x10] sm:$0xff]  }
  0xec   : > { %3163 = vmatprep.subr.bf16.mxu0 %v3656_v11  ;;  %v4515_v2 = vpack.c.bf16 %v564_v62, %v564_v62  ;;  %v1133_v3 = vshrl.u32 %v4501_v54, 16  ;;  %v1135_v6 = vshll.u32 %v4501_v54, 16  ;;  %v437_v8 = vmul.f32 %v4445_v16, %v399_v52  ;;  %v417_v47 = vld [vmem:[%s4419_s5 + $0xe0] sm:$0xff] }
  0xed   : > { %v1125_v5 = vrot.slane %v1123_v59, 1  ;;  %v440_v26 = vmul.f32 %v4445_v16, %v402_v4  ;;  %v475_v27 = vadd.f32 %v4450_v18, %v439_v14  ;;  %v502_v31 = vmax.f32 %v472_v20, 0.0  ;;  %v406_v59 = vld [vmem:[%s4419_s5 + $0x88] sm:$0xff]  ;;  %v408_v14 = vld [vmem:[%s4419_s5 + $0x98] sm:$0xff] }
  0xee   : > { %3036 = vmatpush3.bf16.msra.mxu1 %v3655_v9  ;;  %v1130_v9 = vrot.slane %v1128_v1, 1  ;;  %v1137_v19 = vrot.slane %v1135_v6, 1  ;;  %v473_v21 = vadd.f32 %v4450_v18, %v437_v8  ;;  %v441_v37 = vmul.f32 %v4445_v16, %v403_v22  ;;  %v407_v8 = vld [vmem:[%s4419_s5 + $0x90] sm:$0xff] }
  0xef   : > { %3164 = vmatpush3.bf16.msra.mxu0 %v3656_v11  ;;  %3037 = vmatprep.subr.bf16.mxu1 %v3657_v12  ;;  %v1140_v11 = vshll.u32 %v4515_v2, 16  ;;  %v1126_v15 = vor.u32 %v1125_v5, %v1121_v58  ;;  %v476_v35 = vadd.f32 %v4450_v18, %v440_v26  ;;  %v505_v36 = vmax.f32 %v475_v27, 0.0  ;;  %v3669_v20 = vld [vmem:[#allocation8 + $0x18] sm:$0xff]  }
  0xf0   : > { %3165 = vmatprep.subr.bf16.mxu0 %v3658_v13  ;;  %v503_v32 = vmax.f32 %v473_v21, 0.0  ;;  %v565_v41 = vsel %vm527_vm0, %v502_v31, 0.0  ;;  %v442_v43 = vmul.f32 %v4445_v16, %v404_v28  ;;  %v1797_v51 = vrot.slane %v4499_v53, 1  ;;  %v3670_v21 = vld [vmem:[#allocation8 + $0x1d8] sm:$0xff]   ;;  %v3679_v53 = vld [vmem:[#allocation8 + $0x180] sm:$0xff]  }
  0xf1   : > { %v1142_v23 = vrot.slane %v1140_v11, 1  ;;  %v4533_v29 = vsel %vm1107_vm4, %v1126_v15, %v1130_v9  ;;  %v506_v48 = vmax.f32 %v476_v35, 0.0  ;;  %v568_v49 = vsel %vm527_vm0, %v505_v36, 0.0  ;;  %v409_v28 = vld [vmem:[%s4419_s5 + $0xa0] sm:$0xff] }
  0xf2   : > { %3038 = vmatpush3.bf16.msra.mxu1 %v3657_v12  ;;  %v3664_v12 = vld [vmem:[#allocation8 + $0x1c0] sm:$0xff]   ;;  %3171 = vmatprep.mubr.bf16.mxu0 %v4533_v29  ;;  %v4551_v45 = vpack.c.bf16 %v503_v32, %v565_v41  ;;  %v443_v58 = vmul.f32 %v4445_v16, %v405_v39  ;;  %v478_v6 = vadd.f32 %v4450_v18, %v442_v43  ;;  %vm4632_vm5 = vcmp.eq.s32.totalorder %v538_v56, 1 }
  0xf3   : > { %3166 = vmatpush3.bf16.msra.mxu0 %v3658_v13  ;;  %3039 = vmatprep.subr.bf16.mxu1 %v3659_v30  ;;  %v438_v13 = vmul.f32 %v4445_v16, %v400_v55  ;;  %v477_v55 = vadd.f32 %v4450_v18, %v441_v37  ;;  %v4568_v63 = vpack.c.bf16 %v506_v48, %v568_v49  ;;  %v3671_v41 = vld [vmem:[#allocation8 + $0x20] sm:$0xff]   ;;  %vm4664_vm7 = vcmp.eq.s32.totalorder %v548_v57, 1  ;;  %vm4704_vm8 = vmand %vm527_vm0, %vm4632_vm5 }
  0xf4   : > { %3167 = vmatprep.subr.bf16.mxu0 %v3660_v34  ;;  %v1147_v62 = vshll.u32 %v4551_v45, 16  ;;  %v4570_v1 = vpack.c.bf16 %v506_v48, %v505_v36  ;;  %v479_v7 = vadd.f32 %v4450_v18, %v443_v58  ;;  %v508_v22 = vmax.f32 %v478_v6, 0.0  ;;  %vm2767_vm9 = vmpackc.low %vm4632_vm5, %vm4704_vm8 }
  0xf5   : > { %v474_v25 = vadd.f32 %v4450_v18, %v438_v13  ;;  %v507_v5 = vmax.f32 %v477_v55, 0.0  ;;  %v1157_v11 = vshrl.u32 %v4568_v63, 16  ;;  %v444_v13 = vmul.f32 %v4445_v16, %v406_v59  ;;  %v411_v55 = vld [vmem:[%s4419_s5 + $0xb0] sm:$0xff]  ;;  %vm4755_vm10 = vmand %vm527_vm0, %vm4664_vm7 }
  0xf6   : > { %3040 = vmatpush3.bf16.msra.mxu1 %v3659_v30  ;;  %v1138_v30 = vor.u32 %v1137_v19, %v1133_v3  ;;  %v3668_v3 = vld [vmem:[#allocation8 + $0x1d0] sm:$0xff]   ;;  %v1149_v9 = vrot.slane %v1147_v62, 1  ;;  %v447_v49 = vmul.f32 %v4445_v16, %v409_v28  ;;  %vm555_vm11 = vmand %vm532_vm1, %vm4664_vm7 }
  0xf7   : > { %3168 = vmatpush3.bf16.msra.mxu0 %v3660_v34  ;;  %3041 = vmatprep.subr.bf16.mxu1 %v3661_v42  ;;  %v504_v34 = vmax.f32 %v474_v25, 0.0  ;;  %v570_v19 = vsel %vm532_vm1, %v507_v5, 0.0  ;;  %v480_v27 = vadd.f32 %v4450_v18, %v444_v13  ;;  %v449_v13 = vmul.f32 %v4445_v16, %v411_v55  ;;  %vm542_vm12 = vmand %vm532_vm1, %vm4632_vm5 }
  0xf8   : > { %3169 = vmatprep.subr.bf16.mxu0 %v3662_v46  ;;  %v4543_v40 = vsel %vm1107_vm4, %v1138_v30, %v1142_v23  ;;  %v509_v23 = vmax.f32 %v479_v7, 0.0  ;;  %v4582_v25 = vpack.c.bf16 %v570_v19, %v570_v19  ;;  %v571_v30 = vsel %vm527_vm0, %v508_v22, 0.0  ;;  %v3673_v7 = vld [vmem:[#allocation8 + $0x28] sm:$0xff]   ;;  %vm2820_vm13 = vmpackc.low %vm4664_vm7, %vm4755_vm10 }
  0xf9   : > { %v510_v43 = vmax.f32 %v480_v27, 0.0  ;;  %v483_v6 = vadd.f32 %v4450_v18, %v447_v49  ;;  %v485_v28 = vadd.f32 %v4450_v18, %v449_v13  ;;  %v415_v49 = vld [vmem:[%s4419_s5 + $0xd0] sm:$0xff] }
  0xfa   : > { %3042 = vmatpush3.bf16.msra.mxu1 %v3661_v42  ;;  %v4547_v42 = vpack.c.bf16 %v503_v32, %v502_v31  ;;  %v4591_v31 = vpack.c.bf16 %v509_v23, %v508_v22  ;;  %v445_v32 = vmul.f32 %v4445_v16, %v407_v8  ;;  %v1164_v37 = vshll.u32 %v4582_v25, 16  ;;  %v412_v8 = vld [vmem:[%s4419_s5 + $0xb8] sm:$0xff] }
  0xfb   : > { %3170 = vmatpush3.bf16.msra.mxu0 %v3662_v46  ;;  %3059 = vmatprep.subr.bf16.mxu1 %v3663_v61  ;;  %v567_v46 = vsel %vm532_vm1, %v504_v34, 0.0  ;;  %v410_v34 = vld [vmem:[%s4419_s5 + $0xa8] sm:$0xff]  ;;  %v4600_v39 = vpack.c.bf16 %v509_v23, %v571_v30  ;;  %v513_v22 = vmax.f32 %v483_v6, 0.0  ;;  %v515_v55 = vmax.f32 %v485_v28, 0.0 }
  0xfc   : > { %3187 = vmatprep.subr.bf16.mxu0 %v3664_v12  ;;  %v4558_v52 = vpack.c.bf16 %v567_v46, %v567_v46  ;;  %v481_v46 = vadd.f32 %v4450_v18, %v445_v32  ;;  %v1166_v58 = vrot.slane %v1164_v37, 1  ;;  %v448_v62 = vmul.f32 %v4445_v16, %v410_v34  ;;  %v414_v30 = vld [vmem:[%s4419_s5 + $0xc8] sm:$0xff] }
  0xfd   : > { %3044 = vmatmul.mubr.msk.bf16.vlgmr.msra.gmra.mrb[0].mxu1 %vm4479_vm3, %v4508_v60  ;;  %v1171_v59 = vshll.u32 %v4600_v39, 16  ;;  %v576_v56 = vsel %vm532_vm1, %v513_v22, 0.0  ;;  %v3674_v32 = vld [vmem:[#allocation8 + $0x1e8] sm:$0xff]   ;;  %v453_v57 = vmul.f32 %v4445_v16, %v415_v49  ;;  %v3710_v6 = vld [vmem:[#allocation8 + $0x178] sm:$0xff]  }
  0xfe   : > { %3172 = vmatmul.mubr.bf16.vlgmr.msra.gmra.mrb[0].mxu0 %v4543_v40  ;;  %3060 = vmatpush3.bf16.msra.mxu1 %v3663_v61  ;;  %v1145_v61 = vshrl.u32 %v4551_v45, 16  ;;  %v1152_v4 = vshll.u32 %v4558_v52, 16  ;;  %v484_v23 = vadd.f32 %v4450_v18, %v448_v62  ;;  %v3676_v62 = vld [vmem:[#allocation8 + $0x1f0] sm:$0xff]  }
  0xff   : > { %3188 = vmatpush3.bf16.msra.mxu0 %v3664_v12  ;;  %3061 = vmatprep.subr.bf16.mxu1 %v3665_v24  ;;  %v1159_v12 = vshll.u32 %v4568_v63, 16 }
 0x100   : > { %3189 = vmatprep.subr.bf16.mxu0 %v3666_v33  ;;  %3047 = vmatprep.mubr.msk.bf16.mxu1 %vm4479_vm3, %v4547_v42  ;;  %v1154_v15 = vrot.slane %v1152_v4, 1  ;;  %v511_v4 = vmax.f32 %v481_v46, 0.0 }
 0x101   : > { %v1161_v26 = vrot.slane %v1159_v12, 1  ;;  %v1173_v12 = vrot.slane %v1171_v59, 1  ;;  %v452_v59 = vmul.f32 %v4445_v16, %v414_v30 }
 0x102   : > { %3062 = vmatpush3.bf16.msra.mxu1 %v3665_v24  ;;  %v1150_v24 = vor.u32 %v1149_v9, %v1145_v61  ;;  %v3672_v61 = vld [vmem:[#allocation8 + $0x1e0] sm:$0xff]  }
 0x103   : > { %3190 = vmatpush3.bf16.msra.mxu0 %v3666_v33  ;;  %3063 = vmatprep.subr.bf16.mxu1 %v3667_v50  ;;  %v446_v33 = vmul.f32 %v4445_v16, %v408_v14  ;;  %v1162_v36 = vor.u32 %v1161_v26, %v1157_v11  ;;  %v413_v14 = vld [vmem:[%s4419_s5 + $0xc0] sm:$0xff] }
 0x104   : > { %3191 = vmatprep.subr.bf16.mxu0 %v3668_v3  ;;  %v4597_v35 = vsel %vm1107_vm4, %v1150_v24, %v1154_v15  ;;  %v574_v15 = vsel %vm527_vm0, %v511_v4, 0.0  ;;  %v451_v34 = vmul.f32 %v4445_v16, %v413_v14  ;;  %v488_v14 = vadd.f32 %v4450_v18, %v452_v59 }
 0x105   : > { %3048 = vmatmul.mubr.msk.bf16.gmra.mrb[4].mxu1 %vm4479_vm3, %v4570_v1  ;;  %3175 = vmatprep.mubr.bf16.mxu0 %v4597_v35  ;;  %v482_v48 = vadd.f32 %v4450_v18, %v446_v33  ;;  %v4618_v9 = vsel %vm1107_vm4, %v1162_v36, %v1166_v58  ;;  %v514_v33 = vmax.f32 %v484_v23, 0.0  ;;  %v3675_v36 = vld [vmem:[#allocation8 + $0x30] sm:$0xff]  }
 0x106   : > { %3064 = vmatpush3.bf16.msra.mxu1 %v3667_v50  ;;  %v1169_v50 = vshrl.u32 %v4600_v39, 16  ;;  %3051 = vmatprep.mubr.msk.bf16.mxu1 %vm4479_vm3, %v4591_v31 }
 0x107   : > { %3192 = vmatpush3.bf16.msra.mxu0 %v3668_v3  ;;  %3065 = vmatprep.subr.bf16.mxu1 %v3669_v20  ;;  %v573_v3 = vsel %vm532_vm1, %v510_v43, 0.0  ;;  %v512_v5 = vmax.f32 %v482_v48, 0.0  ;;  %v4648_v43 = vpack.c.bf16 %v576_v56, %v576_v56  ;;  %v577_v58 = vsel %vm527_vm0, %v514_v33, 0.0 }
 0x108   : > { %3193 = vmatprep.subr.bf16.mxu0 %v3670_v21  ;;  %v4620_v11 = vpack.c.bf16 %v573_v3, %v573_v3  ;;  %3176 = vmatmul.mubr.bf16.gmra.mrb[4].mxu0 %v4618_v9  ;;  %v1174_v24 = vor.u32 %v1173_v12, %v1169_v50  ;;  %v4671_v12 = vpack.c.bf16 %v515_v55, %v514_v33  ;;  %v518_v33 = vmax.f32 %v488_v14, 0.0 }
 0x109   : > { %v4627_v19 = vpack.c.bf16 %v512_v5, %v511_v4  ;;  %v4637_v27 = vpack.c.bf16 %v512_v5, %v574_v15  ;;  %v1188_v5 = vshll.u32 %v4648_v43, 16  ;;  %v3677_v15 = vld [vmem:[#allocation8 + $0x38] sm:$0xff]  }
 0x10a   : > { %3066 = vmatpush3.bf16.msra.mxu1 %v3669_v20  ;;  %v1176_v26 = vshll.u32 %v4620_v11, 16 }
 0x10b   : > { %3067 = vmatprep.subr.bf16.mxu1 %v3671_v41  ;;  %3194 = vmatpush3.bf16.msra.mxu0 %v3670_v21  ;;  %v450_v21 = vmul.f32 %v4445_v16, %v412_v8  ;;  %v1181_v46 = vshrl.u32 %v4637_v27, 16  ;;  %v1183_v48 = vshll.u32 %v4637_v27, 16  ;;  %v4669_v8 = vpack.c.bf16 %v515_v55, %v577_v58  ;;  %v3678_v55 = vld [vmem:[#allocation8 + $0x1f8] sm:$0xff]  }
 0x10c   : > { %3195 = vmatprep.subr.bf16.mxu0 %v3672_v61  ;;  %v1178_v37 = vrot.slane %v1176_v26, 1  ;;  %v1190_v22 = vrot.slane %v1188_v5, 1  ;;  %v390_v26 = vld [vmem:[%s4419_s5 + $0x8] sm:$0xff]  ;;  %v4713_v5 = vsel %vm1792_vm6, %v1796_v0, %v1797_v51 }
 0x10d   : > { %3052 = vmatmul.mubr.msk.bf16.gmra.mrb[8].mxu1 %vm4479_vm3, %v4627_v19  ;;  %v486_v50 = vadd.f32 %v4450_v18, %v450_v21  ;;  %v1185_v4 = vrot.slane %v1183_v48, 1  ;;  %v1193_v30 = vshrl.u32 %v4669_v8, 16  ;;  %v1195_v56 = vshll.u32 %v4669_v8, 16 }
 0x10e   : > { %3068 = vmatpush3.bf16.msra.mxu1 %v3671_v41  ;;  %v4658_v3 = vsel %vm1107_vm4, %v1174_v24, %v1178_v37  ;;  %v487_v41 = vadd.f32 %v4450_v18, %v451_v34  ;;  %v389_v24 = vld [vmem:[%s4419_s5] sm:$0xff]  ;;  %3055 = vmatprep.mubr.msk.bf16.mxu1 %vm4479_vm3, %v4671_v12  ;;  %v489_v37 = vadd.f32 %v4450_v18, %v453_v57  ;;  %v418_v57 = vld [vmem:[%s4419_s5 + $0xe8] sm:$0xff]  ;;  %v1814_v20 = vrot.slane %v4669_v8, 1 }
 0x10f   : > { %3069 = vmatprep.subr.bf16.mxu1 %v3673_v7  ;;  %3196 = vmatpush3.bf16.msra.mxu0 %v3672_v61  ;;  %v516_v13 = vmax.f32 %v486_v50, 0.0  ;;  %v1186_v61 = vor.u32 %v1185_v4, %v1181_v46  ;;  %v1197_v46 = vrot.slane %v1195_v56, 1  ;;  %v428_v59 = vmul.f32 %v4445_v16, %v390_v26  ;;  %v3691_v8 = vld [vmem:[#allocation8 + $0x1b0] sm:$0xff]  }
 0x110   : > { %3179 = vmatprep.mubr.bf16.mxu0 %v4658_v3  ;;  %3197 = vmatprep.subr.bf16.mxu0 %v3674_v32  ;;  %v517_v23 = vmax.f32 %v487_v41, 0.0  ;;  %v519_v50 = vmax.f32 %v489_v37, 0.0  ;;  %v455_v56 = vmul.f32 %v4445_v16, %v417_v47 }
 0x111   : > { %v579_v28 = vsel %vm532_vm1, %v516_v13, 0.0  ;;  %v1198_v41 = vor.u32 %v1197_v46, %v1193_v30  ;;  %v4728_v51 = vadd.f32 %v4450_v18, %v428_v59 }
 0x112   : > { %3070 = vmatpush3.bf16.msra.mxu1 %v3673_v7  ;;  %v4685_v7 = vsel %vm1107_vm4, %v1186_v61, %v1190_v22  ;;  %v4687_v21 = vpack.c.bf16 %v579_v28, %v579_v28  ;;  %v580_v34 = vsel %vm527_vm0, %v517_v23, 0.0  ;;  %v4695_v49 = vpack.c.bf16 %v518_v33, %v517_v23  ;;  %v416_v61 = vld [vmem:[%s4419_s5 + $0xd8] sm:$0xff] }
 0x113   : > { %3071 = vmatprep.subr.bf16.mxu1 %v3675_v36  ;;  %3198 = vmatpush3.bf16.msra.mxu0 %v3674_v32  ;;  %v4693_v48 = vpack.c.bf16 %v518_v33, %v580_v34  ;;  %v427_v32 = vmul.f32 %v4445_v16, %v389_v24  ;;  %v582_v0 = vsel %vm532_vm1, %v519_v50, 0.0  ;;  %v4730_v23 = vld [vmem:[#allocation8 + $0x80] sm:$0xff]   ;;  %v454_v24 = vmul.f32 %v4445_v16, %v416_v61  ;;  %v3681_v61 = vld [vmem:[#allocation8 + $0x188] sm:$0xff]  }
 0x114   : > { %3180 = vmatmul.mubr.bf16.gmra.mrb[8].mxu0 %v4685_v7  ;;  %3199 = vmatprep.subr.bf16.mxu0 %v3676_v62  ;;  %v1200_v58 = vshll.u32 %v4687_v21, 16  ;;  %v4734_v26 = vpack.c.bf16 %v582_v0, %v582_v0  ;;  %v456_v34 = vmul.f32 %v4445_v16, %v418_v57  ;;  %v391_v50 = vld [vmem:[%s4419_s5 + $0x10] sm:$0xff] }
 0x115   : > { %3056 = vmatmul.mubr.msk.bf16.gmra.mrb[12].mxu1 %vm4479_vm3, %v4695_v49  ;;  %v1207_v13 = vshll.u32 %v4693_v48, 16  ;;  %v4721_v14 = vadd.f32 %v4450_v18, %v427_v32  ;;  %v490_v37 = vadd.f32 %v4450_v18, %v454_v24  ;;  %v429_v10 = vmul.f32 %v4445_v16, %v391_v50 }
 0x116   : > { %3072 = vmatpush3.bf16.msra.mxu1 %v3675_v36  ;;  %v1205_v36 = vshrl.u32 %v4693_v48, 16  ;;  %v1202_v22 = vrot.slane %v1200_v58, 1  ;;  %v1212_v32 = vshll.u32 %v4734_v26, 16  ;;  %v491_v58 = vadd.f32 %v4450_v18, %v455_v56 }
 0x117   : > { %3073 = vmatprep.subr.bf16.mxu1 %v3677_v15  ;;  %3200 = vmatpush3.bf16.msra.mxu0 %v3676_v62  ;;  %v1209_v28 = vrot.slane %v1207_v13, 1  ;;  %v493_v30 = vmax.f32 %v4721_v14, 0.0  ;;  %v494_v62 = vmax.f32 %v4728_v51, 0.0  ;;  %v1800_v56 = vrot.slane %v4515_v2, 1  ;;  %v3684_v14 = vld [vmem:[#allocation8 + $0x90] sm:$0xff]  }
 0x118   : > { %3201 = vmatprep.subr.bf16.mxu0 %v3678_v55  ;;  %v4739_v33 = vsel %vm1107_vm4, %v1198_v41, %v1202_v22  ;;  %v492_v41 = vadd.f32 %v4450_v18, %v456_v34  ;;  %v1214_v13 = vrot.slane %v1212_v32, 1  ;;  %v521_v47 = vmax.f32 %v491_v58, 0.0 }
 0x119   : > { %3183 = vmatprep.mubr.bf16.mxu0 %v4739_v33  ;;  %v1210_v46 = vor.u32 %v1209_v28, %v1205_v36  ;;  %v2768_v59 = vpack.c.bf16 %v494_v62, %v493_v30  ;;  %v520_v36 = vmax.f32 %v490_v37, 0.0  ;;  %v1802_v2 = vrot.slane %v4551_v45, 1 }
 0x11a   : > { %3074 = vmatpush3.bf16.msra.mxu1 %v3677_v15  ;;  %v522_v22 = vmax.f32 %v492_v41, 0.0  ;;  %v584_v16 = vsel %vm4664_vm7, %v521_v47, 0.0  ;;  %v1803_v50 = vrot.slane %v4558_v52, 1  ;;  %v556_v45 = vsel %vm4704_vm8, %v493_v30, 0.0  ;;  %v3687_v52 = vld [vmem:[#allocation8 + $0x1a0] sm:$0xff]   ;;  %v3712_v15 = vld [vmem:[#allocation8 + $0x208] sm:$0xff]  }
 0x11b   : > { %3091 = vmatprep.subr.bf16.mxu1 %v3679_v53  ;;  %3202 = vmatpush3.bf16.msra.mxu0 %v3678_v55  ;;  %v1799_v55 = vrot.slane %v4501_v54, 1  ;;  %v583_v0 = vsel %vm4755_vm10, %v520_v36, 0.0  ;;  %v4780_v57 = vsel %vm1107_vm4, %v1210_v46, %v1214_v13  ;;  %v465_v54 = vadd.f32 %v4450_v18, %v429_v10  ;;  %v3685_v10 = vld [vmem:[#allocation8 + $0x198] sm:$0xff]  }
 0x11c   : > { %3219 = vmatprep.subr.bf16.mxu0 %v4730_v23  ;;  %3075 = vmatprep.mubr.msk.bf16.mxu1 %vm2767_vm9, %v2768_v59  ;;  %v585_v24 = vsel %vm555_vm11, %v522_v22, 0.0  ;;  %v4789_v28 = vpack.c.bf16 %v584_v16, %v583_v0  ;;  %v4796_v34 = vpack.c.bf16 %v521_v47, %v520_v36  ;;  %v3682_v59 = vld [vmem:[#allocation8 + $0x88] sm:$0xff]   ;;  %v4813_v13 = vsel %vm1792_vm6, %v1802_v2, %v1803_v50 }
 0x11d   : > { %3076 = vmatmul.mubr.msk.bf16.vlgmr.msra.gmra.mrb[0].mxu1 %vm4479_vm3, %v4486_v44  ;;  %3184 = vmatmul.mubr.bf16.gmra.mrb[12].mxu0 %v4780_v57  ;;  %v3683_v44 = vld [vmem:[#allocation8 + $0x190] sm:$0xff]   ;;  %v4799_v18 = vpack.c.bf16 %v585_v24, %v585_v24  ;;  %v495_v37 = vmax.f32 %v465_v54, 0.0  ;;  %v4807_v46 = vsel %vm1792_vm6, %v1799_v55, %v1800_v56  ;;  %v1805_v47 = vrot.slane %v4568_v63, 1 }
 0x11e   : > { %3092 = vmatpush3.bf16.msra.mxu1 %v3679_v53  ;;  %3203 = vmatprep.mubr.bf16.mxu0 %v4543_v40  ;;  %v1217_v53 = vshrl.u32 %v4789_v28, 16  ;;  %v1219_v17 = vshll.u32 %v4789_v28, 16  ;;  %v1806_v22 = vrot.slane %v4582_v25, 1  ;;  %v1809_v0 = vrot.slane %v4620_v11, 1 }
 0x11f   : > { %3093 = vmatprep.subr.bf16.mxu1 %v3681_v61  ;;  %3079 = vmatprep.mubr.msk.bf16.mxu1 %vm4479_vm3, %v4508_v60  ;;  %v1224_v32 = vshll.u32 %v4799_v18, 16  ;;  %v558_v58 = vsel %vm542_vm12, %v495_v37, 0.0  ;;  %v557_v4 = vsel %vm4632_vm5, %v494_v62, 0.0  ;;  %v1811_v11 = vrot.slane %v4637_v27, 1  ;;  %v3686_v27 = vld [vmem:[#allocation8 + $0x98] sm:$0xff]  }
 0x120   : > { %v1221_v41 = vrot.slane %v1219_v17, 1  ;;  %v4831_v25 = vsel %vm1792_vm6, %v1805_v47, %v1806_v22  ;;  %v1812_v30 = vrot.slane %v4648_v43, 1  ;;  %v1815_v51 = vrot.slane %v4687_v21, 1  ;;  %v3689_v43 = vld [vmem:[#allocation8 + $0x1a8] sm:$0xff]   ;;  %v3692_v47 = vld [vmem:[#allocation8 + $0xb0] sm:$0xff]  }
 0x121   : > { %v1226_v36 = vrot.slane %v1224_v32, 1  ;;  %v587_v62 = vpack.c.bf16 %v558_v58, %v558_v58  ;;  %v1817_v2 = vrot.slane %v4693_v48, 1  ;;  %v1818_v32 = vrot.slane %v4734_v26, 1  ;;  %v3690_v48 = vld [vmem:[#allocation8 + $0xa8] sm:$0xff]  }
 0x122   : > { %3094 = vmatpush3.bf16.msra.mxu1 %v3681_v61  ;;  %v1222_v55 = vor.u32 %v1221_v41, %v1217_v53  ;;  %v1808_v61 = vrot.slane %v4600_v39, 1  ;;  %v4850_v16 = vsel %vm1792_vm6, %v1811_v11, %v1812_v30  ;;  %v4853_v54 = vsel %vm1792_vm6, %v1814_v20, %v1815_v51  ;;  %v3688_v53 = vld [vmem:[#allocation8 + $0xa0] sm:$0xff]   ;;  %v3714_v11 = vld [vmem:[#allocation8 + $0x218] sm:$0xff]  }
 0x123   : > { %3095 = vmatprep.subr.bf16.mxu1 %v3683_v44  ;;  %v1820_v50 = vrot.slane %v4789_v28, 1  ;;  %v1821_v41 = vrot.slane %v4799_v18, 1  ;;  %v3695_v28 = vld [vmem:[#allocation8 + $0x40] sm:$0xff]  }
 0x124   : > { %v4828_v63 = vsel %vm1107_vm4, %v1222_v55, %v1226_v36  ;;  %v4840_v39 = vsel %vm1792_vm6, %v1808_v61, %v1809_v0  ;;  %v3693_v36 = vld [vmem:[#allocation8 + $0x1b8] sm:$0xff]   ;;  %v3700_v0 = vld [vmem:[#allocation8 + $0x150] sm:$0xff]  }
 0x125   : > { %3080 = vmatmul.mubr.msk.bf16.gmra.mrb[4].mxu1 %vm4479_vm3, %v4547_v42  ;;  %3204 = vmatmul.mubr.bf16.vlgmr.msra.gmra.mrb[0].mxu0 %v4597_v35  ;;  %v4877_v26 = vsel %vm1792_vm6, %v1820_v50, %v1821_v41  ;;  %v3694_v55 = vld [vmem:[#allocation8 + $0xb8] sm:$0xff]  }
 0x126   : > { %3096 = vmatpush3.bf16.msra.mxu1 %v3683_v44  ;;  %3220 = vmatpush3.bf16.msra.mxu0 %v4730_v23  ;;  %v586_v23 = vpack.c.bf16 %v557_v4, %v556_v45  ;;  %v1116_v44 = vshll.u32 %v587_v62, 16  ;;  %v3697_v45 = vld [vmem:[#allocation8 + $0x48] sm:$0xff]   ;;  %v3701_v61 = vld [vmem:[#allocation8 + $0x58] sm:$0xff]   ;;  %v3704_v4 = vld [vmem:[#allocation8 + $0x160] sm:$0xff]  }
 0x127   : > { %3207 = vmatprep.mubr.bf16.mxu0 %v4618_v9  ;;  %3221 = vmatprep.subr.bf16.mxu0 %v3682_v59 }
 0x128   : > { %3097 = vmatprep.subr.bf16.mxu1 %v3685_v10  ;;  %3083 = vmatprep.mubr.msk.bf16.mxu1 %vm4479_vm3, %v4570_v1  ;;  %v1109_v24 = vshrl.u32 %v586_v23, 16  ;;  %v1111_v56 = vshll.u32 %v586_v23, 16  ;;  %v1118_v37 = vrot.slane %v1116_v44, 1  ;;  %v1793_v18 = vrot.slane %v586_v23, 1 }
 0x12a   : > { %3098 = vmatpush3.bf16.msra.mxu1 %v3685_v10  ;;  %3222 = vmatpush3.bf16.msra.mxu0 %v3682_v59  ;;  %v1113_v21 = vrot.slane %v1111_v56, 1  ;;  %v4870_v59 = vsel %vm1792_vm6, %v1817_v2, %v1818_v32  ;;  %v1794_v10 = vrot.slane %v587_v62, 1 }
 0x12b   : > { %3099 = vmatprep.subr.bf16.mxu1 %v3687_v52  ;;  %3223 = vmatprep.subr.bf16.mxu0 %v3684_v14 }
 0x12c   : > { %v1114_v17 = vor.u32 %v1113_v21, %v1109_v24  ;;  %v1795_v22 = vsel %vm1792_vm6, %v1793_v18, %v1794_v10 }
 0x12d   : > { %3084 = vmatmul.mubr.msk.bf16.gmra.mrb[8].mxu1 %vm4479_vm3, %v4591_v31  ;;  %3208 = vmatmul.mubr.bf16.gmra.mrb[4].mxu0 %v4658_v3 }
 0x12e   : > { %3100 = vmatpush3.bf16.msra.mxu1 %v3687_v52  ;;  %3224 = vmatpush3.bf16.msra.mxu0 %v3684_v14  ;;  %v4866_v58 = vsel %vm1107_vm4, %v1114_v17, %v1118_v37  ;;  %v3698_v52 = vld [vmem:[#allocation8 + $0x148] sm:$0xff]  }
 0x12f   : > { %3211 = vmatprep.mubr.bf16.mxu0 %v4685_v7  ;;  %3225 = vmatprep.subr.bf16.mxu0 %v3686_v27 }
 0x130   : > { %3101 = vmatprep.subr.bf16.mxu1 %v3689_v43  ;;  %3087 = vmatprep.mubr.msk.bf16.mxu1 %vm4479_vm3, %v4627_v19 }
 0x132   : > { %3102 = vmatpush3.bf16.msra.mxu1 %v3689_v43  ;;  %3226 = vmatpush3.bf16.msra.mxu0 %v3686_v27 }
 0x133   : > { %3103 = vmatprep.subr.bf16.mxu1 %v3691_v8  ;;  %3227 = vmatprep.subr.bf16.mxu0 %v3688_v53 }
 0x135   : > { %3088 = vmatmul.mubr.msk.bf16.gmra.mrb[12].mxu1 %vm4479_vm3, %v4671_v12  ;;  %3212 = vmatmul.mubr.bf16.gmra.mrb[8].mxu0 %v4739_v33 }
 0x136   : > { %3104 = vmatpush3.bf16.msra.mxu1 %v3691_v8  ;;  %3228 = vmatpush3.bf16.msra.mxu0 %v3688_v53 }
 0x137   : > { %3215 = vmatprep.mubr.bf16.mxu0 %v4780_v57  ;;  %3229 = vmatprep.subr.bf16.mxu0 %v3690_v48  ;;  %v3699_v57 = vld [vmem:[#allocation8 + $0x50] sm:$0xff]  }
 0x138   : > { %3105 = vmatprep.subr.bf16.mxu1 %v3693_v36  ;;  %3107 = vmatprep.mubr.msk.bf16.mxu1 %vm4479_vm3, %v4508_v60  ;;  %v3696_v60 = vld [vmem:[#allocation8 + $0x140] sm:$0xff]  }
 0x13a   : > { %3106 = vmatpush3.bf16.msra.mxu1 %v3693_v36  ;;  %3230 = vmatpush3.bf16.msra.mxu0 %v3690_v48 }
 0x13b   : > { %3123 = vmatprep.subr.bf16.mxu1 %v3695_v28  ;;  %3231 = vmatprep.subr.bf16.mxu0 %v3692_v47 }
 0x13d   : > { %3108 = vmatmul.mubr.msk.bf16.vlgmr.msra.gmra.mrb[0].mxu1 %vm4479_vm3, %v4547_v42  ;;  %3216 = vmatmul.mubr.bf16.gmra.mrb[12].mxu0 %v4828_v63  ;;  %v3703_v42 = vld [vmem:[#allocation8 + $0x60] sm:$0xff]   ;;  %v3707_v63 = vld [vmem:[#allocation8 + $0x70] sm:$0xff]  }
 0x13e   : > { %3124 = vmatpush3.bf16.msra.mxu1 %v3695_v28  ;;  %3232 = vmatpush3.bf16.msra.mxu0 %v3692_v47 }
 0x13f   : > { %3235 = vmatprep.mubr.bf16.mxu0 %v1795_v22  ;;  %3233 = vmatprep.subr.bf16.mxu0 %v3694_v55 }
 0x140   : > { %3125 = vmatprep.subr.bf16.mxu1 %v3697_v45  ;;  %3111 = vmatprep.mubr.msk.bf16.mxu1 %vm4479_vm3, %v4570_v1  ;;  %v3702_v1 = vld [vmem:[#allocation8 + $0x158] sm:$0xff]  }
 0x142   : > { %3126 = vmatpush3.bf16.msra.mxu1 %v3697_v45  ;;  %3234 = vmatpush3.bf16.msra.mxu0 %v3694_v55 }
 0x143   : > { %3127 = vmatprep.subr.bf16.mxu1 %v3699_v57  ;;  %3251 = vmatprep.subr.bf16.mxu0 %v3696_v60 }
 0x145   : > { %3112 = vmatmul.mubr.msk.bf16.gmra.mrb[4].mxu1 %vm4479_vm3, %v4591_v31  ;;  %3236 = vmatmul.mubr.bf16.vlgmr.msra.gmra.mrb[0].mxu0 %v4713_v5  ;;  %v3705_v31 = vld [vmem:[#allocation8 + $0x68] sm:$0xff]  }
 0x146   : > { %3128 = vmatpush3.bf16.msra.mxu1 %v3699_v57  ;;  %3252 = vmatpush3.bf16.msra.mxu0 %v3696_v60 }
 0x147   : > { %3239 = vmatprep.mubr.bf16.mxu0 %v4807_v46  ;;  %3253 = vmatprep.subr.bf16.mxu0 %v3698_v52 }
 0x148   : > { %3129 = vmatprep.subr.bf16.mxu1 %v3701_v61  ;;  %3115 = vmatprep.mubr.msk.bf16.mxu1 %vm4479_vm3, %v4627_v19  ;;  %v3706_v19 = vld [vmem:[#allocation8 + $0x168] sm:$0xff]  }
 0x14a   : > { %3130 = vmatpush3.bf16.msra.mxu1 %v3701_v61  ;;  %3254 = vmatpush3.bf16.msra.mxu0 %v3698_v52  ;;  %v4952_v61 = vld [vmem:[#allocation10] ss:$0 sm:$0xff] }
 0x14b   : > { %3131 = vmatprep.subr.bf16.mxu1 %v3703_v42  ;;  %3255 = vmatprep.subr.bf16.mxu0 %v3700_v0 }
 0x14d   : > { %3116 = vmatmul.mubr.msk.bf16.gmra.mrb[8].mxu1 %vm4479_vm3, %v4671_v12  ;;  %3240 = vmatmul.mubr.bf16.gmra.mrb[4].mxu0 %v4813_v13  ;;  %v3709_v12 = vld [vmem:[#allocation8 + $0x78] sm:$0xff]  }
 0x14e   : > { %3132 = vmatpush3.bf16.msra.mxu1 %v3703_v42  ;;  %3256 = vmatpush3.bf16.msra.mxu0 %v3700_v0 }
 0x14f   : > { %3243 = vmatprep.mubr.bf16.mxu0 %v4831_v25  ;;  %3257 = vmatprep.subr.bf16.mxu0 %v3702_v1 }
 0x150   : > { %3133 = vmatprep.subr.bf16.mxu1 %v3705_v31  ;;  %3119 = vmatprep.mubr.msk.bf16.mxu1 %vm4479_vm3, %v4695_v49  ;;  %v3708_v49 = vld [vmem:[#allocation8 + $0x170] sm:$0xff]  }
 0x152   : > { %3134 = vmatpush3.bf16.msra.mxu1 %v3705_v31  ;;  %3258 = vmatpush3.bf16.msra.mxu0 %v3702_v1 }
 0x153   : > { %3135 = vmatprep.subr.bf16.mxu1 %v3707_v63  ;;  %3259 = vmatprep.subr.bf16.mxu0 %v3704_v4 }
 0x155   : > { %3120 = vmatmul.mubr.msk.bf16.gmra.mrb[12].mxu1 %vm2820_vm13, %v4796_v34  ;;  %3244 = vmatmul.mubr.bf16.gmra.mrb[8].mxu0 %v4840_v39  ;;  %v3713_v34 = vld [vmem:[#allocation8 + $0x210] sm:$0xff]  }
 0x156   : > { %3136 = vmatpush3.bf16.msra.mxu1 %v3707_v63  ;;  %3260 = vmatpush3.bf16.msra.mxu0 %v3704_v4 }
 0x157   : > { %3247 = vmatprep.mubr.bf16.mxu0 %v4850_v16  ;;  %3261 = vmatprep.subr.bf16.mxu0 %v3706_v19 }
 0x158   : > { %3137 = vmatprep.subr.bf16.mxu1 %v3709_v12  ;;  %3139 = vmatprep.mubr.bf16.mxu1 %v4866_v58 }
 0x15a   : > { %3138 = vmatpush3.bf16.msra.mxu1 %v3709_v12  ;;  %3262 = vmatpush3.bf16.msra.mxu0 %v3706_v19 }
 0x15b   : > { %3315 = vmatprep.subr.bf16.mxu1 %v3711_v38  ;;  %3263 = vmatprep.subr.bf16.mxu0 %v3708_v49 }
 0x15d   : > { %3140 = vmatmul.mubr.bf16.vlgmr.msra.gmra.mrb[0].mxu1 %v4533_v29  ;;  %3248 = vmatmul.mubr.bf16.gmra.mrb[12].mxu0 %v4853_v54  ;;  %v3715_v29 = vld [vmem:[#allocation8 + $0x220] sm:$0xff]  }
 0x15e   : > { %3323 = vmatpush3.bf16.msra.mxu1 %v3711_v38  ;;  %3264 = vmatpush3.bf16.msra.mxu0 %v3708_v49 }
 0x15f   : > { %3267 = vmatprep.mubr.bf16.mxu0 %v4713_v5  ;;  %3265 = vmatprep.subr.bf16.mxu0 %v3710_v6 }
 0x160   : > { %3316 = vmatprep.subr.bf16.mxu1 %v3712_v15  ;;  %3143 = vmatprep.mubr.bf16.mxu1 %v4543_v40  ;;  %v3716_v40 = vld [vmem:[#allocation8 + $0x228] sm:$0xff]  }
 0x162   : > { %3324 = vmatpush3.bf16.msra.mxu1 %v3712_v15  ;;  %3266 = vmatpush3.bf16.msra.mxu0 %v3710_v6 }
 0x163   : > { %3317 = vmatprep.subr.bf16.mxu1 %v3713_v34  ;;  %3283 = vmatprep.subr.bf16.mxu0 %v3711_v38 }
 0x165   : > { %3144 = vmatmul.mubr.bf16.gmra.mrb[4].mxu1 %v4597_v35  ;;  %3268 = vmatmul.mubr.bf16.vlgmr.msra.gmra.mrb[0].mxu0 %v4807_v46  ;;  %v3717_v35 = vld [vmem:[#allocation8 + $0x230] sm:$0xff]  }
 0x166   : > { %3325 = vmatpush3.bf16.msra.mxu1 %v3713_v34  ;;  %3284 = vmatpush3.bf16.msra.mxu0 %v3711_v38 }
 0x167   : > { %3271 = vmatprep.mubr.bf16.mxu0 %v4813_v13  ;;  %3285 = vmatprep.subr.bf16.mxu0 %v3712_v15 }
 0x168   : > { %3318 = vmatprep.subr.bf16.mxu1 %v3714_v11  ;;  %3147 = vmatprep.mubr.bf16.mxu1 %v4618_v9  ;;  %v3718_v9 = vld [vmem:[#allocation8 + $0x238] sm:$0xff]  }
 0x16a   : > { %3326 = vmatpush3.bf16.msra.mxu1 %v3714_v11  ;;  %3286 = vmatpush3.bf16.msra.mxu0 %v3712_v15 }
 0x16b   : > { %3319 = vmatprep.subr.bf16.mxu1 %v3715_v29  ;;  %3287 = vmatprep.subr.bf16.mxu0 %v3713_v34 }
 0x16d   : > { %3148 = vmatmul.mubr.bf16.gmra.mrb[8].mxu1 %v4658_v3  ;;  %3272 = vmatmul.mubr.bf16.gmra.mrb[4].mxu0 %v4831_v25 }
 0x16e   : > { %3327 = vmatpush3.bf16.msra.mxu1 %v3715_v29  ;;  %3288 = vmatpush3.bf16.msra.mxu0 %v3713_v34 }
 0x16f   : > { %3275 = vmatprep.mubr.bf16.mxu0 %v4840_v39  ;;  %3289 = vmatprep.subr.bf16.mxu0 %v3714_v11 }
 0x170   : > { %3320 = vmatprep.subr.bf16.mxu1 %v3716_v40  ;;  %3151 = vmatprep.mubr.bf16.mxu1 %v4685_v7 }
 0x172   : > { %3328 = vmatpush3.bf16.msra.mxu1 %v3716_v40  ;;  %3290 = vmatpush3.bf16.msra.mxu0 %v3714_v11 }
 0x173   : > { %3321 = vmatprep.subr.bf16.mxu1 %v3717_v35  ;;  %3291 = vmatprep.subr.bf16.mxu0 %v3715_v29 }
 0x175   : > { %3152 = vmatmul.mubr.bf16.gmra.mrb[12].mxu1 %v4739_v33  ;;  %3276 = vmatmul.mubr.bf16.gmra.mrb[8].mxu0 %v4850_v16 }
 0x176   : > { %3329 = vmatpush3.bf16.msra.mxu1 %v3717_v35  ;;  %3292 = vmatpush3.bf16.msra.mxu0 %v3715_v29 }
 0x177   : > { %3279 = vmatprep.mubr.bf16.mxu0 %v4853_v54  ;;  %3293 = vmatprep.subr.bf16.mxu0 %v3716_v40 }
 0x178   : > { %3322 = vmatprep.subr.bf16.mxu1 %v3718_v9  ;;  %3307 = vmatprep.mubr.bf16.mxu1 %v4850_v16 }
 0x17a   : > { %3330 = vmatpush3.bf16.msra.mxu1 %v3718_v9  ;;  %3294 = vmatpush3.bf16.msra.mxu0 %v3716_v40 }
 0x17b   : > { %3295 = vmatprep.subr.bf16.mxu0 %v3717_v35 }
 0x17d   : > { %3308 = vmatmul.mubr.bf16.vlgmr.msra.gmra.mrb[16].mxu1 %v4853_v54  ;;  %3280 = vmatmul.mubr.bf16.gmra.mrb[12].mxu0 %v4870_v59 }
 0x17e   : > { %3311 = vmatprep.mubr.bf16.mxu1 %v4870_v59  ;;  %3296 = vmatpush3.bf16.msra.mxu0 %v3717_v35 }
 0x17f   : > { %3299 = vmatprep.mubr.bf16.mxu0 %v4807_v46  ;;  %3297 = vmatprep.subr.bf16.mxu0 %v3718_v9 }
 0x182   : > { %3298 = vmatpush3.bf16.msra.mxu0 %v3718_v9 }
 0x185   : > { %3312 = vmatmul.mubr.bf16.gmra.mrb[20].mxu1 %v4877_v26  ;;  %3300 = vmatmul.mubr.bf16.vlgmr.msra.gmra.mrb[0].mxu0 %v4813_v13 }
 0x186   : > { %3303 = vmatprep.mubr.bf16.mxu0 %v4831_v25 }
 0x18d   : > { %3304 = vmatmul.mubr.bf16.gmra.mrb[4].mxu0 %v4840_v39 }
 0x230   : > { %v3141_v3 = vpop.f32.mrb[0].mxu1 }
 0x231   : > { %v1337_v7 = vpop.f32.mrb[1].mxu1 }
 0x232   : > { %v3142_v5 = vpop.f32.mrb[2].mxu1 }
 0x233   : > { %v1340_v33 = vpop.f32.mrb[3].mxu1 }
 0x238   : > { %v3145_v14 = vpop.f32.mrb[4].mxu1 }
 0x239   : > { %v4940_v30 = vpop.f32.mrb[5].mxu1 }
 0x23a   : > { %v4942_v20 = vpop.f32.mrb[6].mxu1 }
 0x23b   : > { %v4944_v46 = vpop.f32.mrb[7].mxu1 }
 0x240   : > { %v3149_v51 = vpop.f32.mrb[8].mxu1 }
 0x241   : > { %v1369_v23 = vpop.f32.mrb[9].mxu1 }
 0x242   : > { %v3150_v62 = vpop.f32.mrb[10].mxu1 }
 0x243   : > { %v1372_v16 = vpop.f32.mrb[11].mxu1 }
 0x248   : > { %v3153_v13 = vpop.f32.mrb[12].mxu1  ;;  %v3277_v27 = vpop.f32.mrb[8].mxu0 }
 0x249   : > { %v1385_v25 = vpop.f32.mrb[13].mxu1  ;;  %v3339_v54 = vadd.f32 %v3277_v27, %v3149_v51  ;;  %v2142_v39 = vpop.f32.mrb[9].mxu0 }
 0x24a   : > { %v3154_v43 = vpop.f32.mrb[14].mxu1  ;;  %v3341_v24 = vadd.f32 %v2142_v39, %v1369_v23  ;;  %v3278_v56 = vpop.f32.mrb[10].mxu0 }
 0x24b   : > { %v1388_v44 = vpop.f32.mrb[15].mxu1  ;;  %v3343_v8 = vadd.f32 %v3278_v56, %v3150_v62  ;;  %v2145_v21 = vpop.f32.mrb[11].mxu0 }
 0x24c   : > { %v3345_v37 = vadd.f32 %v2145_v21, %v1372_v16 }
 0x250   : > { %v3309_v53 = vpop.f32.mrb[16].mxu1  ;;  %v3281_v17 = vpop.f32.mrb[12].mxu0 }
 0x251   : > { %v4946_v2 = vadd.f32 %v3339_v54, %v3309_v53  ;;  %v2320_v32 = vpop.f32.mrb[17].mxu1  ;;  %v3347_v58 = vadd.f32 %v3281_v17, %v3153_v13  ;;  %v2158_v50 = vpop.f32.mrb[13].mxu0 }
 0x252   : > { %v3342_v59 = vadd.f32 %v3341_v24, %v2320_v32  ;;  %v3310_v41 = vpop.f32.mrb[18].mxu1  ;;  %v3349_v48 = vadd.f32 %v2158_v50, %v1385_v25  ;;  %v3282_v36 = vpop.f32.mrb[14].mxu0 }
 0x253   : > { %v4948_v26 = vadd.f32 %v3343_v8, %v3310_v41  ;;  %v2323_v28 = vpop.f32.mrb[19].mxu1  ;;  %v3351_v47 = vadd.f32 %v3282_v36, %v3154_v43  ;;  %v2161_v18 = vpop.f32.mrb[15].mxu0 }
 0x254   : > { %v3346_v10 = vadd.f32 %v3345_v37, %v2323_v28  ;;  %v3353_v55 = vadd.f32 %v2161_v18, %v1388_v44  ;;  %v5002_v53 = vadd.f32 %v3342_v59, %v4952_v61  ;;  %v5015_v28 = vadd.f32 %v4946_v2, %v4952_v61 }
 0x256   : > { %v5008_v50 = vadd.f32 %v3346_v10, %v4952_v61  ;;  %v2419_v59 = vmul.f32 %v5002_v53, %v5002_v53  ;;  %v2385_v10 = vadd.f32 %v4948_v26, %v4952_v61 }
 0x258   : > { %v3313_v22 = vpop.f32.mrb[20].mxu1  ;;  %v3301_v45 = vpop.f32.mrb[0].mxu0 }
 0x259   : > { %v4950_v57 = vadd.f32 %v3347_v58, %v3313_v22  ;;  %v2336_v60 = vpop.f32.mrb[21].mxu1  ;;  %v3331_v52 = vadd.f32 %v3301_v45, %v3141_v3  ;;  %v2288_v42 = vpop.f32.mrb[1].mxu0 }
 0x25a   : > { %v3350_v0 = vadd.f32 %v3349_v48, %v2336_v60  ;;  %v3314_v1 = vpop.f32.mrb[22].mxu1  ;;  %v3332_v31 = vadd.f32 %v2288_v42, %v1337_v7  ;;  %v3302_v63 = vpop.f32.mrb[2].mxu0  ;;  %v2421_v60 = vmul.f32 %v5015_v28, %v5015_v28 }
 0x25b   : > { %v4954_v4 = vadd.f32 %v3351_v47, %v3314_v1  ;;  %v2339_v19 = vpop.f32.mrb[23].mxu1  ;;  %v3333_v12 = vadd.f32 %v3302_v63, %v3142_v5  ;;  %v2291_v38 = vpop.f32.mrb[3].mxu0  ;;  %v4960_v34 = vadd.f32 %v3331_v52, %v4952_v61  ;;  %v2422_v1 = vmul.f32 %v2385_v10, %v2385_v10 }
 0x25c   : > { %v3354_v49 = vadd.f32 %v3353_v55, %v2339_v19  ;;  %v4957_v6 = vadd.f32 %v3332_v31, %v4952_v61  ;;  %v3334_v15 = vadd.f32 %v2291_v38, %v1340_v33  ;;  %v2420_v55 = vmul.f32 %v5008_v50, %v5008_v50 }
 0x25d   : > { %v4966_v29 = vadd.f32 %v3333_v12, %v4952_v61  ;;  %v2413_v33 = vmul.f32 %v4960_v34, %v4960_v34  ;;  %v2386_v2 = vadd.f32 %v3350_v0, %v4952_v61  ;;  %v2388_v26 = vadd.f32 %v4950_v57, %v4952_v61 }
 0x25e   : > { %v4963_v11 = vadd.f32 %v3334_v15, %v4952_v61  ;;  %v2411_v40 = vmul.f32 %v4957_v6, %v4957_v6  ;;  %v2387_v31 = vadd.f32 %v3354_v49, %v4952_v61 }
 0x25f   : > { %v2414_v13 = vmul.f32 %v4966_v29, %v4966_v29  ;;  %v2423_v12 = vmul.f32 %v2386_v2, %v2386_v2 }
 0x260   : > { %v2390_v35 = vadd.f32 %v4963_v11, %v4957_v6  ;;  %v2412_v9 = vmul.f32 %v4963_v11, %v4963_v11  ;;  %v3305_v3 = vpop.f32.mrb[4].mxu0 }
 0x261   : > { %v3335_v7 = vadd.f32 %v3305_v3, %v3145_v14  ;;  %v2304_v5 = vpop.f32.mrb[5].mxu0  ;;  %v2425_v3 = vmul.f32 %v2388_v26, %v2388_v26 }
 0x262   : > { %v2391_v51 = vadd.f32 %v2390_v35, %v4960_v34  ;;  %v2427_v23 = vadd.f32 %v2412_v9, %v2411_v40  ;;  %v3336_v62 = vadd.f32 %v2304_v5, %v4940_v30  ;;  %v3306_v16 = vpop.f32.mrb[6].mxu0  ;;  %v2389_v40 = vadd.f32 %v4954_v4, %v4952_v61 }
 0x263   : > { %v3337_v27 = vadd.f32 %v3306_v16, %v4942_v20  ;;  %v2307_v25 = vpop.f32.mrb[7].mxu0  ;;  %v4987_v24 = vadd.f32 %v3335_v7, %v4952_v61  ;;  %v2424_v9 = vmul.f32 %v2387_v31, %v2387_v31 }
 0x264   : > { %v2428_v54 = vadd.f32 %v2427_v23, %v2413_v33  ;;  %v4982_v39 = vadd.f32 %v3336_v62, %v4952_v61  ;;  %v2392_v14 = vadd.f32 %v2391_v51, %v4966_v29  ;;  %v3338_v43 = vadd.f32 %v2307_v25, %v4944_v46 }
 0x265   : > { %v4996_v21 = vadd.f32 %v3337_v27, %v4952_v61  ;;  %v2417_v17 = vmul.f32 %v4987_v24, %v4987_v24  ;;  %v2426_v33 = vmul.f32 %v2389_v40, %v2389_v40 }
 0x266   : > { %v2393_v30 = vadd.f32 %v2392_v14, %v4982_v39  ;;  %v2415_v56 = vmul.f32 %v4982_v39, %v4982_v39  ;;  %v2429_v44 = vadd.f32 %v2428_v54, %v2414_v13  ;;  %v4993_v20 = vadd.f32 %v3338_v43, %v4952_v61 }
 0x267   : > { %v2418_v41 = vmul.f32 %v4996_v21, %v4996_v21 }
 0x268   : > { %v2430_v8 = vadd.f32 %v2429_v44, %v2415_v56  ;;  %v2394_v37 = vadd.f32 %v2393_v30, %v4993_v20  ;;  %v2416_v46 = vmul.f32 %v4993_v20, %v4993_v20  ;;  %v4087_v56 = vmov (!%p2872_p12), 0.0  }
 0x269   : > { %2452 = vst [vmem:[%s5039_s23] sm:$0x1] (!%p2872_p12), %v4087_v56  ;;  %2453 = vst [vmem:[%s5043_s18] sm:$0x1] (!%p2872_p12), %v4087_v56 }
 0x26a   : > { %v2395_v32 = vadd.f32 %v2394_v37, %v4987_v24  ;;  %v2431_v58 = vadd.f32 %v2430_v8, %v2416_v46 }
 0x26c   : > { %v2396_v48 = vadd.f32 %v2395_v32, %v4996_v21  ;;  %v2432_v36 = vadd.f32 %v2431_v58, %v2417_v17 }
 0x26e   : > { %v2397_v47 = vadd.f32 %v2396_v48, %v5002_v53  ;;  %v2433_v18 = vadd.f32 %v2432_v36, %v2418_v41 }
 0x270   : > { %v2434_v22 = vadd.f32 %v2433_v18, %v2419_v59  ;;  %v2398_v45 = vadd.f32 %v2397_v47, %v5008_v50 }
 0x272   : > { %v2399_v52 = vadd.f32 %v2398_v45, %v5015_v28  ;;  %v2435_v42 = vadd.f32 %v2434_v22, %v2420_v55 }
 0x274   : > { %v2400_v63 = vadd.f32 %v2399_v52, %v2385_v10  ;;  %v2436_v19 = vadd.f32 %v2435_v42, %v2421_v60 }
 0x276   : > { %v2401_v38 = vadd.f32 %v2400_v63, %v2386_v2  ;;  %v2437_v15 = vadd.f32 %v2436_v19, %v2422_v1 }
 0x278   : > { %v2402_v35 = vadd.f32 %v2401_v38, %v2387_v31  ;;  %v2438_v0 = vadd.f32 %v2437_v15, %v2423_v12 }
 0x27a   : > { %v2403_v7 = vadd.f32 %v2402_v35, %v2388_v26  ;;  %v2439_v5 = vadd.f32 %v2438_v0, %v2424_v9 }
 0x27c   : > { %v2404_v49 = vadd.f32 %v2403_v7, %v2389_v40  ;;  %v2440_v51 = vadd.f32 %v2439_v5, %v2425_v3 }
 0x27e   : > { %v2405_v23 = vrot.slane %v2404_v49, 4  ;;  %v2441_v57 = vadd.f32 %v2440_v51, %v2426_v33 }
 0x280   : > { %v2406_v62 = vadd.f32 %v2405_v23, %v2404_v49  ;;  %v2442_v16 = vrot.slane %v2441_v57, 4 }
 0x282   : > { %v2407_v13 = vrot.slane %v2406_v62, 2  ;;  %v2443_v27 = vadd.f32 %v2442_v16, %v2441_v57 }
 0x284   : > { %v2408_v25 = vadd.f32 %v2407_v13, %v2406_v62  ;;  %v2444_v61 = vrot.slane %v2443_v27, 2  ;;  %2451 = sbr.rel (%p2872_p12) target bundleno = 651 (0x28b), region = 64 }
 0x286   : > { %v2409_v4 = vrot.slane %v2408_v25, 1  ;;  %v2445_v54 = vadd.f32 %v2444_v61, %v2443_v27 }
 0x288   : > { %v2410_v14 = vadd.f32 %v2409_v4, %v2408_v25  ;;  %v2446_v43 = vrot.slane %v2445_v54, 1 }
 0x28a   : > { %v2447_v30 = vadd.f32 %v2446_v43, %v2445_v54 }
 0x28b PF: > { %v2454_v44 = vld [vmem:[%s5039_s23] sm:$0x1]  ;;  %2460 = vst [vmem:[%s5035_s10] sm:$0xff] %v4957_v6  ;;  %2461 = vst [vmem:[%s5035_s10 + $0x8] sm:$0xff] %v4963_v11  ;;  %s5317_s1 = sld [smem:[#allocation24_spill]]  ;;  %s5318_s28 = sld [smem:[#allocation29_spill]] }
 0x28c   : > { %v2457_v8 = vld [vmem:[%s5043_s18] sm:$0x1]  ;;  %2462 = vst [vmem:[%s5035_s10 + $0x10] sm:$0xff] %v4960_v34  ;;  %2463 = vst [vmem:[%s5035_s10 + $0x18] sm:$0xff] %v4966_v29  ;;  %s2481_s3 = sand.u32 1, %s4200_s15   ;;  %v2455_v6 = vadd.f32 %v2454_v44, %v2410_v14  ;;  %s5319_s4 = sld [smem:[#allocation40_spill]] }
 0x28d   : > { %2464 = vst [vmem:[%s5035_s10 + $0x20] sm:$0xff] %v4982_v39  ;;  %2465 = vst [vmem:[%s5035_s10 + $0x28] sm:$0xff] %v4993_v20  ;;  %v2458_v34 = vadd.f32 %v2457_v8, %v2447_v30  ;;  %s2517_s7 = sshll.u32 %s5039_s23, 4  ;;  %s5320_s6 = sld [smem:[#allocation41_spill]]  ;;  %s2518_s7 = int_to_ptr.vmem [resolvable:$true] %s2517_s7 }
 0x28e   : > { %2466 = vst [vmem:[%s5035_s10 + $0x30] sm:$0xff] %v4987_v24  ;;  %2467 = vst [vmem:[%s5035_s10 + $0x38] sm:$0xff] %v4996_v21  ;;  %s5092_s25 = scalar_lea.sflag [#allocation13], %s2481_s3  ;;  %s3861_s15 = scalar_lea.vmem %s2518_s7, 16 }
 0x28f   : > { %2468 = vst [vmem:[%s5035_s10 + $0x40] sm:$0xff] %v5002_v53  ;;  %2469 = vst [vmem:[%s5035_s10 + $0x48] sm:$0xff] %v5008_v50  ;;  %p3862_p2 = scmp.ne.s32.totalorder %s2518_s7, %s3861_s15  ;;  %s4088_s0 = smov [#allocation12]  }
 0x290   : > { %2470 = vst [vmem:[%s5035_s10 + $0x50] sm:$0xff] %v5015_v28  ;;  %2471 = vst [vmem:[%s5035_s10 + $0x58] sm:$0xff] %v2385_v10  ;;  %s3865_s21 = sshll.u32 %s4088_s0, 4  ;;  %s3866_s21 = int_to_ptr.vmem [resolvable:$false] %s3865_s21 }
 0x291   : > { %2472 = vst [vmem:[%s5035_s10 + $0x60] sm:$0xff] %v2386_v2  ;;  %2473 = vst [vmem:[%s5035_s10 + $0x68] sm:$0xff] %v2387_v31  ;;  %s2878_s20 = sshll.u32 %s5317_s1, 4  ;;  %p5321_p9 = scmp.ne.s32.totalorder %s5318_s28, 0 }
 0x292   : > { %2474 = vst [vmem:[%s5035_s10 + $0x70] sm:$0xff] %v2388_v26  ;;  %2475 = vst [vmem:[%s5035_s10 + $0x78] sm:$0xff] %v2389_v40  ;;  %s5082_s22 = scalar_lea.hbm %s5319_s4, %s2878_s20  ;;  %s3867_s5 = scalar_lea.vmem %s3866_s21, 32 }
 0x293   : > { %s5088_s2 = scalar_lea.hbm %s5320_s6, %s2878_s20  ;;  %2456 = vst [vmem:[%s5039_s23] sm:$0x1] %v2455_v6  ;;  %2459 = vst [vmem:[%s5043_s18] sm:$0x1] %v2458_v34  ;;  %p3863_p0 = pnand %p3862_p2, %p5321_p9 }
 0x294   : > { %p3868_p1 = scmp.lt.s32.totalorder %s2518_s7, %s3866_s21  ;;  %p3869_p11 = scmp.lt.s32.totalorder %s3867_s5, %s3861_s15 }
 0x295   : > { %p3864_p8 = pneg %p3863_p0 }
 0x296   : > { %p3870_p5 = por %p3869_p11, %p3868_p1 }
 0x298   : > { %p3871_p13 = pnand %p3870_p5, %p3864_p8 }
 0x29a   : > { %3874 = shalt.err (!%p3871_p13)
}
 0x29b   : > { %s3875_s23 = scalar_lea.hbm %s5082_s22, 16  ;;  %s3879_s0 = scalar_lea.hbm %s5319_s4, 32 }
 0x29c   : > { %p3876_p7 = scmp.ne.s32.totalorder %s5082_s22, %s3875_s23  ;;  %p3880_p4 = scmp.lt.u32.totalorder %s5082_s22, %s5319_s4 }
 0x29d   : > { %p3881_p10 = scmp.lt.u32.totalorder %s3879_s0, %s3875_s23  ;;  %p3883_p2 = scmp.lt.u32.totalorder %s3875_s23, %s5082_s22 }
 0x29e   : > { %p3877_p6 = pnand %p3876_p7, %p5321_p9 }
 0x29f   : > { %p3882_p12 = por %p3881_p10, %p3880_p4 }
 0x2a0   : > { %p3878_p3 = pneg %p3877_p6 }
 0x2a1   : > { %p3884_p0 = por %p3883_p2, %p3882_p12 }
 0x2a3   : > { %p3885_p8 = pnand %p3884_p0, %p3878_p3 }
 0x2a5   : > { %3888 = shalt.err (!%p3885_p8)
}
 0x2a6   : > { %s5322_s15 = sld [smem:[#allocation23_spill]]  ;;  %s5323_s21 = sld [smem:[#allocation22_spill]] }
 0x2a7   : > { %s5324_s5 = sld [smem:[#allocation27_spill]]  ;;  %s2876_s20 = sshll.u32 %s5317_s1, 5 }
 0x2a8   : > { %3481 = dma.vmem_to_hbm [thread:$0]  (%p5321_p9), %s2518_s7, 16, %s5082_s22, %s5092_s25  }
 0x2a9   : > { %s2501_s0 = sshll.u32 %s5035_s10, 4  ;;  %s5325_s19 = sld [smem:[#allocation39_spill]]  ;;  %s5115_s0 = int_to_ptr.vmem [resolvable:$true] %s2501_s0 }
 0x2aa   : > { %s2530_s13 = sshll.u32 %s5043_s18, 4  ;;  %s3889_s22 = scalar_lea.vmem %s5115_s0, 2048  ;;  %s2531_s13 = int_to_ptr.vmem [resolvable:$true] %s2530_s13 }
 0x2ab   : > { %p3890_p1 = scmp.ne.s32.totalorder %s5115_s0, %s3889_s22  ;;  %s4089_s10 = smov [#allocation11]  }
 0x2ac   : > { %s2882_s3 = sshll.u32 %s5322_s15, 4  ;;  %s5326_s12 = sand.u32 1, %s5323_s21  }
 0x2ad   : > { %s2498_s17 = sadd.s32 %s2882_s3, %s2876_s20  ;;  %s5125_s24 = scalar_lea.sflag [#allocation4], %s5326_s12 }
 0x2ae   : > { %s2877_s11 = sshll.u32 %s2498_s17, 7  ;;  %p5327_p11 = scmp.ne.s32.totalorder %s5324_s5, 0 }
 0x2af   : > { %s5120_s30 = scalar_lea.hbm %s5325_s19, %s2877_s11  ;;  %s3893_s1 = sshll.u32 %s4089_s10, 4  ;;  %s3894_s1 = int_to_ptr.vmem [resolvable:$false] %s3893_s1 }
 0x2b0   : > { %p3891_p5 = pnand %p3890_p1, %p5327_p11  ;;  %s3895_s7 = scalar_lea.vmem %s3894_s1, 4096 }
 0x2b1   : > { %p3896_p7 = scmp.lt.s32.totalorder %s5115_s0, %s3894_s1  ;;  %p3897_p6 = scmp.lt.s32.totalorder %s3895_s7, %s3889_s22 }
 0x2b2   : > { %p3892_p13 = pneg %p3891_p5 }
 0x2b3   : > { %p3898_p3 = por %p3897_p6, %p3896_p7 }
 0x2b5   : > { %p3899_p4 = pnand %p3898_p3, %p3892_p13 }
 0x2b7   : > { %3902 = shalt.err (!%p3899_p4)
}
 0x2b8   : > { %s3903_s12 = scalar_lea.hbm %s5120_s30, 2048  ;;  %s3907_s21 = scalar_lea.hbm %s5325_s19, 8192 }
 0x2b9   : > { %p3904_p10 = scmp.ne.s32.totalorder %s5120_s30, %s3903_s12  ;;  %p3908_p0 = scmp.lt.u32.totalorder %s5120_s30, %s5325_s19 }
 0x2ba   : > { %p3909_p8 = scmp.lt.u32.totalorder %s3907_s21, %s3903_s12  ;;  %p3911_p5 = scmp.lt.u32.totalorder %s3903_s12, %s5120_s30 }
 0x2bb   : > { %p3905_p12 = pnand %p3904_p10, %p5327_p11 }
 0x2bc   : > { %p3910_p1 = por %p3909_p8, %p3908_p0 }
 0x2bd   : > { %p3906_p2 = pneg %p3905_p12 }
 0x2be   : > { %p3912_p13 = por %p3911_p5, %p3910_p1 }
 0x2c0   : > { %p3913_p7 = pnand %p3912_p13, %p3906_p2 }
 0x2c2   : > { %3916 = shalt.err (!%p3913_p7)
}
 0x2c3   : > { %s4090_s17 = smov 128   ;;  %s4091_s11 = smov 8  }
 0x2c4   : > { %3480 = dma.vmem_to_hbm [thread:$0]  (%p5327_p11), %s5115_s0, 2048, %s5120_s30, %s5125_s24, %s4090_s17, %s4090_s17, %s4091_s11  }
 0x2c5   : > { %s3917_s23 = scalar_lea.vmem %s2531_s13, 16  ;;  %s4092_s22 = smov [#allocation14]  }
 0x2c6   : > { %p3918_p6 = scmp.ne.s32.totalorder %s2531_s13, %s3917_s23  ;;  %s3921_s10 = sshll.u32 %s4092_s22, 4  ;;  %s3922_s10 = int_to_ptr.vmem [resolvable:$false] %s3921_s10 }
 0x2c7   : > { %s3923_s1 = scalar_lea.vmem %s3922_s10, 32  ;;  %p3924_p10 = scmp.lt.s32.totalorder %s2531_s13, %s3922_s10 }
 0x2c8   : > { %p3919_p3 = pnand %p3918_p6, %p5321_p9  ;;  %p3925_p12 = scmp.lt.s32.totalorder %s3923_s1, %s3917_s23 }
 0x2ca   : > { %p3920_p4 = pneg %p3919_p3  ;;  %p3926_p2 = por %p3925_p12, %p3924_p10 }
 0x2cc   : > { %p3927_p0 = pnand %p3926_p2, %p3920_p4 }
 0x2ce   : > { %3930 = shalt.err (!%p3927_p0)
}
 0x2cf   : > { %s3931_s30 = scalar_lea.hbm %s5088_s2, 16  ;;  %s3935_s5 = scalar_lea.hbm %s5320_s6, 32 }
 0x2d0   : > { %p3932_p11 = scmp.ne.s32.totalorder %s5088_s2, %s3931_s30  ;;  %p3936_p5 = scmp.lt.u32.totalorder %s5088_s2, %s5320_s6 }
 0x2d1   : > { %p3937_p13 = scmp.lt.u32.totalorder %s3935_s5, %s3931_s30  ;;  %p3939_p6 = scmp.lt.u32.totalorder %s3931_s30, %s5088_s2 }
 0x2d2   : > { %p3933_p8 = pnand %p3932_p11, %p5321_p9 }
 0x2d3   : > { %p3938_p7 = por %p3937_p13, %p3936_p5 }
 0x2d4   : > { %p3934_p1 = pneg %p3933_p8 }
 0x2d5   : > { %p3940_p3 = por %p3939_p6, %p3938_p7 }
 0x2d7   : > { %p3941_p4 = pnand %p3940_p3, %p3934_p1 }
 0x2d9   : > { %3944 = shalt.err (!%p3941_p4)
}
 0x2da   : > { %3482 = dma.vmem_to_hbm [thread:$0]  (%p5321_p9), %s2531_s13, 16, %s5088_s2, %s5092_s25  }
 0x2db PF: > { %s5328_s12 = sld [smem:[#allocation21_spill]]  ;;  %s5329_s4 = sld [smem:[#allocation28_spill]] }
 0x2dc   : > { %p3522_p10 = scmp.ge.s32.totalorder %s4075_s14, 2 }
 0x2e1   : > { %s2542_s15 = sand.u32 1, %s5328_s12   ;;  %p5330_p12 = scmp.ne.s32.totalorder %s5329_s4, 0 }
 0x2e2   : > { %s2543_s21 = scalar_lea.sflag [#allocation4], %s2542_s15 }
 0x2e3   : > { %p3504_p2 = pnand %p3522_p10, %p5330_p12 }
 0x2e5   : > { %4014 = dma.done.wait (!%p3504_p2), %s2543_s21, 2048  }
 0x2e6   : > { %4016 = vsyncadd (!%p3504_p2), %s2543_s21, 4294965248  ;;  %s5331_s3 = sadd.s32 4294967294, %s4075_s14   ;;  %s5332_s20 = sld [smem:[#allocation30_spill]] }
 0x2e7   : > { %s2551_s17 = sand.u32 1, %s5331_s3  }
 0x2e8   : > { %s2552_s28 = scalar_lea.sflag [#allocation13], %s2551_s17 }
 0x2ec   : > { %p5333_p0 = scmp.ne.s32.totalorder %s5332_s20, 0 }
 0x2ee   : > { %p3507_p11 = pnand %p3522_p10, %p5333_p0 }
 0x2f0   : > { %4018 = dma.done.wait (!%p3507_p11), %s2552_s28, 32  }
 0x2f1   : > { %4020 = vsyncadd (!%p3507_p11), %s2552_s28, 4294967264  ;;  %s29_s14 = sadd.s32 1, %s4075_s14   ;;  %s5335_s24 = sld [smem:[#allocation20_spill]] }
 0x2f2   : > { %p5178_p9 = scmp.ge.s32.totalorder %s29_s14, 6   ;;  %s5336_s2 = sld [smem:[#allocation22_spill]] }
 0x2f3   : > { %s5337_s11 = smov %s4365_s27  ;;  %s5338_s23 = sld [smem:[#allocation33_spill]] }
 0x2f4   : > { %s5339_s10 = sld [smem:[#allocation25_spill]]  ;;  %s5340_s22 = sld [smem:[#allocation26_spill]] }
 0x2f5   : > { %s5341_s12 = sld [smem:[#allocation31_spill]]  ;;  %s5342_s1 = sld [smem:[#allocation32_spill]] }
 0x2f6   : > { %s5344_s25 = smov %s4031_s26  ;;  %s5345_s26 = smov %s4371_s16 }
 0x2f7   : > { %s5347_s28 = smov %s4043_s29  ;;  %s5348_s29 = smov %s5337_s11 }
 0x2f8   : > { %s5346_s27 = smov %s5336_s2  ;;  %s5349_s30 = smov %s4051_s8 }
 0x2f9   : > { %s5350_s8 = smov %s4055_s9  ;;  %s5351_s9 = smov %s5338_s23 }
 0x2fa   : > { %s5352_s11 = smov %s5340_s22  ;;  %28 = sbr.rel (!%p5178_p9) target bundleno = 23 (0x17), region = 145 }
 0x2fb   : > { %s5353_s13 = smov %s5342_s1 }
 0x301   :  { %2564 = vsyncpa [#allocation3], 1 }
 0x302   :  { %2566 = vsyncpa [#allocation3 + $0x1], 1 }
 0x303   :  { %2567 = vsyncpa [#allocation6], 1 }
 0x304   :  { %2568 = vsyncpa [#allocation9], 1 }
 0x305   :  { %2569 = vsyncpa [#allocation4], 1 }
 0x306   :  { %2571 = vsyncpa [#allocation4 + $0x1], 1 }
 0x307   :  { %2572 = vsyncpa [#allocation13], 1 }
 0x308   :  { %2574 = vsyncpa [#allocation13 + $0x1], 1 }

</bundles_post_ra>
